<compile_context>
chip_gen: v5e
topology: v5e:2x2
jax: 0.10.0
libtpu: 0.0.40
codegen_flags: <defaults>
</compile_context>

<pallas_src>
import functools

import jax
import jax.numpy as jnp
from jax.experimental import pallas as pl
from jax.experimental.pallas import tpu as pltpu


def _padded_conv_kernel(x_ref, w_ref, b_ref, o_ref, xpf_ref, rhs_ref, *,
                        KH, KW, SH, SW, H, W, WO, THO, CIN,
                        PAD_UP, PAD_DOWN, PAD_LEFT, PAD_RIGHT):
    # x_ref:   (CIN, H, W)          one batch element, NCHW layout (W on lanes)
    # w_ref:   (COUT, KH*KW*CIN)    flattened weights, (kh, kw, cin) minor order
    # b_ref:   (COUT, 1)
    # o_ref:   (COUT, THO*WO)       flat, lane-dense output rows of this tile
    # xpf_ref: (CIN, HP, WP)        scratch: reflection-padded image (per batch)
    # rhs_ref: (KH*KW*CIN, THO*WO)  scratch: im2col RHS for this row tile
    t = pl.program_id(1)

    # ---- Phase 1 (once per batch element): build the reflection-padded image.
    # Interior is one big static copy; the borders are a handful of static
    # row/column copies (pad = k - s is tiny).
    @pl.when(t == 0)
    def _build_padded_image():
        xpf_ref[:, PAD_UP:PAD_UP + H, PAD_LEFT:PAD_LEFT + W] = x_ref[...]
        for j in range(PAD_UP):          # padded row j <- input row (PAD_UP - j)
            xpf_ref[:, j:j + 1, PAD_LEFT:PAD_LEFT + W] = \
                x_ref[:, PAD_UP - j:PAD_UP - j + 1, :]
        for j in range(PAD_DOWN):        # padded row PAD_UP+H+j <- input row H-2-j
            rd = PAD_UP + H + j
            xpf_ref[:, rd:rd + 1, PAD_LEFT:PAD_LEFT + W] = \
                x_ref[:, H - 2 - j:H - 1 - j, :]
        for j in range(PAD_LEFT):        # padded col j <- padded col 2*PAD_LEFT-j
            xpf_ref[:, :, j:j + 1] = xpf_ref[:, :, 2 * PAD_LEFT - j:2 * PAD_LEFT - j + 1]
        for j in range(PAD_RIGHT):       # padded col PL+W+j <- padded col PL+W-2-j
            cd = PAD_LEFT + W + j
            cs = PAD_LEFT + W - 2 - j
            xpf_ref[:, :, cd:cd + 1] = xpf_ref[:, :, cs:cs + 1]

    # ---- Phase 2: im2col RHS for this row tile.  Row strides (SH) are pure
    # scalar addressing; column strides (SW) are static slices of a loaded row.
    prow0 = t * (THO * SH)               # first padded row touched by this tile
    for r in range(THO):                 # static unroll (THO is small by design)
        for kh in range(KH):
            prow = xpf_ref[:, pl.ds(prow0 + r * SH + kh, 1), :][:, 0, :]   # (CIN, WP)
            for kw in range(KW):
                if SW > 1:
                    piece = prow[:, kw:kw + SW * WO:SW]
                else:
                    piece = prow[:, kw:kw + WO]
                k0 = (kh * KW + kw) * CIN
                rhs_ref[k0:k0 + CIN, r * WO:(r + 1) * WO] = piece

    # ---- Phase 3: one MXU matmul over the folded contraction; result is
    # lane-dense (COUT, THO*WO) -> unmasked stores, contiguous HBM writeback.
    acc = jnp.dot(w_ref[...], rhs_ref[...], preferred_element_type=jnp.float32)
    acc = acc + b_ref[...].astype(jnp.float32)
    o_ref[...] = acc.astype(o_ref.dtype)


def _round_up(v, m):
    return (v + m - 1) // m * m


def _pick_row_tile(HO, WO, CIN, COUT, KHKW, itemsize,
                   budget=4 * 1024 * 1024, max_rows=256):
    """Largest divisor of HO whose per-tile footprint fits the budget, keeping the
    stored output block lane-aligned (multiple of 128) unless it spans all of HO."""
    def ok_align(d):
        return d == HO or (d * WO) % 128 == 0

    def cost(d):
        return (KHKW * CIN + 2 * COUT) * d * WO * itemsize

    cands = [d for d in range(1, HO + 1) if HO % d == 0 and ok_align(d)]
    good = [d for d in cands if cost(d) <= budget and d <= max_rows]
    if good:
        return max(good)
    return min(cands)


def padded_conv2d(x_nchw, weight_oihw, bias, ks, stride):
    """ReflectionPad2d([pl, pr, pu, pd]) followed by Conv2d(ks, stride, bias=True),
    matching the PyTorch PaddedConv2d module."""
    k_h, k_w = ks if isinstance(ks, tuple) else (ks, ks)
    s_h, s_w = stride if isinstance(stride, tuple) else (stride, stride)
    assert k_h >= s_h and k_w >= s_w, "reflection pad would be negative (k < s)"

    pad_h, pad_w = k_h - s_h, k_w - s_w
    pad_up, pad_left = pad_h // 2, pad_w // 2
    pad_down, pad_right = pad_h - pad_up, pad_w - pad_left

    N, CIN, H, W = x_nchw.shape
    COUT = weight_oihw.shape[0]
    if pad_up or pad_down:
        assert max(pad_up, pad_down) <= H - 1, "reflection pad must be < H"
    if pad_left or pad_right:
        assert max(pad_left, pad_right) <= W - 1, "reflection pad must be < W"

    HP, WP = H + pad_up + pad_down, W + pad_left + pad_right
    HO = (HP - k_h) // s_h + 1
    WO = (WP - k_w) // s_w + 1
    assert HO >= 1 and WO >= 1
    K = k_h * k_w * CIN

    itemsize = jnp.dtype(x_nchw.dtype).itemsize
    THO = _pick_row_tile(HO, WO, CIN, COUT, k_h * k_w, itemsize)
    T = HO // THO

    # Weight / bias prep (tiny tensors): (o, cin, kh, kw) -> (o, kh*kw*cin).
    w_flat = jnp.transpose(weight_oihw, (0, 2, 3, 1)).reshape(COUT, K)
    b2 = bias.reshape(COUT, 1)

    kernel = functools.partial(
        _padded_conv_kernel,
        KH=k_h, KW=k_w, SH=s_h, SW=s_w, H=H, W=W, WO=WO, THO=THO, CIN=CIN,
        PAD_UP=pad_up, PAD_DOWN=pad_down, PAD_LEFT=pad_left, PAD_RIGHT=pad_right)

    # Explicit VMEM budget: double-buffered in/out blocks + resident weights/bias
    # + the two scratch buffers (rough (8,128)-padded footprints).
    def tile_bytes(shape):
        s = list(shape)
        s[-1] = _round_up(s[-1], 128)
        if len(s) >= 2:
            s[-2] = _round_up(s[-2], 8)
        n = 1
        for d in s:
            n *= d
        return n * itemsize

    est = (2 * tile_bytes((CIN, H, W)) + 2 * tile_bytes((COUT, THO * WO))
           + tile_bytes((COUT, K)) + tile_bytes((COUT, 1))
           + tile_bytes((CIN, HP, WP)) + tile_bytes((K, THO * WO)))
    vmem_limit = int(min(48 * 2 ** 20, max(16 * 2 ** 20, 2 * est)))

    # TODO(synk): for very large CIN*H*W the whole image is kept resident per
    # batch; a halo-tiled input DMA would bound that, at the cost of per-tile
    # reflection handling.
    out_flat = pl.pallas_call(
        kernel,
        out_shape=jax.ShapeDtypeStruct((N, COUT, HO * WO), x_nchw.dtype),
        grid=(N, T),
        in_specs=[
            pl.BlockSpec((None, CIN, H, W), lambda n, t: (n, 0, 0, 0)),
            pl.BlockSpec((COUT, K), lambda n, t: (0, 0)),
            pl.BlockSpec((COUT, 1), lambda n, t: (0, 0)),
        ],
        out_specs=pl.BlockSpec((None, COUT, THO * WO), lambda n, t: (n, 0, t)),
        scratch_shapes=[
            pltpu.VMEM((CIN, HP, WP), x_nchw.dtype),
            pltpu.VMEM((K, THO * WO), x_nchw.dtype),
        ],
        compiler_params=pltpu.CompilerParams(
            dimension_semantics=("parallel", "arbitrary"),
            vmem_limit_bytes=vmem_limit),
    )(x_nchw, w_flat, b2)

    return out_flat.reshape(N, COUT, HO, WO)


if __name__ == "__main__":
    # PaddedConv2d(input_channels=4, output_channels=8, ks=3, stride=1)
    N, CIN, H, W = 2, 4, 16, 16
    COUT, KS, STRIDE = 8, 3, 1

    key = jax.random.PRNGKey(0)
    kx, kwt, kb = jax.random.split(key, 3)
    x = jax.random.normal(kx, (N, CIN, H, W), dtype=jnp.float32)
    # Deterministic parameter init (same shapes as nn.Conv2d(CIN, COUT, KS, STRIDE)).
    fan_in = CIN * KS * KS
    bound = 1.0 / (fan_in ** 0.5)
    weight = jax.random.uniform(kwt, (COUT, CIN, KS, KS), jnp.float32, -bound, bound)
    bias = jax.random.uniform(kb, (COUT,), jnp.float32, -bound, bound)

    out = padded_conv2d(x, weight, bias, KS, STRIDE)
    out = jax.block_until_ready(out)

    # Pure-JAX reference.
    xp = jnp.pad(x, ((0, 0), (0, 0), (1, 1), (1, 1)), mode='reflect')
    ref = jax.lax.conv_general_dilated(
        xp, weight, (STRIDE, STRIDE), 'VALID',
        dimension_numbers=('NCHW', 'OIHW', 'NCHW')) + bias.reshape(1, -1, 1, 1)

    assert out.shape == (N, COUT, H, W), out.shape
    err = float(jnp.max(jnp.abs(out - ref)))
    assert jnp.allclose(out, ref, atol=1e-3, rtol=1e-3), err
    print("KERNEL_OK")
</pallas_src>

<mosaic_0001>
module attributes {stable_mosaic.version = 11 : i64} {
  func.func @_padded_conv_kernel(%arg0: i32, %arg1: i32, %arg2: memref<1x4x16x16xf32, #tpu.memory_space<vmem>>, %arg3: memref<8x36xf32, #tpu.memory_space<vmem>>, %arg4: memref<8x1xf32, #tpu.memory_space<vmem>>, %arg5: memref<1x8x256xf32, #tpu.memory_space<vmem>>, %arg6: memref<4x18x18xf32, #tpu.memory_space<vmem>>, %arg7: memref<36x256xf32, #tpu.memory_space<vmem>>) attributes {dimension_semantics = [#tpu.dimension_semantics<parallel>, #tpu.dimension_semantics<arbitrary>], iteration_bounds = array<i64: 2, 1>, scalar_prefetch = 0 : i64, scratch_operands = 2 : i64, tpu.core_type = #tpu.core_type<tc>, window_params = [{transform_indices = @transform_0, window_bounds = array<i64: 1, 4, 16, 16>}, {pipeline_mode = #tpu.pipeline_mode<synchronous>, transform_indices = @transform_1, window_bounds = array<i64: 8, 36>}, {pipeline_mode = #tpu.pipeline_mode<synchronous>, transform_indices = @transform_2, window_bounds = array<i64: 8, 1>}, {transform_indices = @transform_3, window_bounds = array<i64: 1, 8, 256>}]} {
    %c0_i32 = arith.constant 0 : i32
    %0 = arith.cmpi eq, %arg1, %c0_i32 : i32
    %1 = arith.extui %0 : i1 to i32
    %c0_i32_0 = arith.constant 0 : i32
    %2 = arith.cmpi ne, %1, %c0_i32_0 : i32
    scf.if %2 {
      %c0_453 = arith.constant 0 : index
      %c0_454 = arith.constant 0 : index
      %c0_455 = arith.constant 0 : index
      %c0_456 = arith.constant 0 : index
      %541 = vector.load %arg2[%c0_453, %c0_454, %c0_455, %c0_456] : memref<1x4x16x16xf32, #tpu.memory_space<vmem>>, vector<1x4x16x16xf32>
      %542 = vector.shape_cast %541 : vector<1x4x16x16xf32> to vector<4x16x16xf32>
      %c0_457 = arith.constant 0 : index
      %c1 = arith.constant 1 : index
      %c1_458 = arith.constant 1 : index
      %543 = vector.load %arg6[%c0_457, %c1, %c1_458] : memref<4x18x18xf32, #tpu.memory_space<vmem>>, vector<4x16x16xf32>
      tpu.vector_store %arg6[%c0_457, %c1, %c1_458], %542 {strides = array<i32>} : memref<4x18x18xf32, #tpu.memory_space<vmem>>, vector<4x16x16xf32>,
      %c0_459 = arith.constant 0 : index
      %c0_460 = arith.constant 0 : index
      %c1_461 = arith.constant 1 : index
      %c0_462 = arith.constant 0 : index
      %544 = vector.load %arg2[%c0_459, %c0_460, %c1_461, %c0_462] : memref<1x4x16x16xf32, #tpu.memory_space<vmem>>, vector<1x4x1x16xf32>
      %545 = vector.shape_cast %544 : vector<1x4x1x16xf32> to vector<4x1x16xf32>
      %c0_463 = arith.constant 0 : index
      %c0_464 = arith.constant 0 : index
      %c1_465 = arith.constant 1 : index
      %546 = vector.load %arg6[%c0_463, %c0_464, %c1_465] : memref<4x18x18xf32, #tpu.memory_space<vmem>>, vector<4x1x16xf32>
      tpu.vector_store %arg6[%c0_463, %c0_464, %c1_465], %545 {strides = array<i32>} : memref<4x18x18xf32, #tpu.memory_space<vmem>>, vector<4x1x16xf32>,
      %c0_466 = arith.constant 0 : index
      %c0_467 = arith.constant 0 : index
      %c14 = arith.constant 14 : index
      %c0_468 = arith.constant 0 : index
      %547 = vector.load %arg2[%c0_466, %c0_467, %c14, %c0_468] : memref<1x4x16x16xf32, #tpu.memory_space<vmem>>, vector<1x4x1x16xf32>
      %548 = vector.shape_cast %547 : vector<1x4x1x16xf32> to vector<4x1x16xf32>
      %c0_469 = arith.constant 0 : index
      %c17 = arith.constant 17 : index
      %c1_470 = arith.constant 1 : index
      %549 = vector.load %arg6[%c0_469, %c17, %c1_470] : memref<4x18x18xf32, #tpu.memory_space<vmem>>, vector<4x1x16xf32>
      tpu.vector_store %arg6[%c0_469, %c17, %c1_470], %548 {strides = array<i32>} : memref<4x18x18xf32, #tpu.memory_space<vmem>>, vector<4x1x16xf32>,
      %c0_471 = arith.constant 0 : index
      %c0_472 = arith.constant 0 : index
      %c2 = arith.constant 2 : index
      %550 = vector.load %arg6[%c0_471, %c0_472, %c2] : memref<4x18x18xf32, #tpu.memory_space<vmem>>, vector<4x18x1xf32>
      %c0_473 = arith.constant 0 : index
      %c0_474 = arith.constant 0 : index
      %c0_475 = arith.constant 0 : index
      %551 = vector.load %arg6[%c0_473, %c0_474, %c0_475] : memref<4x18x18xf32, #tpu.memory_space<vmem>>, vector<4x18x1xf32>
      tpu.vector_store %arg6[%c0_473, %c0_474, %c0_475], %550 {strides = array<i32>} : memref<4x18x18xf32, #tpu.memory_space<vmem>>, vector<4x18x1xf32>,
      %c0_476 = arith.constant 0 : index
      %c0_477 = arith.constant 0 : index
      %c15 = arith.constant 15 : index
      %552 = vector.load %arg6[%c0_476, %c0_477, %c15] : memref<4x18x18xf32, #tpu.memory_space<vmem>>, vector<4x18x1xf32>
      %c0_478 = arith.constant 0 : index
      %c0_479 = arith.constant 0 : index
      %c17_480 = arith.constant 17 : index
      %553 = vector.load %arg6[%c0_478, %c0_479, %c17_480] : memref<4x18x18xf32, #tpu.memory_space<vmem>>, vector<4x18x1xf32>
      tpu.vector_store %arg6[%c0_478, %c0_479, %c17_480], %552 {strides = array<i32>} : memref<4x18x18xf32, #tpu.memory_space<vmem>>, vector<4x18x1xf32>,
    } else {
    }
    %c16_i32 = arith.constant 16 : i32
    %3 = arith.muli %arg1, %c16_i32 : i32
    %c0_i32_1 = arith.constant 0 : i32
    %4 = arith.addi %3, %c0_i32_1 : i32
    %c0_i32_2 = arith.constant 0 : i32
    %5 = arith.addi %4, %c0_i32_2 : i32
    %c0 = arith.constant 0 : index
    %6 = arith.index_cast %5 : i32 to index
    %c0_3 = arith.constant 0 : index
    %7 = vector.load %arg6[%c0, %6, %c0_3] : memref<4x18x18xf32, #tpu.memory_space<vmem>>, vector<4x1x18xf32>
    %8 = vector.shape_cast %7 : vector<4x1x18xf32> to vector<4x18xf32>
    %9 = vector.extract_strided_slice %8 {offsets = [0, 0], sizes = [4, 16], strides = [1, 1]} : vector<4x18xf32> to vector<4x16xf32>
    %c0_4 = arith.constant 0 : index
    %c0_5 = arith.constant 0 : index
    %10 = vector.load %arg7[%c0_4, %c0_5] : memref<36x256xf32, #tpu.memory_space<vmem>>, vector<4x16xf32>
    tpu.vector_store %arg7[%c0_4, %c0_5], %9 {strides = array<i32>} : memref<36x256xf32, #tpu.memory_space<vmem>>, vector<4x16xf32>,
    %11 = vector.extract_strided_slice %8 {offsets = [0, 1], sizes = [4, 16], strides = [1, 1]} : vector<4x18xf32> to vector<4x16xf32>
    %c4 = arith.constant 4 : index
    %c0_6 = arith.constant 0 : index
    %12 = vector.load %arg7[%c4, %c0_6] : memref<36x256xf32, #tpu.memory_space<vmem>>, vector<4x16xf32>
    tpu.vector_store %arg7[%c4, %c0_6], %11 {strides = array<i32>} : memref<36x256xf32, #tpu.memory_space<vmem>>, vector<4x16xf32>,
    %13 = vector.extract_strided_slice %8 {offsets = [0, 2], sizes = [4, 16], strides = [1, 1]} : vector<4x18xf32> to vector<4x16xf32>
    %c8 = arith.constant 8 : index
    %c0_7 = arith.constant 0 : index
    %14 = vector.load %arg7[%c8, %c0_7] : memref<36x256xf32, #tpu.memory_space<vmem>>, vector<4x16xf32>
    tpu.vector_store %arg7[%c8, %c0_7], %13 {strides = array<i32>} : memref<36x256xf32, #tpu.memory_space<vmem>>, vector<4x16xf32>,
    %c0_i32_8 = arith.constant 0 : i32
    %15 = arith.addi %3, %c0_i32_8 : i32
    %c1_i32 = arith.constant 1 : i32
    %16 = arith.addi %15, %c1_i32 : i32
    %c0_9 = arith.constant 0 : index
    %17 = arith.index_cast %16 : i32 to index
    %c0_10 = arith.constant 0 : index
    %18 = vector.load %arg6[%c0_9, %17, %c0_10] : memref<4x18x18xf32, #tpu.memory_space<vmem>>, vector<4x1x18xf32>
    %19 = vector.shape_cast %18 : vector<4x1x18xf32> to vector<4x18xf32>
    %20 = vector.extract_strided_slice %19 {offsets = [0, 0], sizes = [4, 16], strides = [1, 1]} : vector<4x18xf32> to vector<4x16xf32>
    %c12 = arith.constant 12 : index
    %c0_11 = arith.constant 0 : index
    %21 = vector.load %arg7[%c12, %c0_11] : memref<36x256xf32, #tpu.memory_space<vmem>>, vector<4x16xf32>
    tpu.vector_store %arg7[%c12, %c0_11], %20 {strides = array<i32>} : memref<36x256xf32, #tpu.memory_space<vmem>>, vector<4x16xf32>,
    %22 = vector.extract_strided_slice %19 {offsets = [0, 1], sizes = [4, 16], strides = [1, 1]} : vector<4x18xf32> to vector<4x16xf32>
    %c16 = arith.constant 16 : index
    %c0_12 = arith.constant 0 : index
    %23 = vector.load %arg7[%c16, %c0_12] : memref<36x256xf32, #tpu.memory_space<vmem>>, vector<4x16xf32>
    tpu.vector_store %arg7[%c16, %c0_12], %22 {strides = array<i32>} : memref<36x256xf32, #tpu.memory_space<vmem>>, vector<4x16xf32>,
    %24 = vector.extract_strided_slice %19 {offsets = [0, 2], sizes = [4, 16], strides = [1, 1]} : vector<4x18xf32> to vector<4x16xf32>
    %c20 = arith.constant 20 : index
    %c0_13 = arith.constant 0 : index
    %25 = vector.load %arg7[%c20, %c0_13] : memref<36x256xf32, #tpu.memory_space<vmem>>, vector<4x16xf32>
    tpu.vector_store %arg7[%c20, %c0_13], %24 {strides = array<i32>} : memref<36x256xf32, #tpu.memory_space<vmem>>, vector<4x16xf32>,
    %c0_i32_14 = arith.constant 0 : i32
    %26 = arith.addi %3, %c0_i32_14 : i32
    %c2_i32 = arith.constant 2 : i32
    %27 = arith.addi %26, %c2_i32 : i32
    %c0_15 = arith.constant 0 : index
    %28 = arith.index_cast %27 : i32 to index
    %c0_16 = arith.constant 0 : index
    %29 = vector.load %arg6[%c0_15, %28, %c0_16] : memref<4x18x18xf32, #tpu.memory_space<vmem>>, vector<4x1x18xf32>
    %30 = vector.shape_cast %29 : vector<4x1x18xf32> to vector<4x18xf32>
    %31 = vector.extract_strided_slice %30 {offsets = [0, 0], sizes = [4, 16], strides = [1, 1]} : vector<4x18xf32> to vector<4x16xf32>
    %c24 = arith.constant 24 : index
    %c0_17 = arith.constant 0 : index
    %32 = vector.load %arg7[%c24, %c0_17] : memref<36x256xf32, #tpu.memory_space<vmem>>, vector<4x16xf32>
    tpu.vector_store %arg7[%c24, %c0_17], %31 {strides = array<i32>} : memref<36x256xf32, #tpu.memory_space<vmem>>, vector<4x16xf32>,
    %33 = vector.extract_strided_slice %30 {offsets = [0, 1], sizes = [4, 16], strides = [1, 1]} : vector<4x18xf32> to vector<4x16xf32>
    %c28 = arith.constant 28 : index
    %c0_18 = arith.constant 0 : index
    %34 = vector.load %arg7[%c28, %c0_18] : memref<36x256xf32, #tpu.memory_space<vmem>>, vector<4x16xf32>
    tpu.vector_store %arg7[%c28, %c0_18], %33 {strides = array<i32>} : memref<36x256xf32, #tpu.memory_space<vmem>>, vector<4x16xf32>,
    %35 = vector.extract_strided_slice %30 {offsets = [0, 2], sizes = [4, 16], strides = [1, 1]} : vector<4x18xf32> to vector<4x16xf32>
    %c32 = arith.constant 32 : index
    %c0_19 = arith.constant 0 : index
    %36 = vector.load %arg7[%c32, %c0_19] : memref<36x256xf32, #tpu.memory_space<vmem>>, vector<4x16xf32>
    tpu.vector_store %arg7[%c32, %c0_19], %35 {strides = array<i32>} : memref<36x256xf32, #tpu.memory_space<vmem>>, vector<4x16xf32>,
    %c1_i32_20 = arith.constant 1 : i32
    %37 = arith.addi %3, %c1_i32_20 : i32
    %c0_i32_21 = arith.constant 0 : i32
    %38 = arith.addi %37, %c0_i32_21 : i32
    %c0_22 = arith.constant 0 : index
    %39 = arith.index_cast %38 : i32 to index
    %c0_23 = arith.constant 0 : index
    %40 = vector.load %arg6[%c0_22, %39, %c0_23] : memref<4x18x18xf32, #tpu.memory_space<vmem>>, vector<4x1x18xf32>
    %41 = vector.shape_cast %40 : vector<4x1x18xf32> to vector<4x18xf32>
    %42 = vector.extract_strided_slice %41 {offsets = [0, 0], sizes = [4, 16], strides = [1, 1]} : vector<4x18xf32> to vector<4x16xf32>
    %c0_24 = arith.constant 0 : index
    %c16_25 = arith.constant 16 : index
    %43 = vector.load %arg7[%c0_24, %c16_25] : memref<36x256xf32, #tpu.memory_space<vmem>>, vector<4x16xf32>
    tpu.vector_store %arg7[%c0_24, %c16_25], %42 {strides = array<i32>} : memref<36x256xf32, #tpu.memory_space<vmem>>, vector<4x16xf32>,
    %44 = vector.extract_strided_slice %41 {offsets = [0, 1], sizes = [4, 16], strides = [1, 1]} : vector<4x18xf32> to vector<4x16xf32>
    %c4_26 = arith.constant 4 : index
    %c16_27 = arith.constant 16 : index
    %45 = vector.load %arg7[%c4_26, %c16_27] : memref<36x256xf32, #tpu.memory_space<vmem>>, vector<4x16xf32>
    tpu.vector_store %arg7[%c4_26, %c16_27], %44 {strides = array<i32>} : memref<36x256xf32, #tpu.memory_space<vmem>>, vector<4x16xf32>,
    %46 = vector.extract_strided_slice %41 {offsets = [0, 2], sizes = [4, 16], strides = [1, 1]} : vector<4x18xf32> to vector<4x16xf32>
    %c8_28 = arith.constant 8 : index
    %c16_29 = arith.constant 16 : index
    %47 = vector.load %arg7[%c8_28, %c16_29] : memref<36x256xf32, #tpu.memory_space<vmem>>, vector<4x16xf32>
    tpu.vector_store %arg7[%c8_28, %c16_29], %46 {strides = array<i32>} : memref<36x256xf32, #tpu.memory_space<vmem>>, vector<4x16xf32>,
    %c1_i32_30 = arith.constant 1 : i32
    %48 = arith.addi %3, %c1_i32_30 : i32
    %c1_i32_31 = arith.constant 1 : i32
    %49 = arith.addi %48, %c1_i32_31 : i32
    %c0_32 = arith.constant 0 : index
    %50 = arith.index_cast %49 : i32 to index
    %c0_33 = arith.constant 0 : index
    %51 = vector.load %arg6[%c0_32, %50, %c0_33] : memref<4x18x18xf32, #tpu.memory_space<vmem>>, vector<4x1x18xf32>
    %52 = vector.shape_cast %51 : vector<4x1x18xf32> to vector<4x18xf32>
    %53 = vector.extract_strided_slice %52 {offsets = [0, 0], sizes = [4, 16], strides = [1, 1]} : vector<4x18xf32> to vector<4x16xf32>
    %c12_34 = arith.constant 12 : index
    %c16_35 = arith.constant 16 : index
    %54 = vector.load %arg7[%c12_34, %c16_35] : memref<36x256xf32, #tpu.memory_space<vmem>>, vector<4x16xf32>
    tpu.vector_store %arg7[%c12_34, %c16_35], %53 {strides = array<i32>} : memref<36x256xf32, #tpu.memory_space<vmem>>, vector<4x16xf32>,
    %55 = vector.extract_strided_slice %52 {offsets = [0, 1], sizes = [4, 16], strides = [1, 1]} : vector<4x18xf32> to vector<4x16xf32>
    %c16_36 = arith.constant 16 : index
    %c16_37 = arith.constant 16 : index
    %56 = vector.load %arg7[%c16_36, %c16_37] : memref<36x256xf32, #tpu.memory_space<vmem>>, vector<4x16xf32>
    tpu.vector_store %arg7[%c16_36, %c16_37], %55 {strides = array<i32>} : memref<36x256xf32, #tpu.memory_space<vmem>>, vector<4x16xf32>,
    %57 = vector.extract_strided_slice %52 {offsets = [0, 2], sizes = [4, 16], strides = [1, 1]} : vector<4x18xf32> to vector<4x16xf32>
    %c20_38 = arith.constant 20 : index
    %c16_39 = arith.constant 16 : index
    %58 = vector.load %arg7[%c20_38, %c16_39] : memref<36x256xf32, #tpu.memory_space<vmem>>, vector<4x16xf32>
    tpu.vector_store %arg7[%c20_38, %c16_39], %57 {strides = array<i32>} : memref<36x256xf32, #tpu.memory_space<vmem>>, vector<4x16xf32>,
    %c1_i32_40 = arith.constant 1 : i32
    %59 = arith.addi %3, %c1_i32_40 : i32
    %c2_i32_41 = arith.constant 2 : i32
    %60 = arith.addi %59, %c2_i32_41 : i32
    %c0_42 = arith.constant 0 : index
    %61 = arith.index_cast %60 : i32 to index
    %c0_43 = arith.constant 0 : index
    %62 = vector.load %arg6[%c0_42, %61, %c0_43] : memref<4x18x18xf32, #tpu.memory_space<vmem>>, vector<4x1x18xf32>
    %63 = vector.shape_cast %62 : vector<4x1x18xf32> to vector<4x18xf32>
    %64 = vector.extract_strided_slice %63 {offsets = [0, 0], sizes = [4, 16], strides = [1, 1]} : vector<4x18xf32> to vector<4x16xf32>
    %c24_44 = arith.constant 24 : index
    %c16_45 = arith.constant 16 : index
    %65 = vector.load %arg7[%c24_44, %c16_45] : memref<36x256xf32, #tpu.memory_space<vmem>>, vector<4x16xf32>
    tpu.vector_store %arg7[%c24_44, %c16_45], %64 {strides = array<i32>} : memref<36x256xf32, #tpu.memory_space<vmem>>, vector<4x16xf32>,
    %66 = vector.extract_strided_slice %63 {offsets = [0, 1], sizes = [4, 16], strides = [1, 1]} : vector<4x18xf32> to vector<4x16xf32>
    %c28_46 = arith.constant 28 : index
    %c16_47 = arith.constant 16 : index
    %67 = vector.load %arg7[%c28_46, %c16_47] : memref<36x256xf32, #tpu.memory_space<vmem>>, vector<4x16xf32>
    tpu.vector_store %arg7[%c28_46, %c16_47], %66 {strides = array<i32>} : memref<36x256xf32, #tpu.memory_space<vmem>>, vector<4x16xf32>,
    %68 = vector.extract_strided_slice %63 {offsets = [0, 2], sizes = [4, 16], strides = [1, 1]} : vector<4x18xf32> to vector<4x16xf32>
    %c32_48 = arith.constant 32 : index
    %c16_49 = arith.constant 16 : index
    %69 = vector.load %arg7[%c32_48, %c16_49] : memref<36x256xf32, #tpu.memory_space<vmem>>, vector<4x16xf32>
    tpu.vector_store %arg7[%c32_48, %c16_49], %68 {strides = array<i32>} : memref<36x256xf32, #tpu.memory_space<vmem>>, vector<4x16xf32>,
    %c2_i32_50 = arith.constant 2 : i32
    %70 = arith.addi %3, %c2_i32_50 : i32
    %c0_i32_51 = arith.constant 0 : i32
    %71 = arith.addi %70, %c0_i32_51 : i32
    %c0_52 = arith.constant 0 : index
    %72 = arith.index_cast %71 : i32 to index
    %c0_53 = arith.constant 0 : index
    %73 = vector.load %arg6[%c0_52, %72, %c0_53] : memref<4x18x18xf32, #tpu.memory_space<vmem>>, vector<4x1x18xf32>
    %74 = vector.shape_cast %73 : vector<4x1x18xf32> to vector<4x18xf32>
    %75 = vector.extract_strided_slice %74 {offsets = [0, 0], sizes = [4, 16], strides = [1, 1]} : vector<4x18xf32> to vector<4x16xf32>
    %c0_54 = arith.constant 0 : index
    %c32_55 = arith.constant 32 : index
    %76 = vector.load %arg7[%c0_54, %c32_55] : memref<36x256xf32, #tpu.memory_space<vmem>>, vector<4x16xf32>
    tpu.vector_store %arg7[%c0_54, %c32_55], %75 {strides = array<i32>} : memref<36x256xf32, #tpu.memory_space<vmem>>, vector<4x16xf32>,
    %77 = vector.extract_strided_slice %74 {offsets = [0, 1], sizes = [4, 16], strides = [1, 1]} : vector<4x18xf32> to vector<4x16xf32>
    %c4_56 = arith.constant 4 : index
    %c32_57 = arith.constant 32 : index
    %78 = vector.load %arg7[%c4_56, %c32_57] : memref<36x256xf32, #tpu.memory_space<vmem>>, vector<4x16xf32>
    tpu.vector_store %arg7[%c4_56, %c32_57], %77 {strides = array<i32>} : memref<36x256xf32, #tpu.memory_space<vmem>>, vector<4x16xf32>,
    %79 = vector.extract_strided_slice %74 {offsets = [0, 2], sizes = [4, 16], strides = [1, 1]} : vector<4x18xf32> to vector<4x16xf32>
    %c8_58 = arith.constant 8 : index
    %c32_59 = arith.constant 32 : index
    %80 = vector.load %arg7[%c8_58, %c32_59] : memref<36x256xf32, #tpu.memory_space<vmem>>, vector<4x16xf32>
    tpu.vector_store %arg7[%c8_58, %c32_59], %79 {strides = array<i32>} : memref<36x256xf32, #tpu.memory_space<vmem>>, vector<4x16xf32>,
    %c2_i32_60 = arith.constant 2 : i32
    %81 = arith.addi %3, %c2_i32_60 : i32
    %c1_i32_61 = arith.constant 1 : i32
    %82 = arith.addi %81, %c1_i32_61 : i32
    %c0_62 = arith.constant 0 : index
    %83 = arith.index_cast %82 : i32 to index
    %c0_63 = arith.constant 0 : index
    %84 = vector.load %arg6[%c0_62, %83, %c0_63] : memref<4x18x18xf32, #tpu.memory_space<vmem>>, vector<4x1x18xf32>
    %85 = vector.shape_cast %84 : vector<4x1x18xf32> to vector<4x18xf32>
    %86 = vector.extract_strided_slice %85 {offsets = [0, 0], sizes = [4, 16], strides = [1, 1]} : vector<4x18xf32> to vector<4x16xf32>
    %c12_64 = arith.constant 12 : index
    %c32_65 = arith.constant 32 : index
    %87 = vector.load %arg7[%c12_64, %c32_65] : memref<36x256xf32, #tpu.memory_space<vmem>>, vector<4x16xf32>
    tpu.vector_store %arg7[%c12_64, %c32_65], %86 {strides = array<i32>} : memref<36x256xf32, #tpu.memory_space<vmem>>, vector<4x16xf32>,
    %88 = vector.extract_strided_slice %85 {offsets = [0, 1], sizes = [4, 16], strides = [1, 1]} : vector<4x18xf32> to vector<4x16xf32>
    %c16_66 = arith.constant 16 : index
    %c32_67 = arith.constant 32 : index
    %89 = vector.load %arg7[%c16_66, %c32_67] : memref<36x256xf32, #tpu.memory_space<vmem>>, vector<4x16xf32>
    tpu.vector_store %arg7[%c16_66, %c32_67], %88 {strides = array<i32>} : memref<36x256xf32, #tpu.memory_space<vmem>>, vector<4x16xf32>,
    %90 = vector.extract_strided_slice %85 {offsets = [0, 2], sizes = [4, 16], strides = [1, 1]} : vector<4x18xf32> to vector<4x16xf32>
    %c20_68 = arith.constant 20 : index
    %c32_69 = arith.constant 32 : index
    %91 = vector.load %arg7[%c20_68, %c32_69] : memref<36x256xf32, #tpu.memory_space<vmem>>, vector<4x16xf32>
    tpu.vector_store %arg7[%c20_68, %c32_69], %90 {strides = array<i32>} : memref<36x256xf32, #tpu.memory_space<vmem>>, vector<4x16xf32>,
    %c2_i32_70 = arith.constant 2 : i32
    %92 = arith.addi %3, %c2_i32_70 : i32
    %c2_i32_71 = arith.constant 2 : i32
    %93 = arith.addi %92, %c2_i32_71 : i32
    %c0_72 = arith.constant 0 : index
    %94 = arith.index_cast %93 : i32 to index
    %c0_73 = arith.constant 0 : index
    %95 = vector.load %arg6[%c0_72, %94, %c0_73] : memref<4x18x18xf32, #tpu.memory_space<vmem>>, vector<4x1x18xf32>
    %96 = vector.shape_cast %95 : vector<4x1x18xf32> to vector<4x18xf32>
    %97 = vector.extract_strided_slice %96 {offsets = [0, 0], sizes = [4, 16], strides = [1, 1]} : vector<4x18xf32> to vector<4x16xf32>
    %c24_74 = arith.constant 24 : index
    %c32_75 = arith.constant 32 : index
    %98 = vector.load %arg7[%c24_74, %c32_75] : memref<36x256xf32, #tpu.memory_space<vmem>>, vector<4x16xf32>
    tpu.vector_store %arg7[%c24_74, %c32_75], %97 {strides = array<i32>} : memref<36x256xf32, #tpu.memory_space<vmem>>, vector<4x16xf32>,
    %99 = vector.extract_strided_slice %96 {offsets = [0, 1], sizes = [4, 16], strides = [1, 1]} : vector<4x18xf32> to vector<4x16xf32>
    %c28_76 = arith.constant 28 : index
    %c32_77 = arith.constant 32 : index
    %100 = vector.load %arg7[%c28_76, %c32_77] : memref<36x256xf32, #tpu.memory_space<vmem>>, vector<4x16xf32>
    tpu.vector_store %arg7[%c28_76, %c32_77], %99 {strides = array<i32>} : memref<36x256xf32, #tpu.memory_space<vmem>>, vector<4x16xf32>,
    %101 = vector.extract_strided_slice %96 {offsets = [0, 2], sizes = [4, 16], strides = [1, 1]} : vector<4x18xf32> to vector<4x16xf32>
    %c32_78 = arith.constant 32 : index
    %c32_79 = arith.constant 32 : index
    %102 = vector.load %arg7[%c32_78, %c32_79] : memref<36x256xf32, #tpu.memory_space<vmem>>, vector<4x16xf32>
    tpu.vector_store %arg7[%c32_78, %c32_79], %101 {strides = array<i32>} : memref<36x256xf32, #tpu.memory_space<vmem>>, vector<4x16xf32>,
    %c3_i32 = arith.constant 3 : i32
    %103 = arith.addi %3, %c3_i32 : i32
    %c0_i32_80 = arith.constant 0 : i32
    %104 = arith.addi %103, %c0_i32_80 : i32
    %c0_81 = arith.constant 0 : index
    %105 = arith.index_cast %104 : i32 to index
    %c0_82 = arith.constant 0 : index
    %106 = vector.load %arg6[%c0_81, %105, %c0_82] : memref<4x18x18xf32, #tpu.memory_space<vmem>>, vector<4x1x18xf32>
    %107 = vector.shape_cast %106 : vector<4x1x18xf32> to vector<4x18xf32>
    %108 = vector.extract_strided_slice %107 {offsets = [0, 0], sizes = [4, 16], strides = [1, 1]} : vector<4x18xf32> to vector<4x16xf32>
    %c0_83 = arith.constant 0 : index
    %c48 = arith.constant 48 : index
    %109 = vector.load %arg7[%c0_83, %c48] : memref<36x256xf32, #tpu.memory_space<vmem>>, vector<4x16xf32>
    tpu.vector_store %arg7[%c0_83, %c48], %108 {strides = array<i32>} : memref<36x256xf32, #tpu.memory_space<vmem>>, vector<4x16xf32>,
    %110 = vector.extract_strided_slice %107 {offsets = [0, 1], sizes = [4, 16], strides = [1, 1]} : vector<4x18xf32> to vector<4x16xf32>
    %c4_84 = arith.constant 4 : index
    %c48_85 = arith.constant 48 : index
    %111 = vector.load %arg7[%c4_84, %c48_85] : memref<36x256xf32, #tpu.memory_space<vmem>>, vector<4x16xf32>
    tpu.vector_store %arg7[%c4_84, %c48_85], %110 {strides = array<i32>} : memref<36x256xf32, #tpu.memory_space<vmem>>, vector<4x16xf32>,
    %112 = vector.extract_strided_slice %107 {offsets = [0, 2], sizes = [4, 16], strides = [1, 1]} : vector<4x18xf32> to vector<4x16xf32>
    %c8_86 = arith.constant 8 : index
    %c48_87 = arith.constant 48 : index
    %113 = vector.load %arg7[%c8_86, %c48_87] : memref<36x256xf32, #tpu.memory_space<vmem>>, vector<4x16xf32>
    tpu.vector_store %arg7[%c8_86, %c48_87], %112 {strides = array<i32>} : memref<36x256xf32, #tpu.memory_space<vmem>>, vector<4x16xf32>,
    %c3_i32_88 = arith.constant 3 : i32
    %114 = arith.addi %3, %c3_i32_88 : i32
    %c1_i32_89 = arith.constant 1 : i32
    %115 = arith.addi %114, %c1_i32_89 : i32
    %c0_90 = arith.constant 0 : index
    %116 = arith.index_cast %115 : i32 to index
    %c0_91 = arith.constant 0 : index
    %117 = vector.load %arg6[%c0_90, %116, %c0_91] : memref<4x18x18xf32, #tpu.memory_space<vmem>>, vector<4x1x18xf32>
    %118 = vector.shape_cast %117 : vector<4x1x18xf32> to vector<4x18xf32>
    %119 = vector.extract_strided_slice %118 {offsets = [0, 0], sizes = [4, 16], strides = [1, 1]} : vector<4x18xf32> to vector<4x16xf32>
    %c12_92 = arith.constant 12 : index
    %c48_93 = arith.constant 48 : index
    %120 = vector.load %arg7[%c12_92, %c48_93] : memref<36x256xf32, #tpu.memory_space<vmem>>, vector<4x16xf32>
    tpu.vector_store %arg7[%c12_92, %c48_93], %119 {strides = array<i32>} : memref<36x256xf32, #tpu.memory_space<vmem>>, vector<4x16xf32>,
    %121 = vector.extract_strided_slice %118 {offsets = [0, 1], sizes = [4, 16], strides = [1, 1]} : vector<4x18xf32> to vector<4x16xf32>
    %c16_94 = arith.constant 16 : index
    %c48_95 = arith.constant 48 : index
    %122 = vector.load %arg7[%c16_94, %c48_95] : memref<36x256xf32, #tpu.memory_space<vmem>>, vector<4x16xf32>
    tpu.vector_store %arg7[%c16_94, %c48_95], %121 {strides = array<i32>} : memref<36x256xf32, #tpu.memory_space<vmem>>, vector<4x16xf32>,
    %123 = vector.extract_strided_slice %118 {offsets = [0, 2], sizes = [4, 16], strides = [1, 1]} : vector<4x18xf32> to vector<4x16xf32>
    %c20_96 = arith.constant 20 : index
    %c48_97 = arith.constant 48 : index
    %124 = vector.load %arg7[%c20_96, %c48_97] : memref<36x256xf32, #tpu.memory_space<vmem>>, vector<4x16xf32>
    tpu.vector_store %arg7[%c20_96, %c48_97], %123 {strides = array<i32>} : memref<36x256xf32, #tpu.memory_space<vmem>>, vector<4x16xf32>,
    %c3_i32_98 = arith.constant 3 : i32
    %125 = arith.addi %3, %c3_i32_98 : i32
    %c2_i32_99 = arith.constant 2 : i32
    %126 = arith.addi %125, %c2_i32_99 : i32
    %c0_100 = arith.constant 0 : index
    %127 = arith.index_cast %126 : i32 to index
    %c0_101 = arith.constant 0 : index
    %128 = vector.load %arg6[%c0_100, %127, %c0_101] : memref<4x18x18xf32, #tpu.memory_space<vmem>>, vector<4x1x18xf32>
    %129 = vector.shape_cast %128 : vector<4x1x18xf32> to vector<4x18xf32>
    %130 = vector.extract_strided_slice %129 {offsets = [0, 0], sizes = [4, 16], strides = [1, 1]} : vector<4x18xf32> to vector<4x16xf32>
    %c24_102 = arith.constant 24 : index
    %c48_103 = arith.constant 48 : index
    %131 = vector.load %arg7[%c24_102, %c48_103] : memref<36x256xf32, #tpu.memory_space<vmem>>, vector<4x16xf32>
    tpu.vector_store %arg7[%c24_102, %c48_103], %130 {strides = array<i32>} : memref<36x256xf32, #tpu.memory_space<vmem>>, vector<4x16xf32>,
    %132 = vector.extract_strided_slice %129 {offsets = [0, 1], sizes = [4, 16], strides = [1, 1]} : vector<4x18xf32> to vector<4x16xf32>
    %c28_104 = arith.constant 28 : index
    %c48_105 = arith.constant 48 : index
    %133 = vector.load %arg7[%c28_104, %c48_105] : memref<36x256xf32, #tpu.memory_space<vmem>>, vector<4x16xf32>
    tpu.vector_store %arg7[%c28_104, %c48_105], %132 {strides = array<i32>} : memref<36x256xf32, #tpu.memory_space<vmem>>, vector<4x16xf32>,
    %134 = vector.extract_strided_slice %129 {offsets = [0, 2], sizes = [4, 16], strides = [1, 1]} : vector<4x18xf32> to vector<4x16xf32>
    %c32_106 = arith.constant 32 : index
    %c48_107 = arith.constant 48 : index
    %135 = vector.load %arg7[%c32_106, %c48_107] : memref<36x256xf32, #tpu.memory_space<vmem>>, vector<4x16xf32>
    tpu.vector_store %arg7[%c32_106, %c48_107], %134 {strides = array<i32>} : memref<36x256xf32, #tpu.memory_space<vmem>>, vector<4x16xf32>,
    %c4_i32 = arith.constant 4 : i32
    %136 = arith.addi %3, %c4_i32 : i32
    %c0_i32_108 = arith.constant 0 : i32
    %137 = arith.addi %136, %c0_i32_108 : i32
    %c0_109 = arith.constant 0 : index
    %138 = arith.index_cast %137 : i32 to index
    %c0_110 = arith.constant 0 : index
    %139 = vector.load %arg6[%c0_109, %138, %c0_110] : memref<4x18x18xf32, #tpu.memory_space<vmem>>, vector<4x1x18xf32>
    %140 = vector.shape_cast %139 : vector<4x1x18xf32> to vector<4x18xf32>
    %141 = vector.extract_strided_slice %140 {offsets = [0, 0], sizes = [4, 16], strides = [1, 1]} : vector<4x18xf32> to vector<4x16xf32>
    %c0_111 = arith.constant 0 : index
    %c64 = arith.constant 64 : index
    %142 = vector.load %arg7[%c0_111, %c64] : memref<36x256xf32, #tpu.memory_space<vmem>>, vector<4x16xf32>
    tpu.vector_store %arg7[%c0_111, %c64], %141 {strides = array<i32>} : memref<36x256xf32, #tpu.memory_space<vmem>>, vector<4x16xf32>,
    %143 = vector.extract_strided_slice %140 {offsets = [0, 1], sizes = [4, 16], strides = [1, 1]} : vector<4x18xf32> to vector<4x16xf32>
    %c4_112 = arith.constant 4 : index
    %c64_113 = arith.constant 64 : index
    %144 = vector.load %arg7[%c4_112, %c64_113] : memref<36x256xf32, #tpu.memory_space<vmem>>, vector<4x16xf32>
    tpu.vector_store %arg7[%c4_112, %c64_113], %143 {strides = array<i32>} : memref<36x256xf32, #tpu.memory_space<vmem>>, vector<4x16xf32>,
    %145 = vector.extract_strided_slice %140 {offsets = [0, 2], sizes = [4, 16], strides = [1, 1]} : vector<4x18xf32> to vector<4x16xf32>
    %c8_114 = arith.constant 8 : index
    %c64_115 = arith.constant 64 : index
    %146 = vector.load %arg7[%c8_114, %c64_115] : memref<36x256xf32, #tpu.memory_space<vmem>>, vector<4x16xf32>
    tpu.vector_store %arg7[%c8_114, %c64_115], %145 {strides = array<i32>} : memref<36x256xf32, #tpu.memory_space<vmem>>, vector<4x16xf32>,
    %c4_i32_116 = arith.constant 4 : i32
    %147 = arith.addi %3, %c4_i32_116 : i32
    %c1_i32_117 = arith.constant 1 : i32
    %148 = arith.addi %147, %c1_i32_117 : i32
    %c0_118 = arith.constant 0 : index
    %149 = arith.index_cast %148 : i32 to index
    %c0_119 = arith.constant 0 : index
    %150 = vector.load %arg6[%c0_118, %149, %c0_119] : memref<4x18x18xf32, #tpu.memory_space<vmem>>, vector<4x1x18xf32>
    %151 = vector.shape_cast %150 : vector<4x1x18xf32> to vector<4x18xf32>
    %152 = vector.extract_strided_slice %151 {offsets = [0, 0], sizes = [4, 16], strides = [1, 1]} : vector<4x18xf32> to vector<4x16xf32>
    %c12_120 = arith.constant 12 : index
    %c64_121 = arith.constant 64 : index
    %153 = vector.load %arg7[%c12_120, %c64_121] : memref<36x256xf32, #tpu.memory_space<vmem>>, vector<4x16xf32>
    tpu.vector_store %arg7[%c12_120, %c64_121], %152 {strides = array<i32>} : memref<36x256xf32, #tpu.memory_space<vmem>>, vector<4x16xf32>,
    %154 = vector.extract_strided_slice %151 {offsets = [0, 1], sizes = [4, 16], strides = [1, 1]} : vector<4x18xf32> to vector<4x16xf32>
    %c16_122 = arith.constant 16 : index
    %c64_123 = arith.constant 64 : index
    %155 = vector.load %arg7[%c16_122, %c64_123] : memref<36x256xf32, #tpu.memory_space<vmem>>, vector<4x16xf32>
    tpu.vector_store %arg7[%c16_122, %c64_123], %154 {strides = array<i32>} : memref<36x256xf32, #tpu.memory_space<vmem>>, vector<4x16xf32>,
    %156 = vector.extract_strided_slice %151 {offsets = [0, 2], sizes = [4, 16], strides = [1, 1]} : vector<4x18xf32> to vector<4x16xf32>
    %c20_124 = arith.constant 20 : index
    %c64_125 = arith.constant 64 : index
    %157 = vector.load %arg7[%c20_124, %c64_125] : memref<36x256xf32, #tpu.memory_space<vmem>>, vector<4x16xf32>
    tpu.vector_store %arg7[%c20_124, %c64_125], %156 {strides = array<i32>} : memref<36x256xf32, #tpu.memory_space<vmem>>, vector<4x16xf32>,
    %c4_i32_126 = arith.constant 4 : i32
    %158 = arith.addi %3, %c4_i32_126 : i32
    %c2_i32_127 = arith.constant 2 : i32
    %159 = arith.addi %158, %c2_i32_127 : i32
    %c0_128 = arith.constant 0 : index
    %160 = arith.index_cast %159 : i32 to index
    %c0_129 = arith.constant 0 : index
    %161 = vector.load %arg6[%c0_128, %160, %c0_129] : memref<4x18x18xf32, #tpu.memory_space<vmem>>, vector<4x1x18xf32>
    %162 = vector.shape_cast %161 : vector<4x1x18xf32> to vector<4x18xf32>
    %163 = vector.extract_strided_slice %162 {offsets = [0, 0], sizes = [4, 16], strides = [1, 1]} : vector<4x18xf32> to vector<4x16xf32>
    %c24_130 = arith.constant 24 : index
    %c64_131 = arith.constant 64 : index
    %164 = vector.load %arg7[%c24_130, %c64_131] : memref<36x256xf32, #tpu.memory_space<vmem>>, vector<4x16xf32>
    tpu.vector_store %arg7[%c24_130, %c64_131], %163 {strides = array<i32>} : memref<36x256xf32, #tpu.memory_space<vmem>>, vector<4x16xf32>,
    %165 = vector.extract_strided_slice %162 {offsets = [0, 1], sizes = [4, 16], strides = [1, 1]} : vector<4x18xf32> to vector<4x16xf32>
    %c28_132 = arith.constant 28 : index
    %c64_133 = arith.constant 64 : index
    %166 = vector.load %arg7[%c28_132, %c64_133] : memref<36x256xf32, #tpu.memory_space<vmem>>, vector<4x16xf32>
    tpu.vector_store %arg7[%c28_132, %c64_133], %165 {strides = array<i32>} : memref<36x256xf32, #tpu.memory_space<vmem>>, vector<4x16xf32>,
    %167 = vector.extract_strided_slice %162 {offsets = [0, 2], sizes = [4, 16], strides = [1, 1]} : vector<4x18xf32> to vector<4x16xf32>
    %c32_134 = arith.constant 32 : index
    %c64_135 = arith.constant 64 : index
    %168 = vector.load %arg7[%c32_134, %c64_135] : memref<36x256xf32, #tpu.memory_space<vmem>>, vector<4x16xf32>
    tpu.vector_store %arg7[%c32_134, %c64_135], %167 {strides = array<i32>} : memref<36x256xf32, #tpu.memory_space<vmem>>, vector<4x16xf32>,
    %c5_i32 = arith.constant 5 : i32
    %169 = arith.addi %3, %c5_i32 : i32
    %c0_i32_136 = arith.constant 0 : i32
    %170 = arith.addi %169, %c0_i32_136 : i32
    %c0_137 = arith.constant 0 : index
    %171 = arith.index_cast %170 : i32 to index
    %c0_138 = arith.constant 0 : index
    %172 = vector.load %arg6[%c0_137, %171, %c0_138] : memref<4x18x18xf32, #tpu.memory_space<vmem>>, vector<4x1x18xf32>
    %173 = vector.shape_cast %172 : vector<4x1x18xf32> to vector<4x18xf32>
    %174 = vector.extract_strided_slice %173 {offsets = [0, 0], sizes = [4, 16], strides = [1, 1]} : vector<4x18xf32> to vector<4x16xf32>
    %c0_139 = arith.constant 0 : index
    %c80 = arith.constant 80 : index
    %175 = vector.load %arg7[%c0_139, %c80] : memref<36x256xf32, #tpu.memory_space<vmem>>, vector<4x16xf32>
    tpu.vector_store %arg7[%c0_139, %c80], %174 {strides = array<i32>} : memref<36x256xf32, #tpu.memory_space<vmem>>, vector<4x16xf32>,
    %176 = vector.extract_strided_slice %173 {offsets = [0, 1], sizes = [4, 16], strides = [1, 1]} : vector<4x18xf32> to vector<4x16xf32>
    %c4_140 = arith.constant 4 : index
    %c80_141 = arith.constant 80 : index
    %177 = vector.load %arg7[%c4_140, %c80_141] : memref<36x256xf32, #tpu.memory_space<vmem>>, vector<4x16xf32>
    tpu.vector_store %arg7[%c4_140, %c80_141], %176 {strides = array<i32>} : memref<36x256xf32, #tpu.memory_space<vmem>>, vector<4x16xf32>,
    %178 = vector.extract_strided_slice %173 {offsets = [0, 2], sizes = [4, 16], strides = [1, 1]} : vector<4x18xf32> to vector<4x16xf32>
    %c8_142 = arith.constant 8 : index
    %c80_143 = arith.constant 80 : index
    %179 = vector.load %arg7[%c8_142, %c80_143] : memref<36x256xf32, #tpu.memory_space<vmem>>, vector<4x16xf32>
    tpu.vector_store %arg7[%c8_142, %c80_143], %178 {strides = array<i32>} : memref<36x256xf32, #tpu.memory_space<vmem>>, vector<4x16xf32>,
    %c5_i32_144 = arith.constant 5 : i32
    %180 = arith.addi %3, %c5_i32_144 : i32
    %c1_i32_145 = arith.constant 1 : i32
    %181 = arith.addi %180, %c1_i32_145 : i32
    %c0_146 = arith.constant 0 : index
    %182 = arith.index_cast %181 : i32 to index
    %c0_147 = arith.constant 0 : index
    %183 = vector.load %arg6[%c0_146, %182, %c0_147] : memref<4x18x18xf32, #tpu.memory_space<vmem>>, vector<4x1x18xf32>
    %184 = vector.shape_cast %183 : vector<4x1x18xf32> to vector<4x18xf32>
    %185 = vector.extract_strided_slice %184 {offsets = [0, 0], sizes = [4, 16], strides = [1, 1]} : vector<4x18xf32> to vector<4x16xf32>
    %c12_148 = arith.constant 12 : index
    %c80_149 = arith.constant 80 : index
    %186 = vector.load %arg7[%c12_148, %c80_149] : memref<36x256xf32, #tpu.memory_space<vmem>>, vector<4x16xf32>
    tpu.vector_store %arg7[%c12_148, %c80_149], %185 {strides = array<i32>} : memref<36x256xf32, #tpu.memory_space<vmem>>, vector<4x16xf32>,
    %187 = vector.extract_strided_slice %184 {offsets = [0, 1], sizes = [4, 16], strides = [1, 1]} : vector<4x18xf32> to vector<4x16xf32>
    %c16_150 = arith.constant 16 : index
    %c80_151 = arith.constant 80 : index
    %188 = vector.load %arg7[%c16_150, %c80_151] : memref<36x256xf32, #tpu.memory_space<vmem>>, vector<4x16xf32>
    tpu.vector_store %arg7[%c16_150, %c80_151], %187 {strides = array<i32>} : memref<36x256xf32, #tpu.memory_space<vmem>>, vector<4x16xf32>,
    %189 = vector.extract_strided_slice %184 {offsets = [0, 2], sizes = [4, 16], strides = [1, 1]} : vector<4x18xf32> to vector<4x16xf32>
    %c20_152 = arith.constant 20 : index
    %c80_153 = arith.constant 80 : index
    %190 = vector.load %arg7[%c20_152, %c80_153] : memref<36x256xf32, #tpu.memory_space<vmem>>, vector<4x16xf32>
    tpu.vector_store %arg7[%c20_152, %c80_153], %189 {strides = array<i32>} : memref<36x256xf32, #tpu.memory_space<vmem>>, vector<4x16xf32>,
    %c5_i32_154 = arith.constant 5 : i32
    %191 = arith.addi %3, %c5_i32_154 : i32
    %c2_i32_155 = arith.constant 2 : i32
    %192 = arith.addi %191, %c2_i32_155 : i32
    %c0_156 = arith.constant 0 : index
    %193 = arith.index_cast %192 : i32 to index
    %c0_157 = arith.constant 0 : index
    %194 = vector.load %arg6[%c0_156, %193, %c0_157] : memref<4x18x18xf32, #tpu.memory_space<vmem>>, vector<4x1x18xf32>
    %195 = vector.shape_cast %194 : vector<4x1x18xf32> to vector<4x18xf32>
    %196 = vector.extract_strided_slice %195 {offsets = [0, 0], sizes = [4, 16], strides = [1, 1]} : vector<4x18xf32> to vector<4x16xf32>
    %c24_158 = arith.constant 24 : index
    %c80_159 = arith.constant 80 : index
    %197 = vector.load %arg7[%c24_158, %c80_159] : memref<36x256xf32, #tpu.memory_space<vmem>>, vector<4x16xf32>
    tpu.vector_store %arg7[%c24_158, %c80_159], %196 {strides = array<i32>} : memref<36x256xf32, #tpu.memory_space<vmem>>, vector<4x16xf32>,
    %198 = vector.extract_strided_slice %195 {offsets = [0, 1], sizes = [4, 16], strides = [1, 1]} : vector<4x18xf32> to vector<4x16xf32>
    %c28_160 = arith.constant 28 : index
    %c80_161 = arith.constant 80 : index
    %199 = vector.load %arg7[%c28_160, %c80_161] : memref<36x256xf32, #tpu.memory_space<vmem>>, vector<4x16xf32>
    tpu.vector_store %arg7[%c28_160, %c80_161], %198 {strides = array<i32>} : memref<36x256xf32, #tpu.memory_space<vmem>>, vector<4x16xf32>,
    %200 = vector.extract_strided_slice %195 {offsets = [0, 2], sizes = [4, 16], strides = [1, 1]} : vector<4x18xf32> to vector<4x16xf32>
    %c32_162 = arith.constant 32 : index
    %c80_163 = arith.constant 80 : index
    %201 = vector.load %arg7[%c32_162, %c80_163] : memref<36x256xf32, #tpu.memory_space<vmem>>, vector<4x16xf32>
    tpu.vector_store %arg7[%c32_162, %c80_163], %200 {strides = array<i32>} : memref<36x256xf32, #tpu.memory_space<vmem>>, vector<4x16xf32>,
    %c6_i32 = arith.constant 6 : i32
    %202 = arith.addi %3, %c6_i32 : i32
    %c0_i32_164 = arith.constant 0 : i32
    %203 = arith.addi %202, %c0_i32_164 : i32
    %c0_165 = arith.constant 0 : index
    %204 = arith.index_cast %203 : i32 to index
    %c0_166 = arith.constant 0 : index
    %205 = vector.load %arg6[%c0_165, %204, %c0_166] : memref<4x18x18xf32, #tpu.memory_space<vmem>>, vector<4x1x18xf32>
    %206 = vector.shape_cast %205 : vector<4x1x18xf32> to vector<4x18xf32>
    %207 = vector.extract_strided_slice %206 {offsets = [0, 0], sizes = [4, 16], strides = [1, 1]} : vector<4x18xf32> to vector<4x16xf32>
    %c0_167 = arith.constant 0 : index
    %c96 = arith.constant 96 : index
    %208 = vector.load %arg7[%c0_167, %c96] : memref<36x256xf32, #tpu.memory_space<vmem>>, vector<4x16xf32>
    tpu.vector_store %arg7[%c0_167, %c96], %207 {strides = array<i32>} : memref<36x256xf32, #tpu.memory_space<vmem>>, vector<4x16xf32>,
    %209 = vector.extract_strided_slice %206 {offsets = [0, 1], sizes = [4, 16], strides = [1, 1]} : vector<4x18xf32> to vector<4x16xf32>
    %c4_168 = arith.constant 4 : index
    %c96_169 = arith.constant 96 : index
    %210 = vector.load %arg7[%c4_168, %c96_169] : memref<36x256xf32, #tpu.memory_space<vmem>>, vector<4x16xf32>
    tpu.vector_store %arg7[%c4_168, %c96_169], %209 {strides = array<i32>} : memref<36x256xf32, #tpu.memory_space<vmem>>, vector<4x16xf32>,
    %211 = vector.extract_strided_slice %206 {offsets = [0, 2], sizes = [4, 16], strides = [1, 1]} : vector<4x18xf32> to vector<4x16xf32>
    %c8_170 = arith.constant 8 : index
    %c96_171 = arith.constant 96 : index
    %212 = vector.load %arg7[%c8_170, %c96_171] : memref<36x256xf32, #tpu.memory_space<vmem>>, vector<4x16xf32>
    tpu.vector_store %arg7[%c8_170, %c96_171], %211 {strides = array<i32>} : memref<36x256xf32, #tpu.memory_space<vmem>>, vector<4x16xf32>,
    %c6_i32_172 = arith.constant 6 : i32
    %213 = arith.addi %3, %c6_i32_172 : i32
    %c1_i32_173 = arith.constant 1 : i32
    %214 = arith.addi %213, %c1_i32_173 : i32
    %c0_174 = arith.constant 0 : index
    %215 = arith.index_cast %214 : i32 to index
    %c0_175 = arith.constant 0 : index
    %216 = vector.load %arg6[%c0_174, %215, %c0_175] : memref<4x18x18xf32, #tpu.memory_space<vmem>>, vector<4x1x18xf32>
    %217 = vector.shape_cast %216 : vector<4x1x18xf32> to vector<4x18xf32>
    %218 = vector.extract_strided_slice %217 {offsets = [0, 0], sizes = [4, 16], strides = [1, 1]} : vector<4x18xf32> to vector<4x16xf32>
    %c12_176 = arith.constant 12 : index
    %c96_177 = arith.constant 96 : index
    %219 = vector.load %arg7[%c12_176, %c96_177] : memref<36x256xf32, #tpu.memory_space<vmem>>, vector<4x16xf32>
    tpu.vector_store %arg7[%c12_176, %c96_177], %218 {strides = array<i32>} : memref<36x256xf32, #tpu.memory_space<vmem>>, vector<4x16xf32>,
    %220 = vector.extract_strided_slice %217 {offsets = [0, 1], sizes = [4, 16], strides = [1, 1]} : vector<4x18xf32> to vector<4x16xf32>
    %c16_178 = arith.constant 16 : index
    %c96_179 = arith.constant 96 : index
    %221 = vector.load %arg7[%c16_178, %c96_179] : memref<36x256xf32, #tpu.memory_space<vmem>>, vector<4x16xf32>
    tpu.vector_store %arg7[%c16_178, %c96_179], %220 {strides = array<i32>} : memref<36x256xf32, #tpu.memory_space<vmem>>, vector<4x16xf32>,
    %222 = vector.extract_strided_slice %217 {offsets = [0, 2], sizes = [4, 16], strides = [1, 1]} : vector<4x18xf32> to vector<4x16xf32>
    %c20_180 = arith.constant 20 : index
    %c96_181 = arith.constant 96 : index
    %223 = vector.load %arg7[%c20_180, %c96_181] : memref<36x256xf32, #tpu.memory_space<vmem>>, vector<4x16xf32>
    tpu.vector_store %arg7[%c20_180, %c96_181], %222 {strides = array<i32>} : memref<36x256xf32, #tpu.memory_space<vmem>>, vector<4x16xf32>,
    %c6_i32_182 = arith.constant 6 : i32
    %224 = arith.addi %3, %c6_i32_182 : i32
    %c2_i32_183 = arith.constant 2 : i32
    %225 = arith.addi %224, %c2_i32_183 : i32
    %c0_184 = arith.constant 0 : index
    %226 = arith.index_cast %225 : i32 to index
    %c0_185 = arith.constant 0 : index
    %227 = vector.load %arg6[%c0_184, %226, %c0_185] : memref<4x18x18xf32, #tpu.memory_space<vmem>>, vector<4x1x18xf32>
    %228 = vector.shape_cast %227 : vector<4x1x18xf32> to vector<4x18xf32>
    %229 = vector.extract_strided_slice %228 {offsets = [0, 0], sizes = [4, 16], strides = [1, 1]} : vector<4x18xf32> to vector<4x16xf32>
    %c24_186 = arith.constant 24 : index
    %c96_187 = arith.constant 96 : index
    %230 = vector.load %arg7[%c24_186, %c96_187] : memref<36x256xf32, #tpu.memory_space<vmem>>, vector<4x16xf32>
    tpu.vector_store %arg7[%c24_186, %c96_187], %229 {strides = array<i32>} : memref<36x256xf32, #tpu.memory_space<vmem>>, vector<4x16xf32>,
    %231 = vector.extract_strided_slice %228 {offsets = [0, 1], sizes = [4, 16], strides = [1, 1]} : vector<4x18xf32> to vector<4x16xf32>
    %c28_188 = arith.constant 28 : index
    %c96_189 = arith.constant 96 : index
    %232 = vector.load %arg7[%c28_188, %c96_189] : memref<36x256xf32, #tpu.memory_space<vmem>>, vector<4x16xf32>
    tpu.vector_store %arg7[%c28_188, %c96_189], %231 {strides = array<i32>} : memref<36x256xf32, #tpu.memory_space<vmem>>, vector<4x16xf32>,
    %233 = vector.extract_strided_slice %228 {offsets = [0, 2], sizes = [4, 16], strides = [1, 1]} : vector<4x18xf32> to vector<4x16xf32>
    %c32_190 = arith.constant 32 : index
    %c96_191 = arith.constant 96 : index
    %234 = vector.load %arg7[%c32_190, %c96_191] : memref<36x256xf32, #tpu.memory_space<vmem>>, vector<4x16xf32>
    tpu.vector_store %arg7[%c32_190, %c96_191], %233 {strides = array<i32>} : memref<36x256xf32, #tpu.memory_space<vmem>>, vector<4x16xf32>,
    %c7_i32 = arith.constant 7 : i32
    %235 = arith.addi %3, %c7_i32 : i32
    %c0_i32_192 = arith.constant 0 : i32
    %236 = arith.addi %235, %c0_i32_192 : i32
    %c0_193 = arith.constant 0 : index
    %237 = arith.index_cast %236 : i32 to index
    %c0_194 = arith.constant 0 : index
    %238 = vector.load %arg6[%c0_193, %237, %c0_194] : memref<4x18x18xf32, #tpu.memory_space<vmem>>, vector<4x1x18xf32>
    %239 = vector.shape_cast %238 : vector<4x1x18xf32> to vector<4x18xf32>
    %240 = vector.extract_strided_slice %239 {offsets = [0, 0], sizes = [4, 16], strides = [1, 1]} : vector<4x18xf32> to vector<4x16xf32>
    %c0_195 = arith.constant 0 : index
    %c112 = arith.constant 112 : index
    %241 = vector.load %arg7[%c0_195, %c112] : memref<36x256xf32, #tpu.memory_space<vmem>>, vector<4x16xf32>
    tpu.vector_store %arg7[%c0_195, %c112], %240 {strides = array<i32>} : memref<36x256xf32, #tpu.memory_space<vmem>>, vector<4x16xf32>,
    %242 = vector.extract_strided_slice %239 {offsets = [0, 1], sizes = [4, 16], strides = [1, 1]} : vector<4x18xf32> to vector<4x16xf32>
    %c4_196 = arith.constant 4 : index
    %c112_197 = arith.constant 112 : index
    %243 = vector.load %arg7[%c4_196, %c112_197] : memref<36x256xf32, #tpu.memory_space<vmem>>, vector<4x16xf32>
    tpu.vector_store %arg7[%c4_196, %c112_197], %242 {strides = array<i32>} : memref<36x256xf32, #tpu.memory_space<vmem>>, vector<4x16xf32>,
    %244 = vector.extract_strided_slice %239 {offsets = [0, 2], sizes = [4, 16], strides = [1, 1]} : vector<4x18xf32> to vector<4x16xf32>
    %c8_198 = arith.constant 8 : index
    %c112_199 = arith.constant 112 : index
    %245 = vector.load %arg7[%c8_198, %c112_199] : memref<36x256xf32, #tpu.memory_space<vmem>>, vector<4x16xf32>
    tpu.vector_store %arg7[%c8_198, %c112_199], %244 {strides = array<i32>} : memref<36x256xf32, #tpu.memory_space<vmem>>, vector<4x16xf32>,
    %c7_i32_200 = arith.constant 7 : i32
    %246 = arith.addi %3, %c7_i32_200 : i32
    %c1_i32_201 = arith.constant 1 : i32
    %247 = arith.addi %246, %c1_i32_201 : i32
    %c0_202 = arith.constant 0 : index
    %248 = arith.index_cast %247 : i32 to index
    %c0_203 = arith.constant 0 : index
    %249 = vector.load %arg6[%c0_202, %248, %c0_203] : memref<4x18x18xf32, #tpu.memory_space<vmem>>, vector<4x1x18xf32>
    %250 = vector.shape_cast %249 : vector<4x1x18xf32> to vector<4x18xf32>
    %251 = vector.extract_strided_slice %250 {offsets = [0, 0], sizes = [4, 16], strides = [1, 1]} : vector<4x18xf32> to vector<4x16xf32>
    %c12_204 = arith.constant 12 : index
    %c112_205 = arith.constant 112 : index
    %252 = vector.load %arg7[%c12_204, %c112_205] : memref<36x256xf32, #tpu.memory_space<vmem>>, vector<4x16xf32>
    tpu.vector_store %arg7[%c12_204, %c112_205], %251 {strides = array<i32>} : memref<36x256xf32, #tpu.memory_space<vmem>>, vector<4x16xf32>,
    %253 = vector.extract_strided_slice %250 {offsets = [0, 1], sizes = [4, 16], strides = [1, 1]} : vector<4x18xf32> to vector<4x16xf32>
    %c16_206 = arith.constant 16 : index
    %c112_207 = arith.constant 112 : index
    %254 = vector.load %arg7[%c16_206, %c112_207] : memref<36x256xf32, #tpu.memory_space<vmem>>, vector<4x16xf32>
    tpu.vector_store %arg7[%c16_206, %c112_207], %253 {strides = array<i32>} : memref<36x256xf32, #tpu.memory_space<vmem>>, vector<4x16xf32>,
    %255 = vector.extract_strided_slice %250 {offsets = [0, 2], sizes = [4, 16], strides = [1, 1]} : vector<4x18xf32> to vector<4x16xf32>
    %c20_208 = arith.constant 20 : index
    %c112_209 = arith.constant 112 : index
    %256 = vector.load %arg7[%c20_208, %c112_209] : memref<36x256xf32, #tpu.memory_space<vmem>>, vector<4x16xf32>
    tpu.vector_store %arg7[%c20_208, %c112_209], %255 {strides = array<i32>} : memref<36x256xf32, #tpu.memory_space<vmem>>, vector<4x16xf32>,
    %c7_i32_210 = arith.constant 7 : i32
    %257 = arith.addi %3, %c7_i32_210 : i32
    %c2_i32_211 = arith.constant 2 : i32
    %258 = arith.addi %257, %c2_i32_211 : i32
    %c0_212 = arith.constant 0 : index
    %259 = arith.index_cast %258 : i32 to index
    %c0_213 = arith.constant 0 : index
    %260 = vector.load %arg6[%c0_212, %259, %c0_213] : memref<4x18x18xf32, #tpu.memory_space<vmem>>, vector<4x1x18xf32>
    %261 = vector.shape_cast %260 : vector<4x1x18xf32> to vector<4x18xf32>
    %262 = vector.extract_strided_slice %261 {offsets = [0, 0], sizes = [4, 16], strides = [1, 1]} : vector<4x18xf32> to vector<4x16xf32>
    %c24_214 = arith.constant 24 : index
    %c112_215 = arith.constant 112 : index
    %263 = vector.load %arg7[%c24_214, %c112_215] : memref<36x256xf32, #tpu.memory_space<vmem>>, vector<4x16xf32>
    tpu.vector_store %arg7[%c24_214, %c112_215], %262 {strides = array<i32>} : memref<36x256xf32, #tpu.memory_space<vmem>>, vector<4x16xf32>,
    %264 = vector.extract_strided_slice %261 {offsets = [0, 1], sizes = [4, 16], strides = [1, 1]} : vector<4x18xf32> to vector<4x16xf32>
    %c28_216 = arith.constant 28 : index
    %c112_217 = arith.constant 112 : index
    %265 = vector.load %arg7[%c28_216, %c112_217] : memref<36x256xf32, #tpu.memory_space<vmem>>, vector<4x16xf32>
    tpu.vector_store %arg7[%c28_216, %c112_217], %264 {strides = array<i32>} : memref<36x256xf32, #tpu.memory_space<vmem>>, vector<4x16xf32>,
    %266 = vector.extract_strided_slice %261 {offsets = [0, 2], sizes = [4, 16], strides = [1, 1]} : vector<4x18xf32> to vector<4x16xf32>
    %c32_218 = arith.constant 32 : index
    %c112_219 = arith.constant 112 : index
    %267 = vector.load %arg7[%c32_218, %c112_219] : memref<36x256xf32, #tpu.memory_space<vmem>>, vector<4x16xf32>
    tpu.vector_store %arg7[%c32_218, %c112_219], %266 {strides = array<i32>} : memref<36x256xf32, #tpu.memory_space<vmem>>, vector<4x16xf32>,
    %c8_i32 = arith.constant 8 : i32
    %268 = arith.addi %3, %c8_i32 : i32
    %c0_i32_220 = arith.constant 0 : i32
    %269 = arith.addi %268, %c0_i32_220 : i32
    %c0_221 = arith.constant 0 : index
    %270 = arith.index_cast %269 : i32 to index
    %c0_222 = arith.constant 0 : index
    %271 = vector.load %arg6[%c0_221, %270, %c0_222] : memref<4x18x18xf32, #tpu.memory_space<vmem>>, vector<4x1x18xf32>
    %272 = vector.shape_cast %271 : vector<4x1x18xf32> to vector<4x18xf32>
    %273 = vector.extract_strided_slice %272 {offsets = [0, 0], sizes = [4, 16], strides = [1, 1]} : vector<4x18xf32> to vector<4x16xf32>
    %c0_223 = arith.constant 0 : index
    %c128 = arith.constant 128 : index
    %274 = vector.load %arg7[%c0_223, %c128] : memref<36x256xf32, #tpu.memory_space<vmem>>, vector<4x16xf32>
    tpu.vector_store %arg7[%c0_223, %c128], %273 {strides = array<i32>} : memref<36x256xf32, #tpu.memory_space<vmem>>, vector<4x16xf32>,
    %275 = vector.extract_strided_slice %272 {offsets = [0, 1], sizes = [4, 16], strides = [1, 1]} : vector<4x18xf32> to vector<4x16xf32>
    %c4_224 = arith.constant 4 : index
    %c128_225 = arith.constant 128 : index
    %276 = vector.load %arg7[%c4_224, %c128_225] : memref<36x256xf32, #tpu.memory_space<vmem>>, vector<4x16xf32>
    tpu.vector_store %arg7[%c4_224, %c128_225], %275 {strides = array<i32>} : memref<36x256xf32, #tpu.memory_space<vmem>>, vector<4x16xf32>,
    %277 = vector.extract_strided_slice %272 {offsets = [0, 2], sizes = [4, 16], strides = [1, 1]} : vector<4x18xf32> to vector<4x16xf32>
    %c8_226 = arith.constant 8 : index
    %c128_227 = arith.constant 128 : index
    %278 = vector.load %arg7[%c8_226, %c128_227] : memref<36x256xf32, #tpu.memory_space<vmem>>, vector<4x16xf32>
    tpu.vector_store %arg7[%c8_226, %c128_227], %277 {strides = array<i32>} : memref<36x256xf32, #tpu.memory_space<vmem>>, vector<4x16xf32>,
    %c8_i32_228 = arith.constant 8 : i32
    %279 = arith.addi %3, %c8_i32_228 : i32
    %c1_i32_229 = arith.constant 1 : i32
    %280 = arith.addi %279, %c1_i32_229 : i32
    %c0_230 = arith.constant 0 : index
    %281 = arith.index_cast %280 : i32 to index
    %c0_231 = arith.constant 0 : index
    %282 = vector.load %arg6[%c0_230, %281, %c0_231] : memref<4x18x18xf32, #tpu.memory_space<vmem>>, vector<4x1x18xf32>
    %283 = vector.shape_cast %282 : vector<4x1x18xf32> to vector<4x18xf32>
    %284 = vector.extract_strided_slice %283 {offsets = [0, 0], sizes = [4, 16], strides = [1, 1]} : vector<4x18xf32> to vector<4x16xf32>
    %c12_232 = arith.constant 12 : index
    %c128_233 = arith.constant 128 : index
    %285 = vector.load %arg7[%c12_232, %c128_233] : memref<36x256xf32, #tpu.memory_space<vmem>>, vector<4x16xf32>
    tpu.vector_store %arg7[%c12_232, %c128_233], %284 {strides = array<i32>} : memref<36x256xf32, #tpu.memory_space<vmem>>, vector<4x16xf32>,
    %286 = vector.extract_strided_slice %283 {offsets = [0, 1], sizes = [4, 16], strides = [1, 1]} : vector<4x18xf32> to vector<4x16xf32>
    %c16_234 = arith.constant 16 : index
    %c128_235 = arith.constant 128 : index
    %287 = vector.load %arg7[%c16_234, %c128_235] : memref<36x256xf32, #tpu.memory_space<vmem>>, vector<4x16xf32>
    tpu.vector_store %arg7[%c16_234, %c128_235], %286 {strides = array<i32>} : memref<36x256xf32, #tpu.memory_space<vmem>>, vector<4x16xf32>,
    %288 = vector.extract_strided_slice %283 {offsets = [0, 2], sizes = [4, 16], strides = [1, 1]} : vector<4x18xf32> to vector<4x16xf32>
    %c20_236 = arith.constant 20 : index
    %c128_237 = arith.constant 128 : index
    %289 = vector.load %arg7[%c20_236, %c128_237] : memref<36x256xf32, #tpu.memory_space<vmem>>, vector<4x16xf32>
    tpu.vector_store %arg7[%c20_236, %c128_237], %288 {strides = array<i32>} : memref<36x256xf32, #tpu.memory_space<vmem>>, vector<4x16xf32>,
    %c8_i32_238 = arith.constant 8 : i32
    %290 = arith.addi %3, %c8_i32_238 : i32
    %c2_i32_239 = arith.constant 2 : i32
    %291 = arith.addi %290, %c2_i32_239 : i32
    %c0_240 = arith.constant 0 : index
    %292 = arith.index_cast %291 : i32 to index
    %c0_241 = arith.constant 0 : index
    %293 = vector.load %arg6[%c0_240, %292, %c0_241] : memref<4x18x18xf32, #tpu.memory_space<vmem>>, vector<4x1x18xf32>
    %294 = vector.shape_cast %293 : vector<4x1x18xf32> to vector<4x18xf32>
    %295 = vector.extract_strided_slice %294 {offsets = [0, 0], sizes = [4, 16], strides = [1, 1]} : vector<4x18xf32> to vector<4x16xf32>
    %c24_242 = arith.constant 24 : index
    %c128_243 = arith.constant 128 : index
    %296 = vector.load %arg7[%c24_242, %c128_243] : memref<36x256xf32, #tpu.memory_space<vmem>>, vector<4x16xf32>
    tpu.vector_store %arg7[%c24_242, %c128_243], %295 {strides = array<i32>} : memref<36x256xf32, #tpu.memory_space<vmem>>, vector<4x16xf32>,
    %297 = vector.extract_strided_slice %294 {offsets = [0, 1], sizes = [4, 16], strides = [1, 1]} : vector<4x18xf32> to vector<4x16xf32>
    %c28_244 = arith.constant 28 : index
    %c128_245 = arith.constant 128 : index
    %298 = vector.load %arg7[%c28_244, %c128_245] : memref<36x256xf32, #tpu.memory_space<vmem>>, vector<4x16xf32>
    tpu.vector_store %arg7[%c28_244, %c128_245], %297 {strides = array<i32>} : memref<36x256xf32, #tpu.memory_space<vmem>>, vector<4x16xf32>,
    %299 = vector.extract_strided_slice %294 {offsets = [0, 2], sizes = [4, 16], strides = [1, 1]} : vector<4x18xf32> to vector<4x16xf32>
    %c32_246 = arith.constant 32 : index
    %c128_247 = arith.constant 128 : index
    %300 = vector.load %arg7[%c32_246, %c128_247] : memref<36x256xf32, #tpu.memory_space<vmem>>, vector<4x16xf32>
    tpu.vector_store %arg7[%c32_246, %c128_247], %299 {strides = array<i32>} : memref<36x256xf32, #tpu.memory_space<vmem>>, vector<4x16xf32>,
    %c9_i32 = arith.constant 9 : i32
    %301 = arith.addi %3, %c9_i32 : i32
    %c0_i32_248 = arith.constant 0 : i32
    %302 = arith.addi %301, %c0_i32_248 : i32
    %c0_249 = arith.constant 0 : index
    %303 = arith.index_cast %302 : i32 to index
    %c0_250 = arith.constant 0 : index
    %304 = vector.load %arg6[%c0_249, %303, %c0_250] : memref<4x18x18xf32, #tpu.memory_space<vmem>>, vector<4x1x18xf32>
    %305 = vector.shape_cast %304 : vector<4x1x18xf32> to vector<4x18xf32>
    %306 = vector.extract_strided_slice %305 {offsets = [0, 0], sizes = [4, 16], strides = [1, 1]} : vector<4x18xf32> to vector<4x16xf32>
    %c0_251 = arith.constant 0 : index
    %c144 = arith.constant 144 : index
    %307 = vector.load %arg7[%c0_251, %c144] : memref<36x256xf32, #tpu.memory_space<vmem>>, vector<4x16xf32>
    tpu.vector_store %arg7[%c0_251, %c144], %306 {strides = array<i32>} : memref<36x256xf32, #tpu.memory_space<vmem>>, vector<4x16xf32>,
    %308 = vector.extract_strided_slice %305 {offsets = [0, 1], sizes = [4, 16], strides = [1, 1]} : vector<4x18xf32> to vector<4x16xf32>
    %c4_252 = arith.constant 4 : index
    %c144_253 = arith.constant 144 : index
    %309 = vector.load %arg7[%c4_252, %c144_253] : memref<36x256xf32, #tpu.memory_space<vmem>>, vector<4x16xf32>
    tpu.vector_store %arg7[%c4_252, %c144_253], %308 {strides = array<i32>} : memref<36x256xf32, #tpu.memory_space<vmem>>, vector<4x16xf32>,
    %310 = vector.extract_strided_slice %305 {offsets = [0, 2], sizes = [4, 16], strides = [1, 1]} : vector<4x18xf32> to vector<4x16xf32>
    %c8_254 = arith.constant 8 : index
    %c144_255 = arith.constant 144 : index
    %311 = vector.load %arg7[%c8_254, %c144_255] : memref<36x256xf32, #tpu.memory_space<vmem>>, vector<4x16xf32>
    tpu.vector_store %arg7[%c8_254, %c144_255], %310 {strides = array<i32>} : memref<36x256xf32, #tpu.memory_space<vmem>>, vector<4x16xf32>,
    %c9_i32_256 = arith.constant 9 : i32
    %312 = arith.addi %3, %c9_i32_256 : i32
    %c1_i32_257 = arith.constant 1 : i32
    %313 = arith.addi %312, %c1_i32_257 : i32
    %c0_258 = arith.constant 0 : index
    %314 = arith.index_cast %313 : i32 to index
    %c0_259 = arith.constant 0 : index
    %315 = vector.load %arg6[%c0_258, %314, %c0_259] : memref<4x18x18xf32, #tpu.memory_space<vmem>>, vector<4x1x18xf32>
    %316 = vector.shape_cast %315 : vector<4x1x18xf32> to vector<4x18xf32>
    %317 = vector.extract_strided_slice %316 {offsets = [0, 0], sizes = [4, 16], strides = [1, 1]} : vector<4x18xf32> to vector<4x16xf32>
    %c12_260 = arith.constant 12 : index
    %c144_261 = arith.constant 144 : index
    %318 = vector.load %arg7[%c12_260, %c144_261] : memref<36x256xf32, #tpu.memory_space<vmem>>, vector<4x16xf32>
    tpu.vector_store %arg7[%c12_260, %c144_261], %317 {strides = array<i32>} : memref<36x256xf32, #tpu.memory_space<vmem>>, vector<4x16xf32>,
    %319 = vector.extract_strided_slice %316 {offsets = [0, 1], sizes = [4, 16], strides = [1, 1]} : vector<4x18xf32> to vector<4x16xf32>
    %c16_262 = arith.constant 16 : index
    %c144_263 = arith.constant 144 : index
    %320 = vector.load %arg7[%c16_262, %c144_263] : memref<36x256xf32, #tpu.memory_space<vmem>>, vector<4x16xf32>
    tpu.vector_store %arg7[%c16_262, %c144_263], %319 {strides = array<i32>} : memref<36x256xf32, #tpu.memory_space<vmem>>, vector<4x16xf32>,
    %321 = vector.extract_strided_slice %316 {offsets = [0, 2], sizes = [4, 16], strides = [1, 1]} : vector<4x18xf32> to vector<4x16xf32>
    %c20_264 = arith.constant 20 : index
    %c144_265 = arith.constant 144 : index
    %322 = vector.load %arg7[%c20_264, %c144_265] : memref<36x256xf32, #tpu.memory_space<vmem>>, vector<4x16xf32>
    tpu.vector_store %arg7[%c20_264, %c144_265], %321 {strides = array<i32>} : memref<36x256xf32, #tpu.memory_space<vmem>>, vector<4x16xf32>,
    %c9_i32_266 = arith.constant 9 : i32
    %323 = arith.addi %3, %c9_i32_266 : i32
    %c2_i32_267 = arith.constant 2 : i32
    %324 = arith.addi %323, %c2_i32_267 : i32
    %c0_268 = arith.constant 0 : index
    %325 = arith.index_cast %324 : i32 to index
    %c0_269 = arith.constant 0 : index
    %326 = vector.load %arg6[%c0_268, %325, %c0_269] : memref<4x18x18xf32, #tpu.memory_space<vmem>>, vector<4x1x18xf32>
    %327 = vector.shape_cast %326 : vector<4x1x18xf32> to vector<4x18xf32>
    %328 = vector.extract_strided_slice %327 {offsets = [0, 0], sizes = [4, 16], strides = [1, 1]} : vector<4x18xf32> to vector<4x16xf32>
    %c24_270 = arith.constant 24 : index
    %c144_271 = arith.constant 144 : index
    %329 = vector.load %arg7[%c24_270, %c144_271] : memref<36x256xf32, #tpu.memory_space<vmem>>, vector<4x16xf32>
    tpu.vector_store %arg7[%c24_270, %c144_271], %328 {strides = array<i32>} : memref<36x256xf32, #tpu.memory_space<vmem>>, vector<4x16xf32>,
    %330 = vector.extract_strided_slice %327 {offsets = [0, 1], sizes = [4, 16], strides = [1, 1]} : vector<4x18xf32> to vector<4x16xf32>
    %c28_272 = arith.constant 28 : index
    %c144_273 = arith.constant 144 : index
    %331 = vector.load %arg7[%c28_272, %c144_273] : memref<36x256xf32, #tpu.memory_space<vmem>>, vector<4x16xf32>
    tpu.vector_store %arg7[%c28_272, %c144_273], %330 {strides = array<i32>} : memref<36x256xf32, #tpu.memory_space<vmem>>, vector<4x16xf32>,
    %332 = vector.extract_strided_slice %327 {offsets = [0, 2], sizes = [4, 16], strides = [1, 1]} : vector<4x18xf32> to vector<4x16xf32>
    %c32_274 = arith.constant 32 : index
    %c144_275 = arith.constant 144 : index
    %333 = vector.load %arg7[%c32_274, %c144_275] : memref<36x256xf32, #tpu.memory_space<vmem>>, vector<4x16xf32>
    tpu.vector_store %arg7[%c32_274, %c144_275], %332 {strides = array<i32>} : memref<36x256xf32, #tpu.memory_space<vmem>>, vector<4x16xf32>,
    %c10_i32 = arith.constant 10 : i32
    %334 = arith.addi %3, %c10_i32 : i32
    %c0_i32_276 = arith.constant 0 : i32
    %335 = arith.addi %334, %c0_i32_276 : i32
    %c0_277 = arith.constant 0 : index
    %336 = arith.index_cast %335 : i32 to index
    %c0_278 = arith.constant 0 : index
    %337 = vector.load %arg6[%c0_277, %336, %c0_278] : memref<4x18x18xf32, #tpu.memory_space<vmem>>, vector<4x1x18xf32>
    %338 = vector.shape_cast %337 : vector<4x1x18xf32> to vector<4x18xf32>
    %339 = vector.extract_strided_slice %338 {offsets = [0, 0], sizes = [4, 16], strides = [1, 1]} : vector<4x18xf32> to vector<4x16xf32>
    %c0_279 = arith.constant 0 : index
    %c160 = arith.constant 160 : index
    %340 = vector.load %arg7[%c0_279, %c160] : memref<36x256xf32, #tpu.memory_space<vmem>>, vector<4x16xf32>
    tpu.vector_store %arg7[%c0_279, %c160], %339 {strides = array<i32>} : memref<36x256xf32, #tpu.memory_space<vmem>>, vector<4x16xf32>,
    %341 = vector.extract_strided_slice %338 {offsets = [0, 1], sizes = [4, 16], strides = [1, 1]} : vector<4x18xf32> to vector<4x16xf32>
    %c4_280 = arith.constant 4 : index
    %c160_281 = arith.constant 160 : index
    %342 = vector.load %arg7[%c4_280, %c160_281] : memref<36x256xf32, #tpu.memory_space<vmem>>, vector<4x16xf32>
    tpu.vector_store %arg7[%c4_280, %c160_281], %341 {strides = array<i32>} : memref<36x256xf32, #tpu.memory_space<vmem>>, vector<4x16xf32>,
    %343 = vector.extract_strided_slice %338 {offsets = [0, 2], sizes = [4, 16], strides = [1, 1]} : vector<4x18xf32> to vector<4x16xf32>
    %c8_282 = arith.constant 8 : index
    %c160_283 = arith.constant 160 : index
    %344 = vector.load %arg7[%c8_282, %c160_283] : memref<36x256xf32, #tpu.memory_space<vmem>>, vector<4x16xf32>
    tpu.vector_store %arg7[%c8_282, %c160_283], %343 {strides = array<i32>} : memref<36x256xf32, #tpu.memory_space<vmem>>, vector<4x16xf32>,
    %c10_i32_284 = arith.constant 10 : i32
    %345 = arith.addi %3, %c10_i32_284 : i32
    %c1_i32_285 = arith.constant 1 : i32
    %346 = arith.addi %345, %c1_i32_285 : i32
    %c0_286 = arith.constant 0 : index
    %347 = arith.index_cast %346 : i32 to index
    %c0_287 = arith.constant 0 : index
    %348 = vector.load %arg6[%c0_286, %347, %c0_287] : memref<4x18x18xf32, #tpu.memory_space<vmem>>, vector<4x1x18xf32>
    %349 = vector.shape_cast %348 : vector<4x1x18xf32> to vector<4x18xf32>
    %350 = vector.extract_strided_slice %349 {offsets = [0, 0], sizes = [4, 16], strides = [1, 1]} : vector<4x18xf32> to vector<4x16xf32>
    %c12_288 = arith.constant 12 : index
    %c160_289 = arith.constant 160 : index
    %351 = vector.load %arg7[%c12_288, %c160_289] : memref<36x256xf32, #tpu.memory_space<vmem>>, vector<4x16xf32>
    tpu.vector_store %arg7[%c12_288, %c160_289], %350 {strides = array<i32>} : memref<36x256xf32, #tpu.memory_space<vmem>>, vector<4x16xf32>,
    %352 = vector.extract_strided_slice %349 {offsets = [0, 1], sizes = [4, 16], strides = [1, 1]} : vector<4x18xf32> to vector<4x16xf32>
    %c16_290 = arith.constant 16 : index
    %c160_291 = arith.constant 160 : index
    %353 = vector.load %arg7[%c16_290, %c160_291] : memref<36x256xf32, #tpu.memory_space<vmem>>, vector<4x16xf32>
    tpu.vector_store %arg7[%c16_290, %c160_291], %352 {strides = array<i32>} : memref<36x256xf32, #tpu.memory_space<vmem>>, vector<4x16xf32>,
    %354 = vector.extract_strided_slice %349 {offsets = [0, 2], sizes = [4, 16], strides = [1, 1]} : vector<4x18xf32> to vector<4x16xf32>
    %c20_292 = arith.constant 20 : index
    %c160_293 = arith.constant 160 : index
    %355 = vector.load %arg7[%c20_292, %c160_293] : memref<36x256xf32, #tpu.memory_space<vmem>>, vector<4x16xf32>
    tpu.vector_store %arg7[%c20_292, %c160_293], %354 {strides = array<i32>} : memref<36x256xf32, #tpu.memory_space<vmem>>, vector<4x16xf32>,
    %c10_i32_294 = arith.constant 10 : i32
    %356 = arith.addi %3, %c10_i32_294 : i32
    %c2_i32_295 = arith.constant 2 : i32
    %357 = arith.addi %356, %c2_i32_295 : i32
    %c0_296 = arith.constant 0 : index
    %358 = arith.index_cast %357 : i32 to index
    %c0_297 = arith.constant 0 : index
    %359 = vector.load %arg6[%c0_296, %358, %c0_297] : memref<4x18x18xf32, #tpu.memory_space<vmem>>, vector<4x1x18xf32>
    %360 = vector.shape_cast %359 : vector<4x1x18xf32> to vector<4x18xf32>
    %361 = vector.extract_strided_slice %360 {offsets = [0, 0], sizes = [4, 16], strides = [1, 1]} : vector<4x18xf32> to vector<4x16xf32>
    %c24_298 = arith.constant 24 : index
    %c160_299 = arith.constant 160 : index
    %362 = vector.load %arg7[%c24_298, %c160_299] : memref<36x256xf32, #tpu.memory_space<vmem>>, vector<4x16xf32>
    tpu.vector_store %arg7[%c24_298, %c160_299], %361 {strides = array<i32>} : memref<36x256xf32, #tpu.memory_space<vmem>>, vector<4x16xf32>,
    %363 = vector.extract_strided_slice %360 {offsets = [0, 1], sizes = [4, 16], strides = [1, 1]} : vector<4x18xf32> to vector<4x16xf32>
    %c28_300 = arith.constant 28 : index
    %c160_301 = arith.constant 160 : index
    %364 = vector.load %arg7[%c28_300, %c160_301] : memref<36x256xf32, #tpu.memory_space<vmem>>, vector<4x16xf32>
    tpu.vector_store %arg7[%c28_300, %c160_301], %363 {strides = array<i32>} : memref<36x256xf32, #tpu.memory_space<vmem>>, vector<4x16xf32>,
    %365 = vector.extract_strided_slice %360 {offsets = [0, 2], sizes = [4, 16], strides = [1, 1]} : vector<4x18xf32> to vector<4x16xf32>
    %c32_302 = arith.constant 32 : index
    %c160_303 = arith.constant 160 : index
    %366 = vector.load %arg7[%c32_302, %c160_303] : memref<36x256xf32, #tpu.memory_space<vmem>>, vector<4x16xf32>
    tpu.vector_store %arg7[%c32_302, %c160_303], %365 {strides = array<i32>} : memref<36x256xf32, #tpu.memory_space<vmem>>, vector<4x16xf32>,
    %c11_i32 = arith.constant 11 : i32
    %367 = arith.addi %3, %c11_i32 : i32
    %c0_i32_304 = arith.constant 0 : i32
    %368 = arith.addi %367, %c0_i32_304 : i32
    %c0_305 = arith.constant 0 : index
    %369 = arith.index_cast %368 : i32 to index
    %c0_306 = arith.constant 0 : index
    %370 = vector.load %arg6[%c0_305, %369, %c0_306] : memref<4x18x18xf32, #tpu.memory_space<vmem>>, vector<4x1x18xf32>
    %371 = vector.shape_cast %370 : vector<4x1x18xf32> to vector<4x18xf32>
    %372 = vector.extract_strided_slice %371 {offsets = [0, 0], sizes = [4, 16], strides = [1, 1]} : vector<4x18xf32> to vector<4x16xf32>
    %c0_307 = arith.constant 0 : index
    %c176 = arith.constant 176 : index
    %373 = vector.load %arg7[%c0_307, %c176] : memref<36x256xf32, #tpu.memory_space<vmem>>, vector<4x16xf32>
    tpu.vector_store %arg7[%c0_307, %c176], %372 {strides = array<i32>} : memref<36x256xf32, #tpu.memory_space<vmem>>, vector<4x16xf32>,
    %374 = vector.extract_strided_slice %371 {offsets = [0, 1], sizes = [4, 16], strides = [1, 1]} : vector<4x18xf32> to vector<4x16xf32>
    %c4_308 = arith.constant 4 : index
    %c176_309 = arith.constant 176 : index
    %375 = vector.load %arg7[%c4_308, %c176_309] : memref<36x256xf32, #tpu.memory_space<vmem>>, vector<4x16xf32>
    tpu.vector_store %arg7[%c4_308, %c176_309], %374 {strides = array<i32>} : memref<36x256xf32, #tpu.memory_space<vmem>>, vector<4x16xf32>,
    %376 = vector.extract_strided_slice %371 {offsets = [0, 2], sizes = [4, 16], strides = [1, 1]} : vector<4x18xf32> to vector<4x16xf32>
    %c8_310 = arith.constant 8 : index
    %c176_311 = arith.constant 176 : index
    %377 = vector.load %arg7[%c8_310, %c176_311] : memref<36x256xf32, #tpu.memory_space<vmem>>, vector<4x16xf32>
    tpu.vector_store %arg7[%c8_310, %c176_311], %376 {strides = array<i32>} : memref<36x256xf32, #tpu.memory_space<vmem>>, vector<4x16xf32>,
    %c11_i32_312 = arith.constant 11 : i32
    %378 = arith.addi %3, %c11_i32_312 : i32
    %c1_i32_313 = arith.constant 1 : i32
    %379 = arith.addi %378, %c1_i32_313 : i32
    %c0_314 = arith.constant 0 : index
    %380 = arith.index_cast %379 : i32 to index
    %c0_315 = arith.constant 0 : index
    %381 = vector.load %arg6[%c0_314, %380, %c0_315] : memref<4x18x18xf32, #tpu.memory_space<vmem>>, vector<4x1x18xf32>
    %382 = vector.shape_cast %381 : vector<4x1x18xf32> to vector<4x18xf32>
    %383 = vector.extract_strided_slice %382 {offsets = [0, 0], sizes = [4, 16], strides = [1, 1]} : vector<4x18xf32> to vector<4x16xf32>
    %c12_316 = arith.constant 12 : index
    %c176_317 = arith.constant 176 : index
    %384 = vector.load %arg7[%c12_316, %c176_317] : memref<36x256xf32, #tpu.memory_space<vmem>>, vector<4x16xf32>
    tpu.vector_store %arg7[%c12_316, %c176_317], %383 {strides = array<i32>} : memref<36x256xf32, #tpu.memory_space<vmem>>, vector<4x16xf32>,
    %385 = vector.extract_strided_slice %382 {offsets = [0, 1], sizes = [4, 16], strides = [1, 1]} : vector<4x18xf32> to vector<4x16xf32>
    %c16_318 = arith.constant 16 : index
    %c176_319 = arith.constant 176 : index
    %386 = vector.load %arg7[%c16_318, %c176_319] : memref<36x256xf32, #tpu.memory_space<vmem>>, vector<4x16xf32>
    tpu.vector_store %arg7[%c16_318, %c176_319], %385 {strides = array<i32>} : memref<36x256xf32, #tpu.memory_space<vmem>>, vector<4x16xf32>,
    %387 = vector.extract_strided_slice %382 {offsets = [0, 2], sizes = [4, 16], strides = [1, 1]} : vector<4x18xf32> to vector<4x16xf32>
    %c20_320 = arith.constant 20 : index
    %c176_321 = arith.constant 176 : index
    %388 = vector.load %arg7[%c20_320, %c176_321] : memref<36x256xf32, #tpu.memory_space<vmem>>, vector<4x16xf32>
    tpu.vector_store %arg7[%c20_320, %c176_321], %387 {strides = array<i32>} : memref<36x256xf32, #tpu.memory_space<vmem>>, vector<4x16xf32>,
    %c11_i32_322 = arith.constant 11 : i32
    %389 = arith.addi %3, %c11_i32_322 : i32
    %c2_i32_323 = arith.constant 2 : i32
    %390 = arith.addi %389, %c2_i32_323 : i32
    %c0_324 = arith.constant 0 : index
    %391 = arith.index_cast %390 : i32 to index
    %c0_325 = arith.constant 0 : index
    %392 = vector.load %arg6[%c0_324, %391, %c0_325] : memref<4x18x18xf32, #tpu.memory_space<vmem>>, vector<4x1x18xf32>
    %393 = vector.shape_cast %392 : vector<4x1x18xf32> to vector<4x18xf32>
    %394 = vector.extract_strided_slice %393 {offsets = [0, 0], sizes = [4, 16], strides = [1, 1]} : vector<4x18xf32> to vector<4x16xf32>
    %c24_326 = arith.constant 24 : index
    %c176_327 = arith.constant 176 : index
    %395 = vector.load %arg7[%c24_326, %c176_327] : memref<36x256xf32, #tpu.memory_space<vmem>>, vector<4x16xf32>
    tpu.vector_store %arg7[%c24_326, %c176_327], %394 {strides = array<i32>} : memref<36x256xf32, #tpu.memory_space<vmem>>, vector<4x16xf32>,
    %396 = vector.extract_strided_slice %393 {offsets = [0, 1], sizes = [4, 16], strides = [1, 1]} : vector<4x18xf32> to vector<4x16xf32>
    %c28_328 = arith.constant 28 : index
    %c176_329 = arith.constant 176 : index
    %397 = vector.load %arg7[%c28_328, %c176_329] : memref<36x256xf32, #tpu.memory_space<vmem>>, vector<4x16xf32>
    tpu.vector_store %arg7[%c28_328, %c176_329], %396 {strides = array<i32>} : memref<36x256xf32, #tpu.memory_space<vmem>>, vector<4x16xf32>,
    %398 = vector.extract_strided_slice %393 {offsets = [0, 2], sizes = [4, 16], strides = [1, 1]} : vector<4x18xf32> to vector<4x16xf32>
    %c32_330 = arith.constant 32 : index
    %c176_331 = arith.constant 176 : index
    %399 = vector.load %arg7[%c32_330, %c176_331] : memref<36x256xf32, #tpu.memory_space<vmem>>, vector<4x16xf32>
    tpu.vector_store %arg7[%c32_330, %c176_331], %398 {strides = array<i32>} : memref<36x256xf32, #tpu.memory_space<vmem>>, vector<4x16xf32>,
    %c12_i32 = arith.constant 12 : i32
    %400 = arith.addi %3, %c12_i32 : i32
    %c0_i32_332 = arith.constant 0 : i32
    %401 = arith.addi %400, %c0_i32_332 : i32
    %c0_333 = arith.constant 0 : index
    %402 = arith.index_cast %401 : i32 to index
    %c0_334 = arith.constant 0 : index
    %403 = vector.load %arg6[%c0_333, %402, %c0_334] : memref<4x18x18xf32, #tpu.memory_space<vmem>>, vector<4x1x18xf32>
    %404 = vector.shape_cast %403 : vector<4x1x18xf32> to vector<4x18xf32>
    %405 = vector.extract_strided_slice %404 {offsets = [0, 0], sizes = [4, 16], strides = [1, 1]} : vector<4x18xf32> to vector<4x16xf32>
    %c0_335 = arith.constant 0 : index
    %c192 = arith.constant 192 : index
    %406 = vector.load %arg7[%c0_335, %c192] : memref<36x256xf32, #tpu.memory_space<vmem>>, vector<4x16xf32>
    tpu.vector_store %arg7[%c0_335, %c192], %405 {strides = array<i32>} : memref<36x256xf32, #tpu.memory_space<vmem>>, vector<4x16xf32>,
    %407 = vector.extract_strided_slice %404 {offsets = [0, 1], sizes = [4, 16], strides = [1, 1]} : vector<4x18xf32> to vector<4x16xf32>
    %c4_336 = arith.constant 4 : index
    %c192_337 = arith.constant 192 : index
    %408 = vector.load %arg7[%c4_336, %c192_337] : memref<36x256xf32, #tpu.memory_space<vmem>>, vector<4x16xf32>
    tpu.vector_store %arg7[%c4_336, %c192_337], %407 {strides = array<i32>} : memref<36x256xf32, #tpu.memory_space<vmem>>, vector<4x16xf32>,
    %409 = vector.extract_strided_slice %404 {offsets = [0, 2], sizes = [4, 16], strides = [1, 1]} : vector<4x18xf32> to vector<4x16xf32>
    %c8_338 = arith.constant 8 : index
    %c192_339 = arith.constant 192 : index
    %410 = vector.load %arg7[%c8_338, %c192_339] : memref<36x256xf32, #tpu.memory_space<vmem>>, vector<4x16xf32>
    tpu.vector_store %arg7[%c8_338, %c192_339], %409 {strides = array<i32>} : memref<36x256xf32, #tpu.memory_space<vmem>>, vector<4x16xf32>,
    %c12_i32_340 = arith.constant 12 : i32
    %411 = arith.addi %3, %c12_i32_340 : i32
    %c1_i32_341 = arith.constant 1 : i32
    %412 = arith.addi %411, %c1_i32_341 : i32
    %c0_342 = arith.constant 0 : index
    %413 = arith.index_cast %412 : i32 to index
    %c0_343 = arith.constant 0 : index
    %414 = vector.load %arg6[%c0_342, %413, %c0_343] : memref<4x18x18xf32, #tpu.memory_space<vmem>>, vector<4x1x18xf32>
    %415 = vector.shape_cast %414 : vector<4x1x18xf32> to vector<4x18xf32>
    %416 = vector.extract_strided_slice %415 {offsets = [0, 0], sizes = [4, 16], strides = [1, 1]} : vector<4x18xf32> to vector<4x16xf32>
    %c12_344 = arith.constant 12 : index
    %c192_345 = arith.constant 192 : index
    %417 = vector.load %arg7[%c12_344, %c192_345] : memref<36x256xf32, #tpu.memory_space<vmem>>, vector<4x16xf32>
    tpu.vector_store %arg7[%c12_344, %c192_345], %416 {strides = array<i32>} : memref<36x256xf32, #tpu.memory_space<vmem>>, vector<4x16xf32>,
    %418 = vector.extract_strided_slice %415 {offsets = [0, 1], sizes = [4, 16], strides = [1, 1]} : vector<4x18xf32> to vector<4x16xf32>
    %c16_346 = arith.constant 16 : index
    %c192_347 = arith.constant 192 : index
    %419 = vector.load %arg7[%c16_346, %c192_347] : memref<36x256xf32, #tpu.memory_space<vmem>>, vector<4x16xf32>
    tpu.vector_store %arg7[%c16_346, %c192_347], %418 {strides = array<i32>} : memref<36x256xf32, #tpu.memory_space<vmem>>, vector<4x16xf32>,
    %420 = vector.extract_strided_slice %415 {offsets = [0, 2], sizes = [4, 16], strides = [1, 1]} : vector<4x18xf32> to vector<4x16xf32>
    %c20_348 = arith.constant 20 : index
    %c192_349 = arith.constant 192 : index
    %421 = vector.load %arg7[%c20_348, %c192_349] : memref<36x256xf32, #tpu.memory_space<vmem>>, vector<4x16xf32>
    tpu.vector_store %arg7[%c20_348, %c192_349], %420 {strides = array<i32>} : memref<36x256xf32, #tpu.memory_space<vmem>>, vector<4x16xf32>,
    %c12_i32_350 = arith.constant 12 : i32
    %422 = arith.addi %3, %c12_i32_350 : i32
    %c2_i32_351 = arith.constant 2 : i32
    %423 = arith.addi %422, %c2_i32_351 : i32
    %c0_352 = arith.constant 0 : index
    %424 = arith.index_cast %423 : i32 to index
    %c0_353 = arith.constant 0 : index
    %425 = vector.load %arg6[%c0_352, %424, %c0_353] : memref<4x18x18xf32, #tpu.memory_space<vmem>>, vector<4x1x18xf32>
    %426 = vector.shape_cast %425 : vector<4x1x18xf32> to vector<4x18xf32>
    %427 = vector.extract_strided_slice %426 {offsets = [0, 0], sizes = [4, 16], strides = [1, 1]} : vector<4x18xf32> to vector<4x16xf32>
    %c24_354 = arith.constant 24 : index
    %c192_355 = arith.constant 192 : index
    %428 = vector.load %arg7[%c24_354, %c192_355] : memref<36x256xf32, #tpu.memory_space<vmem>>, vector<4x16xf32>
    tpu.vector_store %arg7[%c24_354, %c192_355], %427 {strides = array<i32>} : memref<36x256xf32, #tpu.memory_space<vmem>>, vector<4x16xf32>,
    %429 = vector.extract_strided_slice %426 {offsets = [0, 1], sizes = [4, 16], strides = [1, 1]} : vector<4x18xf32> to vector<4x16xf32>
    %c28_356 = arith.constant 28 : index
    %c192_357 = arith.constant 192 : index
    %430 = vector.load %arg7[%c28_356, %c192_357] : memref<36x256xf32, #tpu.memory_space<vmem>>, vector<4x16xf32>
    tpu.vector_store %arg7[%c28_356, %c192_357], %429 {strides = array<i32>} : memref<36x256xf32, #tpu.memory_space<vmem>>, vector<4x16xf32>,
    %431 = vector.extract_strided_slice %426 {offsets = [0, 2], sizes = [4, 16], strides = [1, 1]} : vector<4x18xf32> to vector<4x16xf32>
    %c32_358 = arith.constant 32 : index
    %c192_359 = arith.constant 192 : index
    %432 = vector.load %arg7[%c32_358, %c192_359] : memref<36x256xf32, #tpu.memory_space<vmem>>, vector<4x16xf32>
    tpu.vector_store %arg7[%c32_358, %c192_359], %431 {strides = array<i32>} : memref<36x256xf32, #tpu.memory_space<vmem>>, vector<4x16xf32>,
    %c13_i32 = arith.constant 13 : i32
    %433 = arith.addi %3, %c13_i32 : i32
    %c0_i32_360 = arith.constant 0 : i32
    %434 = arith.addi %433, %c0_i32_360 : i32
    %c0_361 = arith.constant 0 : index
    %435 = arith.index_cast %434 : i32 to index
    %c0_362 = arith.constant 0 : index
    %436 = vector.load %arg6[%c0_361, %435, %c0_362] : memref<4x18x18xf32, #tpu.memory_space<vmem>>, vector<4x1x18xf32>
    %437 = vector.shape_cast %436 : vector<4x1x18xf32> to vector<4x18xf32>
    %438 = vector.extract_strided_slice %437 {offsets = [0, 0], sizes = [4, 16], strides = [1, 1]} : vector<4x18xf32> to vector<4x16xf32>
    %c0_363 = arith.constant 0 : index
    %c208 = arith.constant 208 : index
    %439 = vector.load %arg7[%c0_363, %c208] : memref<36x256xf32, #tpu.memory_space<vmem>>, vector<4x16xf32>
    tpu.vector_store %arg7[%c0_363, %c208], %438 {strides = array<i32>} : memref<36x256xf32, #tpu.memory_space<vmem>>, vector<4x16xf32>,
    %440 = vector.extract_strided_slice %437 {offsets = [0, 1], sizes = [4, 16], strides = [1, 1]} : vector<4x18xf32> to vector<4x16xf32>
    %c4_364 = arith.constant 4 : index
    %c208_365 = arith.constant 208 : index
    %441 = vector.load %arg7[%c4_364, %c208_365] : memref<36x256xf32, #tpu.memory_space<vmem>>, vector<4x16xf32>
    tpu.vector_store %arg7[%c4_364, %c208_365], %440 {strides = array<i32>} : memref<36x256xf32, #tpu.memory_space<vmem>>, vector<4x16xf32>,
    %442 = vector.extract_strided_slice %437 {offsets = [0, 2], sizes = [4, 16], strides = [1, 1]} : vector<4x18xf32> to vector<4x16xf32>
    %c8_366 = arith.constant 8 : index
    %c208_367 = arith.constant 208 : index
    %443 = vector.load %arg7[%c8_366, %c208_367] : memref<36x256xf32, #tpu.memory_space<vmem>>, vector<4x16xf32>
    tpu.vector_store %arg7[%c8_366, %c208_367], %442 {strides = array<i32>} : memref<36x256xf32, #tpu.memory_space<vmem>>, vector<4x16xf32>,
    %c13_i32_368 = arith.constant 13 : i32
    %444 = arith.addi %3, %c13_i32_368 : i32
    %c1_i32_369 = arith.constant 1 : i32
    %445 = arith.addi %444, %c1_i32_369 : i32
    %c0_370 = arith.constant 0 : index
    %446 = arith.index_cast %445 : i32 to index
    %c0_371 = arith.constant 0 : index
    %447 = vector.load %arg6[%c0_370, %446, %c0_371] : memref<4x18x18xf32, #tpu.memory_space<vmem>>, vector<4x1x18xf32>
    %448 = vector.shape_cast %447 : vector<4x1x18xf32> to vector<4x18xf32>
    %449 = vector.extract_strided_slice %448 {offsets = [0, 0], sizes = [4, 16], strides = [1, 1]} : vector<4x18xf32> to vector<4x16xf32>
    %c12_372 = arith.constant 12 : index
    %c208_373 = arith.constant 208 : index
    %450 = vector.load %arg7[%c12_372, %c208_373] : memref<36x256xf32, #tpu.memory_space<vmem>>, vector<4x16xf32>
    tpu.vector_store %arg7[%c12_372, %c208_373], %449 {strides = array<i32>} : memref<36x256xf32, #tpu.memory_space<vmem>>, vector<4x16xf32>,
    %451 = vector.extract_strided_slice %448 {offsets = [0, 1], sizes = [4, 16], strides = [1, 1]} : vector<4x18xf32> to vector<4x16xf32>
    %c16_374 = arith.constant 16 : index
    %c208_375 = arith.constant 208 : index
    %452 = vector.load %arg7[%c16_374, %c208_375] : memref<36x256xf32, #tpu.memory_space<vmem>>, vector<4x16xf32>
    tpu.vector_store %arg7[%c16_374, %c208_375], %451 {strides = array<i32>} : memref<36x256xf32, #tpu.memory_space<vmem>>, vector<4x16xf32>,
    %453 = vector.extract_strided_slice %448 {offsets = [0, 2], sizes = [4, 16], strides = [1, 1]} : vector<4x18xf32> to vector<4x16xf32>
    %c20_376 = arith.constant 20 : index
    %c208_377 = arith.constant 208 : index
    %454 = vector.load %arg7[%c20_376, %c208_377] : memref<36x256xf32, #tpu.memory_space<vmem>>, vector<4x16xf32>
    tpu.vector_store %arg7[%c20_376, %c208_377], %453 {strides = array<i32>} : memref<36x256xf32, #tpu.memory_space<vmem>>, vector<4x16xf32>,
    %c13_i32_378 = arith.constant 13 : i32
    %455 = arith.addi %3, %c13_i32_378 : i32
    %c2_i32_379 = arith.constant 2 : i32
    %456 = arith.addi %455, %c2_i32_379 : i32
    %c0_380 = arith.constant 0 : index
    %457 = arith.index_cast %456 : i32 to index
    %c0_381 = arith.constant 0 : index
    %458 = vector.load %arg6[%c0_380, %457, %c0_381] : memref<4x18x18xf32, #tpu.memory_space<vmem>>, vector<4x1x18xf32>
    %459 = vector.shape_cast %458 : vector<4x1x18xf32> to vector<4x18xf32>
    %460 = vector.extract_strided_slice %459 {offsets = [0, 0], sizes = [4, 16], strides = [1, 1]} : vector<4x18xf32> to vector<4x16xf32>
    %c24_382 = arith.constant 24 : index
    %c208_383 = arith.constant 208 : index
    %461 = vector.load %arg7[%c24_382, %c208_383] : memref<36x256xf32, #tpu.memory_space<vmem>>, vector<4x16xf32>
    tpu.vector_store %arg7[%c24_382, %c208_383], %460 {strides = array<i32>} : memref<36x256xf32, #tpu.memory_space<vmem>>, vector<4x16xf32>,
    %462 = vector.extract_strided_slice %459 {offsets = [0, 1], sizes = [4, 16], strides = [1, 1]} : vector<4x18xf32> to vector<4x16xf32>
    %c28_384 = arith.constant 28 : index
    %c208_385 = arith.constant 208 : index
    %463 = vector.load %arg7[%c28_384, %c208_385] : memref<36x256xf32, #tpu.memory_space<vmem>>, vector<4x16xf32>
    tpu.vector_store %arg7[%c28_384, %c208_385], %462 {strides = array<i32>} : memref<36x256xf32, #tpu.memory_space<vmem>>, vector<4x16xf32>,
    %464 = vector.extract_strided_slice %459 {offsets = [0, 2], sizes = [4, 16], strides = [1, 1]} : vector<4x18xf32> to vector<4x16xf32>
    %c32_386 = arith.constant 32 : index
    %c208_387 = arith.constant 208 : index
    %465 = vector.load %arg7[%c32_386, %c208_387] : memref<36x256xf32, #tpu.memory_space<vmem>>, vector<4x16xf32>
    tpu.vector_store %arg7[%c32_386, %c208_387], %464 {strides = array<i32>} : memref<36x256xf32, #tpu.memory_space<vmem>>, vector<4x16xf32>,
    %c14_i32 = arith.constant 14 : i32
    %466 = arith.addi %3, %c14_i32 : i32
    %c0_i32_388 = arith.constant 0 : i32
    %467 = arith.addi %466, %c0_i32_388 : i32
    %c0_389 = arith.constant 0 : index
    %468 = arith.index_cast %467 : i32 to index
    %c0_390 = arith.constant 0 : index
    %469 = vector.load %arg6[%c0_389, %468, %c0_390] : memref<4x18x18xf32, #tpu.memory_space<vmem>>, vector<4x1x18xf32>
    %470 = vector.shape_cast %469 : vector<4x1x18xf32> to vector<4x18xf32>
    %471 = vector.extract_strided_slice %470 {offsets = [0, 0], sizes = [4, 16], strides = [1, 1]} : vector<4x18xf32> to vector<4x16xf32>
    %c0_391 = arith.constant 0 : index
    %c224 = arith.constant 224 : index
    %472 = vector.load %arg7[%c0_391, %c224] : memref<36x256xf32, #tpu.memory_space<vmem>>, vector<4x16xf32>
    tpu.vector_store %arg7[%c0_391, %c224], %471 {strides = array<i32>} : memref<36x256xf32, #tpu.memory_space<vmem>>, vector<4x16xf32>,
    %473 = vector.extract_strided_slice %470 {offsets = [0, 1], sizes = [4, 16], strides = [1, 1]} : vector<4x18xf32> to vector<4x16xf32>
    %c4_392 = arith.constant 4 : index
    %c224_393 = arith.constant 224 : index
    %474 = vector.load %arg7[%c4_392, %c224_393] : memref<36x256xf32, #tpu.memory_space<vmem>>, vector<4x16xf32>
    tpu.vector_store %arg7[%c4_392, %c224_393], %473 {strides = array<i32>} : memref<36x256xf32, #tpu.memory_space<vmem>>, vector<4x16xf32>,
    %475 = vector.extract_strided_slice %470 {offsets = [0, 2], sizes = [4, 16], strides = [1, 1]} : vector<4x18xf32> to vector<4x16xf32>
    %c8_394 = arith.constant 8 : index
    %c224_395 = arith.constant 224 : index
    %476 = vector.load %arg7[%c8_394, %c224_395] : memref<36x256xf32, #tpu.memory_space<vmem>>, vector<4x16xf32>
    tpu.vector_store %arg7[%c8_394, %c224_395], %475 {strides = array<i32>} : memref<36x256xf32, #tpu.memory_space<vmem>>, vector<4x16xf32>,
    %c14_i32_396 = arith.constant 14 : i32
    %477 = arith.addi %3, %c14_i32_396 : i32
    %c1_i32_397 = arith.constant 1 : i32
    %478 = arith.addi %477, %c1_i32_397 : i32
    %c0_398 = arith.constant 0 : index
    %479 = arith.index_cast %478 : i32 to index
    %c0_399 = arith.constant 0 : index
    %480 = vector.load %arg6[%c0_398, %479, %c0_399] : memref<4x18x18xf32, #tpu.memory_space<vmem>>, vector<4x1x18xf32>
    %481 = vector.shape_cast %480 : vector<4x1x18xf32> to vector<4x18xf32>
    %482 = vector.extract_strided_slice %481 {offsets = [0, 0], sizes = [4, 16], strides = [1, 1]} : vector<4x18xf32> to vector<4x16xf32>
    %c12_400 = arith.constant 12 : index
    %c224_401 = arith.constant 224 : index
    %483 = vector.load %arg7[%c12_400, %c224_401] : memref<36x256xf32, #tpu.memory_space<vmem>>, vector<4x16xf32>
    tpu.vector_store %arg7[%c12_400, %c224_401], %482 {strides = array<i32>} : memref<36x256xf32, #tpu.memory_space<vmem>>, vector<4x16xf32>,
    %484 = vector.extract_strided_slice %481 {offsets = [0, 1], sizes = [4, 16], strides = [1, 1]} : vector<4x18xf32> to vector<4x16xf32>
    %c16_402 = arith.constant 16 : index
    %c224_403 = arith.constant 224 : index
    %485 = vector.load %arg7[%c16_402, %c224_403] : memref<36x256xf32, #tpu.memory_space<vmem>>, vector<4x16xf32>
    tpu.vector_store %arg7[%c16_402, %c224_403], %484 {strides = array<i32>} : memref<36x256xf32, #tpu.memory_space<vmem>>, vector<4x16xf32>,
    %486 = vector.extract_strided_slice %481 {offsets = [0, 2], sizes = [4, 16], strides = [1, 1]} : vector<4x18xf32> to vector<4x16xf32>
    %c20_404 = arith.constant 20 : index
    %c224_405 = arith.constant 224 : index
    %487 = vector.load %arg7[%c20_404, %c224_405] : memref<36x256xf32, #tpu.memory_space<vmem>>, vector<4x16xf32>
    tpu.vector_store %arg7[%c20_404, %c224_405], %486 {strides = array<i32>} : memref<36x256xf32, #tpu.memory_space<vmem>>, vector<4x16xf32>,
    %c14_i32_406 = arith.constant 14 : i32
    %488 = arith.addi %3, %c14_i32_406 : i32
    %c2_i32_407 = arith.constant 2 : i32
    %489 = arith.addi %488, %c2_i32_407 : i32
    %c0_408 = arith.constant 0 : index
    %490 = arith.index_cast %489 : i32 to index
    %c0_409 = arith.constant 0 : index
    %491 = vector.load %arg6[%c0_408, %490, %c0_409] : memref<4x18x18xf32, #tpu.memory_space<vmem>>, vector<4x1x18xf32>
    %492 = vector.shape_cast %491 : vector<4x1x18xf32> to vector<4x18xf32>
    %493 = vector.extract_strided_slice %492 {offsets = [0, 0], sizes = [4, 16], strides = [1, 1]} : vector<4x18xf32> to vector<4x16xf32>
    %c24_410 = arith.constant 24 : index
    %c224_411 = arith.constant 224 : index
    %494 = vector.load %arg7[%c24_410, %c224_411] : memref<36x256xf32, #tpu.memory_space<vmem>>, vector<4x16xf32>
    tpu.vector_store %arg7[%c24_410, %c224_411], %493 {strides = array<i32>} : memref<36x256xf32, #tpu.memory_space<vmem>>, vector<4x16xf32>,
    %495 = vector.extract_strided_slice %492 {offsets = [0, 1], sizes = [4, 16], strides = [1, 1]} : vector<4x18xf32> to vector<4x16xf32>
    %c28_412 = arith.constant 28 : index
    %c224_413 = arith.constant 224 : index
    %496 = vector.load %arg7[%c28_412, %c224_413] : memref<36x256xf32, #tpu.memory_space<vmem>>, vector<4x16xf32>
    tpu.vector_store %arg7[%c28_412, %c224_413], %495 {strides = array<i32>} : memref<36x256xf32, #tpu.memory_space<vmem>>, vector<4x16xf32>,
    %497 = vector.extract_strided_slice %492 {offsets = [0, 2], sizes = [4, 16], strides = [1, 1]} : vector<4x18xf32> to vector<4x16xf32>
    %c32_414 = arith.constant 32 : index
    %c224_415 = arith.constant 224 : index
    %498 = vector.load %arg7[%c32_414, %c224_415] : memref<36x256xf32, #tpu.memory_space<vmem>>, vector<4x16xf32>
    tpu.vector_store %arg7[%c32_414, %c224_415], %497 {strides = array<i32>} : memref<36x256xf32, #tpu.memory_space<vmem>>, vector<4x16xf32>,
    %c15_i32 = arith.constant 15 : i32
    %499 = arith.addi %3, %c15_i32 : i32
    %c0_i32_416 = arith.constant 0 : i32
    %500 = arith.addi %499, %c0_i32_416 : i32
    %c0_417 = arith.constant 0 : index
    %501 = arith.index_cast %500 : i32 to index
    %c0_418 = arith.constant 0 : index
    %502 = vector.load %arg6[%c0_417, %501, %c0_418] : memref<4x18x18xf32, #tpu.memory_space<vmem>>, vector<4x1x18xf32>
    %503 = vector.shape_cast %502 : vector<4x1x18xf32> to vector<4x18xf32>
    %504 = vector.extract_strided_slice %503 {offsets = [0, 0], sizes = [4, 16], strides = [1, 1]} : vector<4x18xf32> to vector<4x16xf32>
    %c0_419 = arith.constant 0 : index
    %c240 = arith.constant 240 : index
    %505 = vector.load %arg7[%c0_419, %c240] : memref<36x256xf32, #tpu.memory_space<vmem>>, vector<4x16xf32>
    tpu.vector_store %arg7[%c0_419, %c240], %504 {strides = array<i32>} : memref<36x256xf32, #tpu.memory_space<vmem>>, vector<4x16xf32>,
    %506 = vector.extract_strided_slice %503 {offsets = [0, 1], sizes = [4, 16], strides = [1, 1]} : vector<4x18xf32> to vector<4x16xf32>
    %c4_420 = arith.constant 4 : index
    %c240_421 = arith.constant 240 : index
    %507 = vector.load %arg7[%c4_420, %c240_421] : memref<36x256xf32, #tpu.memory_space<vmem>>, vector<4x16xf32>
    tpu.vector_store %arg7[%c4_420, %c240_421], %506 {strides = array<i32>} : memref<36x256xf32, #tpu.memory_space<vmem>>, vector<4x16xf32>,
    %508 = vector.extract_strided_slice %503 {offsets = [0, 2], sizes = [4, 16], strides = [1, 1]} : vector<4x18xf32> to vector<4x16xf32>
    %c8_422 = arith.constant 8 : index
    %c240_423 = arith.constant 240 : index
    %509 = vector.load %arg7[%c8_422, %c240_423] : memref<36x256xf32, #tpu.memory_space<vmem>>, vector<4x16xf32>
    tpu.vector_store %arg7[%c8_422, %c240_423], %508 {strides = array<i32>} : memref<36x256xf32, #tpu.memory_space<vmem>>, vector<4x16xf32>,
    %c15_i32_424 = arith.constant 15 : i32
    %510 = arith.addi %3, %c15_i32_424 : i32
    %c1_i32_425 = arith.constant 1 : i32
    %511 = arith.addi %510, %c1_i32_425 : i32
    %c0_426 = arith.constant 0 : index
    %512 = arith.index_cast %511 : i32 to index
    %c0_427 = arith.constant 0 : index
    %513 = vector.load %arg6[%c0_426, %512, %c0_427] : memref<4x18x18xf32, #tpu.memory_space<vmem>>, vector<4x1x18xf32>
    %514 = vector.shape_cast %513 : vector<4x1x18xf32> to vector<4x18xf32>
    %515 = vector.extract_strided_slice %514 {offsets = [0, 0], sizes = [4, 16], strides = [1, 1]} : vector<4x18xf32> to vector<4x16xf32>
    %c12_428 = arith.constant 12 : index
    %c240_429 = arith.constant 240 : index
    %516 = vector.load %arg7[%c12_428, %c240_429] : memref<36x256xf32, #tpu.memory_space<vmem>>, vector<4x16xf32>
    tpu.vector_store %arg7[%c12_428, %c240_429], %515 {strides = array<i32>} : memref<36x256xf32, #tpu.memory_space<vmem>>, vector<4x16xf32>,
    %517 = vector.extract_strided_slice %514 {offsets = [0, 1], sizes = [4, 16], strides = [1, 1]} : vector<4x18xf32> to vector<4x16xf32>
    %c16_430 = arith.constant 16 : index
    %c240_431 = arith.constant 240 : index
    %518 = vector.load %arg7[%c16_430, %c240_431] : memref<36x256xf32, #tpu.memory_space<vmem>>, vector<4x16xf32>
    tpu.vector_store %arg7[%c16_430, %c240_431], %517 {strides = array<i32>} : memref<36x256xf32, #tpu.memory_space<vmem>>, vector<4x16xf32>,
    %519 = vector.extract_strided_slice %514 {offsets = [0, 2], sizes = [4, 16], strides = [1, 1]} : vector<4x18xf32> to vector<4x16xf32>
    %c20_432 = arith.constant 20 : index
    %c240_433 = arith.constant 240 : index
    %520 = vector.load %arg7[%c20_432, %c240_433] : memref<36x256xf32, #tpu.memory_space<vmem>>, vector<4x16xf32>
    tpu.vector_store %arg7[%c20_432, %c240_433], %519 {strides = array<i32>} : memref<36x256xf32, #tpu.memory_space<vmem>>, vector<4x16xf32>,
    %c15_i32_434 = arith.constant 15 : i32
    %521 = arith.addi %3, %c15_i32_434 : i32
    %c2_i32_435 = arith.constant 2 : i32
    %522 = arith.addi %521, %c2_i32_435 : i32
    %c0_436 = arith.constant 0 : index
    %523 = arith.index_cast %522 : i32 to index
    %c0_437 = arith.constant 0 : index
    %524 = vector.load %arg6[%c0_436, %523, %c0_437] : memref<4x18x18xf32, #tpu.memory_space<vmem>>, vector<4x1x18xf32>
    %525 = vector.shape_cast %524 : vector<4x1x18xf32> to vector<4x18xf32>
    %526 = vector.extract_strided_slice %525 {offsets = [0, 0], sizes = [4, 16], strides = [1, 1]} : vector<4x18xf32> to vector<4x16xf32>
    %c24_438 = arith.constant 24 : index
    %c240_439 = arith.constant 240 : index
    %527 = vector.load %arg7[%c24_438, %c240_439] : memref<36x256xf32, #tpu.memory_space<vmem>>, vector<4x16xf32>
    tpu.vector_store %arg7[%c24_438, %c240_439], %526 {strides = array<i32>} : memref<36x256xf32, #tpu.memory_space<vmem>>, vector<4x16xf32>,
    %528 = vector.extract_strided_slice %525 {offsets = [0, 1], sizes = [4, 16], strides = [1, 1]} : vector<4x18xf32> to vector<4x16xf32>
    %c28_440 = arith.constant 28 : index
    %c240_441 = arith.constant 240 : index
    %529 = vector.load %arg7[%c28_440, %c240_441] : memref<36x256xf32, #tpu.memory_space<vmem>>, vector<4x16xf32>
    tpu.vector_store %arg7[%c28_440, %c240_441], %528 {strides = array<i32>} : memref<36x256xf32, #tpu.memory_space<vmem>>, vector<4x16xf32>,
    %530 = vector.extract_strided_slice %525 {offsets = [0, 2], sizes = [4, 16], strides = [1, 1]} : vector<4x18xf32> to vector<4x16xf32>
    %c32_442 = arith.constant 32 : index
    %c240_443 = arith.constant 240 : index
    %531 = vector.load %arg7[%c32_442, %c240_443] : memref<36x256xf32, #tpu.memory_space<vmem>>, vector<4x16xf32>
    tpu.vector_store %arg7[%c32_442, %c240_443], %530 {strides = array<i32>} : memref<36x256xf32, #tpu.memory_space<vmem>>, vector<4x16xf32>,
    %c0_444 = arith.constant 0 : index
    %c0_445 = arith.constant 0 : index
    %532 = vector.load %arg3[%c0_444, %c0_445] : memref<8x36xf32, #tpu.memory_space<vmem>>, vector<8x36xf32>
    %c0_446 = arith.constant 0 : index
    %c0_447 = arith.constant 0 : index
    %533 = vector.load %arg7[%c0_446, %c0_447] : memref<36x256xf32, #tpu.memory_space<vmem>>, vector<36x256xf32>
    %cst = arith.constant dense<0.000000e+00> : vector<8x256xf32>
    %534 = tpu.matmul %532, %533, %cst {dimension_numbers = #tpu.dot_dimension_numbers<[1], [0], [0], [1], [0, 0, 1, 1], [], []>} : vector<8x36xf32>, vector<36x256xf32>, vector<8x256xf32> -> vector<8x256xf32>
    %c0_448 = arith.constant 0 : index
    %c0_449 = arith.constant 0 : index
    %535 = vector.load %arg4[%c0_448, %c0_449] : memref<8x1xf32, #tpu.memory_space<vmem>>, vector<8x1xf32>
    %536 = vector.broadcast %535 : vector<8x1xf32> to vector<8x256xf32>
    %537 = arith.addf %534, %536 : vector<8x256xf32>
    %c0_450 = arith.constant 0 : index
    %c0_451 = arith.constant 0 : index
    %c0_452 = arith.constant 0 : index
    %538 = vector.load %arg5[%c0_450, %c0_451, %c0_452] : memref<1x8x256xf32, #tpu.memory_space<vmem>>, vector<1x8x256xf32>
    %539 = vector.shape_cast %538 : vector<1x8x256xf32> to vector<8x256xf32>
    %540 = vector.shape_cast %537 : vector<8x256xf32> to vector<1x8x256xf32>
    tpu.vector_store %arg5[%c0_450, %c0_451, %c0_452], %540 {strides = array<i32>} : memref<1x8x256xf32, #tpu.memory_space<vmem>>, vector<1x8x256xf32>,
    return
  }
  func.func @transform_0(%arg0: i32, %arg1: i32) -> (i32, i32, i32, i32) {
    %c0_i32 = arith.constant 0 : i32
    %c0_i32_0 = arith.constant 0 : i32
    %c0_i32_1 = arith.constant 0 : i32
    %c0_i32_2 = arith.constant 0 : i32
    return %arg0, %c0_i32, %c0_i32_0, %c0_i32_1 : i32, i32, i32, i32
  }
  func.func @transform_1(%arg0: i32, %arg1: i32) -> (i32, i32) {
    %c0_i32 = arith.constant 0 : i32
    %c0_i32_0 = arith.constant 0 : i32
    %c0_i32_1 = arith.constant 0 : i32
    return %c0_i32, %c0_i32_0 : i32, i32
  }
  func.func @transform_2(%arg0: i32, %arg1: i32) -> (i32, i32) {
    %c0_i32 = arith.constant 0 : i32
    %c0_i32_0 = arith.constant 0 : i32
    %c0_i32_1 = arith.constant 0 : i32
    return %c0_i32, %c0_i32_0 : i32, i32
  }
  func.func @transform_3(%arg0: i32, %arg1: i32) -> (i32, i32, i32) {
    %c0_i32 = arith.constant 0 : i32
    %c0_i32_0 = arith.constant 0 : i32
    return %arg0, %c0_i32, %arg1 : i32, i32, i32
  }
}

</mosaic_0001>

<bundles_post_ra>
// kernel: tpu_custom_call.1
= control target key start
LH: loop header
LB: loop body
LE: loop exit
PB: predicated region body
PF: predicated region fallthrough
CT: control target
= control target key end

     0   :  { %8 = vsyncpa [#allocation5], 0  ;;  %s3812_s0 = inlined_call_operand.hbm [shape: f32[2,4,16,16], index: 0, kind: input, shape index: {}]   ;;  %s3813_s1 = inlined_call_operand.vmem [shape: f32[8,36], index: 1, kind: input, shape index: {}]   ;;  %s3814_s2 = inlined_call_operand.vmem [shape: f32[8,1], index: 2, kind: input, shape index: {}]   ;;  %s3815_s3 = inlined_call_operand.hbm [shape: f32[2,8,256], index: 3, kind: output, shape index: {}]  }
   0x1   :  { %10 = vsyncpa [#allocation5 + $0x1], 0 }
   0x2   :  { %11 = vsyncpa [#allocation6], 0 }
   0x3   :  { %13 = vsyncpa [#allocation6 + $0x1], 0  ;;  %s2772_s12 = smov 0   ;;  %s2774_s13 = smov 0  }
   0x4   :  { %s2776_s14 = smov 0   ;;  %s2778_s15 = smov 0  }
   0x5   :  { %s2780_s16 = smov 0   ;;  %s2782_s17 = smov 0  }
   0x6 LB: > { %s2309_s18 = sadd.s32 4294967295, %s2722_s17   ;;  %s2310_s19 = sadd.s32 4294967294, %s2722_s17   ;;  %s2722_s17 = sphi %s2782_s17, %s19_s17   ;;  %s2718_s16 = sphi %s2780_s16, %s3884_s16   ;;  %s2714_s15 = sphi %s2778_s15, %s3883_s15   ;;  %s2710_s14 = sphi %s2776_s14, %s3882_s14   ;;  %s2706_s13 = sphi %s2774_s13, %s3881_s13   ;;  %s2702_s12 = sphi %s2772_s12, %s3880_s12  }
   0x7   : > { %s31_s20 = sadd.s32 1, %s2718_s16  ;;  %s38_s21 = sadd.s32 1, %s2710_s14 }
   0x8   : > { %p33_p0 = scmp.ge.s32.totalorder %s31_s20, 2  ;;  %p45_p1 = scmp.ne.s32.totalorder %s2710_s14, %s2706_s13 }
   0x9   : > { %p46_p2 = scmp.eq.s32.totalorder %s2722_s17, 0  ;;  %p51_p3 = scmp.ne.s32.totalorder %s2706_s13, %s2702_s12 }
   0xa   : > { %s3886_s20 = smov (%p33_p0, %s31_s20), 0  ;;  %p52_p5 = scmp.eq.s32.totalorder %s2309_s18, 0 }
   0xb   : > { %p2813_p4 = por %p46_p2, %p45_p1  ;;  %s35_s23 = ssub.s32 %s2718_s16, %s3886_s20 }
   0xc   : > { %p119_p6 = scmp.eq.s32.totalorder %s2309_s18, 1  ;;  %p36_p7 = scmp.eq.s32.totalorder %s35_s23, 0 }
   0xd   : > { %p2819_p8 = por %p52_p5, %p51_p3  ;;  %p125_p10 = scmp.eq.s32.totalorder %s2310_s19, 1 }
   0xe   : > { %p2823_p9 = por %p119_p6, %p45_p1  ;;  %p2312_p12 = scmp.ge.s32.totalorder %s2722_s17, 2 }
   0xf   : > { %s2828_s26 = scalar_select %p36_p7, %s2710_s14, %s38_s21  }
  0x10   : > { %p2830_p11 = por %p125_p10, %p51_p3  ;;  %p2530_p13 = scmp.lt.s32.totalorder %s2722_s17, 2 }
  0x11   : > { %s151_s28 = sand.u32 1, %s2710_s14   ;;  %s2516_s30 = sshll.u32 %s2718_s16, 6 }
  0x12   : > { %s2313_s29 = sshll.u32 %s151_s28, 6  ;;  %s160_s6 = scalar_lea.hbm %s3812_s0, %s2516_s30 }
  0x13   : > { %s155_s7 = scalar_lea.vmem [#allocation4], %s2313_s29  ;;  %s161_s9 = sshll.u32 %s160_s6, 4  ;;  %s162_s9 = int_to_ptr.hbm [resolvable:$true] %s161_s9 }
  0x14   : > { %s163_s8 = sshll.u32 %s155_s7, 4  ;;  %p2523_p0 = pnand %p2530_p13, %p2813_p4  ;;  %s164_s8 = int_to_ptr.vmem [resolvable:$true] %s163_s8 }
  0x15   : > { %p2316_p1 = scmp.ge.s32.totalorder %s2722_s17, 1  ;;  %s152_s10 = scalar_lea.sflag [#allocation5], %s151_s28 }
  0x16   : > { %s2724_s11 = smov 128   ;;  %s2725_s18 = smov 8  }
  0x17   : > { %2525 = dma.hbm_to_vmem [thread:$0]  (!%p2523_p0), %s162_s9, 1024, %s164_s8, %s152_s10, %s2724_s11, %s2724_s11, %s2725_s18  }
  0x18   : > { %p171_p2 = scmp.lt.s32.totalorder %s2722_s17, 3 }
  0x1a   : > { %p172_p3 = pnand %p2316_p1, %p171_p2 }
  0x1b   : > { %s2846_s19 = sand.u32 (!%p172_p3), 1, %s2706_s13  }
  0x1c   : > { %175 = sbr.rel (%p172_p3) target bundleno = 1064 (0x428), region = 32  ;;  %s2317_s21 = sshll.u32 (!%p172_p3), %s2846_s19, 6 }
  0x1d   : > { %s178_s23 = scalar_lea.sflag (!%p172_p3), [#allocation5], %s2846_s19  ;;  %s2850_s29 = scalar_lea.vmem (!%p172_p3), [#allocation4], %s2317_s21 }
  0x21   : > { %2693 = dma.done.wait (%p2819_p8), %s178_s23, 1024  }
  0x22   : > { %2695 = vsyncadd (%p2819_p8), %s178_s23, 4294966272  ;;  %v214_v0 = vld [vmem:[%s2850_s29 + $0x20] sm:$0xff]  ;;  %v212_v1 = vld [vmem:[%s2850_s29 + $0x10] sm:$0xff]  ;;  %s2726_s22 = smov 1   ;;  %vm250_vm0 = vcmask 138248   ;;  %vm279_vm1 = vcmask 131080  }
  0x23   : > { %v210_v2 = vld [vmem:[%s2850_s29] sm:$0xff]  ;;  %234 = vrot.lane.b32.xlu2 %v214_v0, %s2726_s22  ;;  %230 = vrot.lane.b32.xlu1 %v212_v1, %s2726_s22  ;;  %v215_v3 = vld [vmem:[%s2850_s29 + $0x28] sm:$0xff]  ;;  %s2727_s24 = smov 126   ;;  %vm368_vm2 = vcmask 7168   ;;  %s2728_s28 = smov 2   ;;  %vm371_vm3 = vcmask 1024  }
  0x24   : > { %226 = vrot.lane.b32.xlu0 %v210_v2, %s2726_s22  ;;  %v213_v4 = vld [vmem:[%s2850_s29 + $0x18] sm:$0xff]  ;;  %v211_v5 = vld [vmem:[%s2850_s29 + $0x8] sm:$0xff]  ;;  %v259_v6 = vld [vmem:[%s2850_s29 + $0x1] sm:$0x1]  ;;  %vm442_vm4 = vcmask 146568   ;;  %vm445_vm5 = vcmask 140424  }
  0x25   : > { %v217_v7 = vld [vmem:[%s2850_s29 + $0x38] sm:$0xff]  ;;  %v216_v8 = vld [vmem:[%s2850_s29 + $0x30] sm:$0xff]  ;;  %v261_v10 = vld [vmem:[%s2850_s29 + $0x21] sm:$0x1]  ;;  %vm480_vm6 = vcmask 1045509   ;;  %vm467_vm7 = vcmask 1041409  }
  0x26   : > { %v262_v9 = vld [vmem:[%s2850_s29 + $0x31] sm:$0x1]  ;;  %v286_v12 = vld [vmem:[%s2850_s29 + $0x2e] sm:$0x1]  ;;  %v285_v13 = vld [vmem:[%s2850_s29 + $0x1e] sm:$0x1] }
  0x27   : > { %v260_v11 = vld [vmem:[%s2850_s29 + $0x11] sm:$0x1]  ;;  %v284_v14 = vld [vmem:[%s2850_s29 + $0xe] sm:$0x1]  ;;  %v287_v15 = vld [vmem:[%s2850_s29 + $0x3e] sm:$0x1] }
  0x28   : > { %vm483_vm8 = vcmask 1046534   ;;  %vm486_vm9 = vcmask 1047559   ;;  %vm470_vm10 = vcmask 1042434   ;;  %vm473_vm11 = vcmask 1043459   ;;  %s2729_s30 = smov 127   ;;  %s2730_s4 = smov 16  }
  0x29   : > { %vm476_vm12 = vcmask 125952   ;;  %vm491_vm13 = vcmask 130052   ;;  %s2731_s5 = smov 15   ;;  %s2732_s6 = smov 14   ;;  %vm592_vm14 = vcmask 261252   ;;  %vm580_vm15 = vcmask 257152  }
  0x2a   : > { %s2733_s7 = smov 32   ;;  %s2734_s8 = smov 31  }
  0x2b   : > { %236 = vrot.lane.b32.xlu2 %v215_v3, %s2726_s22  ;;  %232 = vrot.lane.b32.xlu1 %v213_v4, %s2726_s22  ;;  %s2735_s9 = smov 30   ;;  %s2736_s10 = smov 48  }
  0x2c   : > { %228 = vrot.lane.b32.xlu0 %v211_v5, %s2726_s22  ;;  %s2737_s11 = smov 47   ;;  %s2738_s18 = smov 46  }
  0x2d   : > { %s3822_s21 = smov 64   ;;  %s3816_s23 = smov 63  }
  0x2e   : > { %s2741_s29 = smov 62  }
  0x33   : > { %267 = vrot.lane.b32.xlu2 %v259_v6, %s2726_s22  ;;  %240 = vrot.lane.b32.xlu1 %v217_v7, %s2726_s22 }
  0x34   : > { %238 = vrot.lane.b32.xlu0 %v216_v8, %s2726_s22 }
  0x3b   : > { %273 = vrot.lane.b32.xlu2 %v262_v9, %s2726_s22  ;;  %271 = vrot.lane.b32.xlu1 %v261_v10, %s2726_s22 }
  0x3c   : > { %269 = vrot.lane.b32.xlu0 %v260_v11, %s2726_s22 }
  0x43   : > { %296 = vrot.lane.b32.xlu2 %v286_v12, %s2726_s22  ;;  %294 = vrot.lane.b32.xlu1 %v285_v13, %s2726_s22 }
  0x44   : > { %292 = vrot.lane.b32.xlu0 %v284_v14, %s2726_s22 }
  0x4c   : > { %298 = vrot.lane.b32.xlu0 %v287_v15, %s2726_s22  ;;  %s3820_s22 = smov 80  }
  0x7d   : > { %v235_v16 = vpop.permute.xlu2 %234 }
  0x7e   : > { %255 = vst.msk [vmem:[#allocation2 + $0x31] sm:$0xff] %vm250_vm0, %v235_v16 }
  0x85   : > { %v237_v17 = vpop.permute.xlu2 %236 }
  0x86   : > { %256 = vst.msk [vmem:[#allocation2 + $0x39] sm:$0xff] %vm250_vm0, %v237_v17 }
  0x8d   : > { %v268_v18 = vpop.permute.xlu2 %267  ;;  %v315_v35 = vld [vmem:[#allocation2 + $0x38] sm:$0xff] }
  0x8e   : > { %280 = vst.msk [vmem:[#allocation2] sm:$0x1] %vm279_vm1, %v268_v18 }
  0x95   : > { %v274_v19 = vpop.permute.xlu2 %273  ;;  %v231_v20 = vpop.permute.xlu1 %230 }
  0x96   : > { %283 = vst.msk [vmem:[#allocation2 + $0x48] sm:$0x1] %vm279_vm1, %v274_v19  ;;  %v227_v21 = vpop.permute.xlu0 %226 }
  0x97   : > { %253 = vst.msk [vmem:[#allocation2 + $0x19] sm:$0xff] %vm250_vm0, %v231_v20 }
  0x98   : > { %251 = vst.msk [vmem:[#allocation2 + $0x1] sm:$0xff] %vm250_vm0, %v227_v21 }
  0x9d   : > { %v297_v22 = vpop.permute.xlu2 %296  ;;  %v233_v23 = vpop.permute.xlu1 %232 }
  0x9e   : > { %306 = vst.msk [vmem:[#allocation2 + $0x41] sm:$0x1] %vm279_vm1, %v297_v22  ;;  %v229_v24 = vpop.permute.xlu0 %228 }
  0x9f   : > { %254 = vst.msk [vmem:[#allocation2 + $0x21] sm:$0xff] %vm250_vm0, %v233_v23  ;;  %v308_v25 = vld [vmem:[#allocation2] sm:$0xff] }
  0xa0   : > { %252 = vst.msk [vmem:[#allocation2 + $0x9] sm:$0xff] %vm250_vm0, %v229_v24  ;;  %332 = vrot.lane.b32.xlu1 %v308_v25, %s2727_s24 }
  0xa5   : > { %v241_v26 = vpop.permute.xlu1 %240  ;;  %v316_v42 = vld [vmem:[#allocation2 + $0x40] sm:$0x3] }
  0xa6   : > { %258 = vst.msk [vmem:[#allocation2 + $0x51] sm:$0xff] %vm250_vm0, %v241_v26  ;;  %v239_v27 = vpop.permute.xlu0 %238  ;;  %v312_v31 = vld [vmem:[#allocation2 + $0x20] sm:$0xff] }
  0xa7   : > { %257 = vst.msk [vmem:[#allocation2 + $0x49] sm:$0xff] %vm250_vm0, %v239_v27  ;;  %v309_v28 = vld [vmem:[#allocation2 + $0x8] sm:$0xff]  ;;  %vm3831_vm0 = vcmask 392452  }
  0xa8   : > { %334 = vrot.lane.b32.xlu2 %v309_v28, %s2727_s24 }
  0xad   : > { %v272_v29 = vpop.permute.xlu1 %271 }
  0xae   : > { %282 = vst.msk [vmem:[#allocation2 + $0x30] sm:$0x1] %vm279_vm1, %v272_v29  ;;  %v270_v30 = vpop.permute.xlu0 %269  ;;  %v318_v39 = vld [vmem:[#allocation2 + $0x50] sm:$0xff]  ;;  %v317_v40 = vld [vmem:[#allocation2 + $0x48] sm:$0xff] }
  0xaf   : > { %281 = vst.msk [vmem:[#allocation2 + $0x18] sm:$0x1] %vm279_vm1, %v270_v30 }
  0xb0   : > { %340 = vrot.lane.b32.xlu2 %v312_v31, %s2727_s24 }
  0xb5   : > { %v295_v32 = vpop.permute.xlu1 %294  ;;  %v314_v37 = vld [vmem:[#allocation2 + $0x30] sm:$0xff] }
  0xb6   : > { %305 = vst.msk [vmem:[#allocation2 + $0x29] sm:$0x1] %vm279_vm1, %v295_v32  ;;  %v293_v33 = vpop.permute.xlu0 %292  ;;  %v311_v34 = vld [vmem:[#allocation2 + $0x18] sm:$0xff] }
  0xb7   : > { %304 = vst.msk [vmem:[#allocation2 + $0x11] sm:$0x1] %vm279_vm1, %v293_v33  ;;  %338 = vrot.lane.b32.xlu1 %v311_v34, %s2727_s24 }
  0xb8   : > { %346 = vrot.lane.b32.xlu2 %v315_v35, %s2727_s24 }
  0xbd   : > { %v313_v41 = vld [vmem:[#allocation2 + $0x28] sm:$0x3] }
  0xbe   : > { %v299_v36 = vpop.permute.xlu0 %298  ;;  %v310_v38 = vld [vmem:[#allocation2 + $0x10] sm:$0x3] }
  0xbf   : > { %307 = vst.msk [vmem:[#allocation2 + $0x59] sm:$0x1] %vm279_vm1, %v299_v36  ;;  %344 = vrot.lane.b32.xlu1 %v314_v37, %s2727_s24  ;;  %336 = vrot.lane.b32.xlu0 %v310_v38, %s2727_s24  ;;  %vm683_vm1 = vcmask 388352  }
  0xc0   : > { %352 = vrot.lane.b32.xlu2 %v318_v39, %s2727_s24 }
  0xc6   : > { %v319_v43 = vld [vmem:[#allocation2 + $0x58] sm:$0x3] }
  0xc7   : > { %350 = vrot.lane.b32.xlu1 %v317_v40, %s2727_s24  ;;  %342 = vrot.lane.b32.xlu0 %v313_v41, %s2727_s24 }
  0xcf   : > { %348 = vrot.lane.b32.xlu0 %v316_v42, %s2727_s24 }
  0xd7   : > { %354 = vrot.lane.b32.xlu0 %v319_v43, %s2727_s24 }
 0x102   : > { %v335_v44 = vpop.permute.xlu2 %334 }
 0x103   : > { %370 = vst.msk [vmem:[#allocation2 + $0x8] sm:$0xff] %vm368_vm2, %v335_v44 }
 0x10a   : > { %v341_v45 = vpop.permute.xlu2 %340  ;;  %v383_v46 = vld [vmem:[#allocation2 + $0x8] sm:$0xff] }
 0x10b   : > { %374 = vst.msk [vmem:[#allocation2 + $0x20] sm:$0xff] %vm368_vm2, %v341_v45  ;;  %408 = vrot.lane.b32.xlu2 %v383_v46, %s2728_s28 }
 0x112   : > { %v333_v47 = vpop.permute.xlu1 %332  ;;  %v347_v48 = vpop.permute.xlu2 %346  ;;  %v386_v49 = vld [vmem:[#allocation2 + $0x20] sm:$0xff] }
 0x113   : > { %369 = vst.msk [vmem:[#allocation2] sm:$0xff] %vm368_vm2, %v333_v47  ;;  %414 = vrot.lane.b32.xlu2 %v386_v49, %s2728_s28 }
 0x114   : > { %377 = vst.msk [vmem:[#allocation2 + $0x38] sm:$0xff] %vm368_vm2, %v347_v48 }
 0x11a   : > { %v353_v50 = vpop.permute.xlu2 %352  ;;  %v382_v51 = vld [vmem:[#allocation2] sm:$0xff] }
 0x11b   : > { %380 = vst.msk [vmem:[#allocation2 + $0x50] sm:$0xff] %vm368_vm2, %v353_v50  ;;  %v389_v52 = vld [vmem:[#allocation2 + $0x38] sm:$0xff]  ;;  %406 = vrot.lane.b32.xlu1 %v382_v51, %s2728_s28 }
 0x11c   : > { %420 = vrot.lane.b32.xlu2 %v389_v52, %s2728_s28 }
 0x122   : > { %v392_v53 = vld [vmem:[#allocation2 + $0x50] sm:$0xff] }
 0x124   : > { %426 = vrot.lane.b32.xlu2 %v392_v53, %s2728_s28 }
 0x129   : > { %v339_v54 = vpop.permute.xlu1 %338 }
 0x12a   : > { %373 = vst.msk [vmem:[#allocation2 + $0x18] sm:$0xff] %vm368_vm2, %v339_v54 }
 0x131   : > { %v345_v55 = vpop.permute.xlu1 %344  ;;  %v337_v56 = vpop.permute.xlu0 %336  ;;  %v385_v57 = vld [vmem:[#allocation2 + $0x18] sm:$0xff] }
 0x132   : > { %376 = vst.msk [vmem:[#allocation2 + $0x30] sm:$0xff] %vm368_vm2, %v345_v55  ;;  %412 = vrot.lane.b32.xlu1 %v385_v57, %s2728_s28 }
 0x133   : > { %372 = vst.msk [vmem:[#allocation2 + $0x10] sm:$0x3] %vm371_vm3, %v337_v56 }
 0x139   : > { %v351_v58 = vpop.permute.xlu1 %350  ;;  %v343_v59 = vpop.permute.xlu0 %342  ;;  %v388_v60 = vld [vmem:[#allocation2 + $0x30] sm:$0xff] }
 0x13a   : > { %379 = vst.msk [vmem:[#allocation2 + $0x48] sm:$0xff] %vm368_vm2, %v351_v58  ;;  %418 = vrot.lane.b32.xlu1 %v388_v60, %s2728_s28  ;;  %v384_v61 = vld [vmem:[#allocation2 + $0x10] sm:$0x3]  ;;  %vm3830_vm2 = vcmask 523652  }
 0x13b   : > { %375 = vst.msk [vmem:[#allocation2 + $0x28] sm:$0x3] %vm371_vm3, %v343_v59  ;;  %410 = vrot.lane.b32.xlu0 %v384_v61, %s2728_s28 }
 0x141   : > { %v349_v62 = vpop.permute.xlu0 %348  ;;  %v391_v63 = vld [vmem:[#allocation2 + $0x48] sm:$0xff] }
 0x142   : > { %378 = vst.msk [vmem:[#allocation2 + $0x40] sm:$0x3] %vm371_vm3, %v349_v62  ;;  %424 = vrot.lane.b32.xlu1 %v391_v63, %s2728_s28  ;;  %v387_v0 = vld [vmem:[#allocation2 + $0x28] sm:$0x3] }
 0x143   : > { %416 = vrot.lane.b32.xlu0 %v387_v0, %s2728_s28 }
 0x149   : > { %v355_v1 = vpop.permute.xlu0 %354  ;;  %v390_v2 = vld [vmem:[#allocation2 + $0x40] sm:$0x3] }
 0x14a   : > { %381 = vst.msk [vmem:[#allocation2 + $0x58] sm:$0x3] %vm371_vm3, %v355_v1  ;;  %vm786_vm3 = vcmask 519552  }
 0x14b   : > { %422 = vrot.lane.b32.xlu0 %v390_v2, %s2728_s28 }
 0x151   : > { %v393_v3 = vld [vmem:[#allocation2 + $0x58] sm:$0x3] }
 0x153   : > { %428 = vrot.lane.b32.xlu0 %v393_v3, %s2728_s28  ;;  %s3818_s28 = smov 79  }
 0x165   : > { %v409_v4 = vpop.permute.xlu2 %408 }
 0x166   : > { %444 = vst.msk [vmem:[#allocation2 + $0x8] sm:$0xff] %vm442_vm4, %v409_v4 }
 0x16d   : > { %v415_v5 = vpop.permute.xlu2 %414 }
 0x16e   : > { %448 = vst.msk [vmem:[#allocation2 + $0x20] sm:$0xff] %vm442_vm4, %v415_v5 }
 0x176   : > { %v421_v6 = vpop.permute.xlu2 %420 }
 0x177   : > { %451 = vst.msk [vmem:[#allocation2 + $0x38] sm:$0xff] %vm442_vm4, %v421_v6 }
 0x17e   : > { %v427_v7 = vpop.permute.xlu2 %426 }
 0x17f   : > { %454 = vst.msk [vmem:[#allocation2 + $0x50] sm:$0xff] %vm442_vm4, %v427_v7 }
 0x18d   : > { %v407_v8 = vpop.permute.xlu1 %406 }
 0x18e   : > { %443 = vst.msk [vmem:[#allocation2] sm:$0xff] %vm442_vm4, %v407_v8 }
 0x195   : > { %v458_v14 = vld [vmem:[#allocation2] sm:$0x1]  ;;  %v2319_v20 = vld [vmem:[#allocation2 + $0x1] sm:$0x1]  ;;  %v2323_v37 = vld [vmem:[#allocation2 + $0x2] sm:$0x1] }
 0x196   : > { %v478_v29 = vrot.slane %v458_v14, 4  ;;  %v507_v30 = vrot.slane %v2319_v20, 4  ;;  %v548_v61 = vrot.slane %v2323_v37, 4  ;;  %v2327_v5 = vld [vmem:[#allocation2 + $0x1] sm:$0x1] }
 0x1a4   : > { %v413_v9 = vpop.permute.xlu1 %412 }
 0x1a5   : > { %447 = vst.msk [vmem:[#allocation2 + $0x18] sm:$0xff] %vm442_vm4, %v413_v9 }
 0x1ac   : > { %v419_v10 = vpop.permute.xlu1 %418  ;;  %v459_v12 = vld [vmem:[#allocation2 + $0x18] sm:$0x1]  ;;  %v2320_v15 = vld [vmem:[#allocation2 + $0x19] sm:$0x1]  ;;  %v2933_v18 = vld [vmem:[#allocation2 + $0x1a] sm:$0x1] }
 0x1ad   : > { %450 = vst.msk [vmem:[#allocation2 + $0x30] sm:$0xff] %vm442_vm4, %v419_v10  ;;  %v411_v11 = vpop.permute.xlu0 %410  ;;  %v479_v19 = vrot.slane %v459_v12, 3  ;;  %v466_v21 = vrot.slane %v459_v12, 7  ;;  %v516_v23 = vrot.slane %v2320_v15, 7  ;;  %v508_v27 = vrot.slane %v2320_v15, 3 }
 0x1ae   : > { %446 = vst.msk [vmem:[#allocation2 + $0x10] sm:$0x3] %vm445_vm5, %v411_v11  ;;  %v540_v28 = vrot.slane %v2933_v18, 7  ;;  %v549_v59 = vrot.slane %v2933_v18, 3  ;;  %v2328_v2 = vld [vmem:[#allocation2 + $0x19] sm:$0x1] }
 0x1af   : > { %v481_v34 = vsel %vm480_vm6, %v479_v19, %v478_v29  ;;  %v468_v35 = vsel %vm467_vm7, %v466_v21, %v458_v14  ;;  %v517_v36 = vsel %vm467_vm7, %v516_v23, %v2319_v20  ;;  %v509_v42 = vsel %vm480_vm6, %v508_v27, %v507_v30  ;;  %v2332_v18 = vld [vmem:[#allocation2 + $0x1a] sm:$0x1] }
 0x1b0   : > { %v541_v44 = vsel %vm467_vm7, %v540_v28, %v2323_v37  ;;  %v550_v0 = vsel %vm480_vm6, %v549_v59, %v548_v61  ;;  %v571_v7 = vrot.slane %v2328_v2, 7  ;;  %v583_v8 = vrot.slane %v2328_v2, 3 }
 0x1b1   : > { %v582_v12 = vrot.slane %v2327_v5, 4 }
 0x1b2   : > { %v572_v14 = vsel %vm467_vm7, %v571_v7, %v2327_v5  ;;  %v2344_v5 = vld [vmem:[#allocation2 + $0x1b] sm:$0x1] }
 0x1b3   : > { %v584_v15 = vsel %vm480_vm6, %v583_v8, %v582_v12  ;;  %v720_v12 = vrot.slane %v2344_v5, 7 }
 0x1b4   : > { %v425_v13 = vpop.permute.xlu1 %424  ;;  %v460_v17 = vld [vmem:[#allocation2 + $0x30] sm:$0x1]  ;;  %v2321_v22 = vld [vmem:[#allocation2 + $0x31] sm:$0x1]  ;;  %v2325_v24 = vld [vmem:[#allocation2 + $0x32] sm:$0x1] }
 0x1b5   : > { %453 = vst.msk [vmem:[#allocation2 + $0x48] sm:$0xff] %vm442_vm4, %v425_v13  ;;  %v417_v16 = vpop.permute.xlu0 %416  ;;  %v482_v25 = vrot.slane %v460_v17, 2  ;;  %v469_v26 = vrot.slane %v460_v17, 6  ;;  %v518_v31 = vrot.slane %v2321_v22, 6  ;;  %v510_v32 = vrot.slane %v2321_v22, 2 }
 0x1b6   : > { %449 = vst.msk [vmem:[#allocation2 + $0x28] sm:$0x3] %vm445_vm5, %v417_v16  ;;  %v542_v33 = vrot.slane %v2325_v24, 6  ;;  %v551_v60 = vrot.slane %v2325_v24, 2  ;;  %v2329_v4 = vld [vmem:[#allocation2 + $0x31] sm:$0x1] }
 0x1b7   : > { %v484_v39 = vsel %vm483_vm8, %v482_v25, %v481_v34  ;;  %v471_v40 = vsel %vm470_vm10, %v469_v26, %v468_v35  ;;  %v519_v50 = vsel %vm470_vm10, %v518_v31, %v517_v36  ;;  %v511_v51 = vsel %vm483_vm8, %v510_v32, %v509_v42  ;;  %v2333_v21 = vld [vmem:[#allocation2 + $0x32] sm:$0x1]  ;;  %v2331_v22 = vld [vmem:[#allocation2 + $0x2] sm:$0x1]  ;;  %v2336_v35 = vld [vmem:[#allocation2 + $0x1b] sm:$0x1] }
 0x1b8   : > { %v543_v52 = vsel %vm470_vm10, %v542_v33, %v541_v44  ;;  %v552_v1 = vsel %vm483_vm8, %v551_v60, %v550_v0  ;;  %v573_v9 = vrot.slane %v2329_v4, 6  ;;  %v585_v10 = vrot.slane %v2329_v4, 2  ;;  %v2345_v8 = vld [vmem:[#allocation2 + $0x33] sm:$0x1] }
 0x1b9   : > { %v607_v24 = vrot.slane %v2332_v18, 3  ;;  %v617_v25 = vrot.slane %v2332_v18, 7  ;;  %v609_v26 = vrot.slane %v2333_v21, 2  ;;  %v619_v27 = vrot.slane %v2333_v21, 6 }
 0x1ba   : > { %v574_v16 = vsel %vm470_vm10, %v573_v9, %v572_v14  ;;  %v586_v17 = vsel %vm483_vm8, %v585_v10, %v584_v15  ;;  %v606_v28 = vrot.slane %v2331_v22, 4  ;;  %v652_v42 = vrot.slane %v2336_v35, 3  ;;  %v2343_v9 = vld [vmem:[#allocation2 + $0x3] sm:$0x1]  ;;  %v2348_v15 = vld [vmem:[#allocation2 + $0x1c] sm:$0x1] }
 0x1bb   : > { %v618_v32 = vsel %vm467_vm7, %v617_v25, %v2331_v22  ;;  %v722_v14 = vrot.slane %v2345_v8, 6  ;;  %v721_v22 = vsel %vm467_vm7, %v720_v12, %v2343_v9  ;;  %vm3832_vm4 = vcmask 654852  }
 0x1bc   : > { %v461_v38 = vld [vmem:[#allocation2 + $0x48] sm:$0x1]  ;;  %v2322_v41 = vld [vmem:[#allocation2 + $0x49] sm:$0x1]  ;;  %v2326_v43 = vld [vmem:[#allocation2 + $0x4a] sm:$0x1]  ;;  %v608_v31 = vsel %vm480_vm6, %v607_v24, %v606_v28  ;;  %v620_v34 = vsel %vm470_vm10, %v619_v27, %v618_v32 }
 0x1bd   : > { %v423_v45 = vpop.permute.xlu0 %422  ;;  %v485_v46 = vrot.slane %v461_v38, 1  ;;  %v472_v47 = vrot.slane %v461_v38, 5  ;;  %v520_v48 = vrot.slane %v2322_v41, 5  ;;  %v512_v49 = vrot.slane %v2322_v41, 1  ;;  %v2330_v6 = vld [vmem:[#allocation2 + $0x49] sm:$0x1] }
 0x1be   : > { %452 = vst.msk [vmem:[#allocation2 + $0x40] sm:$0x3] %vm445_vm5, %v423_v45  ;;  %v544_v53 = vrot.slane %v2326_v43, 5  ;;  %v553_v62 = vrot.slane %v2326_v43, 1  ;;  %v575_v11 = vrot.slane %v2330_v6, 5  ;;  %v587_v13 = vrot.slane %v2330_v6, 1 }
 0x1bf   : > { %v487_v54 = vsel %vm486_vm9, %v485_v46, %v484_v39  ;;  %v474_v55 = vsel %vm473_vm11, %v472_v47, %v471_v40  ;;  %v521_v56 = vsel %vm473_vm11, %v520_v48, %v519_v50  ;;  %v513_v57 = vsel %vm486_vm9, %v512_v49, %v511_v51  ;;  %v2334_v23 = vld [vmem:[#allocation2 + $0x4a] sm:$0x1]  ;;  %v2337_v38 = vld [vmem:[#allocation2 + $0x33] sm:$0x1]  ;;  %v2335_v39 = vld [vmem:[#allocation2 + $0x3] sm:$0x1] }
 0x1c0   : > { %488 = vrot.lane.b32.xlu1 %v487_v54, %s2729_s30  ;;  %493 = vrot.lane.b32.xlu2 %v474_v55, %s2727_s24  ;;  %477 = vst.msk [vmem:[#allocation3] sm:$0xf] %vm476_vm12, %v474_v55  ;;  %v545_v58 = vsel %vm473_vm11, %v544_v53, %v543_v52  ;;  %v554_v3 = vsel %vm486_vm9, %v553_v62, %v552_v1  ;;  %v611_v29 = vrot.slane %v2334_v23, 1  ;;  %v621_v30 = vrot.slane %v2334_v23, 5  ;;  %v2338_v40 = vld [vmem:[#allocation2 + $0x4b] sm:$0x1] }
 0x1c1   : > { %522 = vrot.lane.b32.xlu0 %v521_v56, %s2729_s30  ;;  %515 = vst.msk [vmem:[#allocation3 + $0x10] sm:$0xf0] %vm491_vm13, %v513_v57  ;;  %v576_v19 = vsel %vm473_vm11, %v575_v11, %v574_v16  ;;  %v588_v20 = vsel %vm486_vm9, %v587_v13, %v586_v17  ;;  %v610_v33 = vsel %vm483_vm8, %v609_v26, %v608_v31  ;;  %v641_v41 = vrot.slane %v2336_v35, 7  ;;  %v2340_v52 = vld [vmem:[#allocation2 + $0x1a] sm:$0x1] }
 0x1c2   : > { %547 = vst.msk [vmem:[#allocation3 + $0x30] sm:$0xf] %vm476_vm12, %v545_v58  ;;  %v612_v36 = vsel %vm486_vm9, %v611_v29, %v610_v33  ;;  %v622_v37 = vsel %vm473_vm11, %v621_v30, %v620_v34  ;;  %v643_v43 = vrot.slane %v2337_v38, 6  ;;  %v654_v44 = vrot.slane %v2337_v38, 2  ;;  %v2341_v55 = vld [vmem:[#allocation2 + $0x32] sm:$0x1] }
 0x1c3   : > { %v645_v45 = vrot.slane %v2338_v40, 5  ;;  %v651_v46 = vrot.slane %v2335_v39, 4  ;;  %v656_v47 = vrot.slane %v2338_v40, 1  ;;  %v642_v48 = vsel %vm467_vm7, %v641_v41, %v2335_v39  ;;  %v2339_v56 = vld [vmem:[#allocation2 + $0x2] sm:$0x1] }
 0x1c4   : > { %v644_v50 = vsel %vm470_vm10, %v643_v43, %v642_v48  ;;  %v686_v59 = vrot.slane %v2340_v52, 3  ;;  %v676_v60 = vrot.slane %v2341_v55, 6  ;;  %v688_v61 = vrot.slane %v2341_v55, 2  ;;  %v2346_v10 = vld [vmem:[#allocation2 + $0x4b] sm:$0x1] }
 0x1c5   : > { %v429_v63 = vpop.permute.xlu0 %428  ;;  %v653_v49 = vsel %vm480_vm6, %v652_v42, %v651_v46  ;;  %v646_v53 = vsel %vm473_vm11, %v645_v45, %v644_v50  ;;  %v710_v11 = vrot.slane %v2344_v5, 3  ;;  %v712_v13 = vrot.slane %v2345_v8, 2  ;;  %v2350_v23 = vld [vmem:[#allocation2 + $0x4c] sm:$0x1]  ;;  %v3007_v29 = vld [vmem:[#allocation2 + $0x1b] sm:$0x1] }
 0x1c6   : > { %455 = vst.msk [vmem:[#allocation2 + $0x58] sm:$0x3] %vm445_vm5, %v429_v63  ;;  %v655_v51 = vsel %vm483_vm8, %v654_v44, %v653_v49  ;;  %v685_v63 = vrot.slane %v2339_v56, 4  ;;  %v709_v16 = vrot.slane %v2343_v9, 4  ;;  %v714_v17 = vrot.slane %v2346_v10, 1 }
 0x1c7   : > { %v657_v54 = vsel %vm486_vm9, %v656_v47, %v655_v51  ;;  %v724_v18 = vrot.slane %v2346_v10, 5  ;;  %v744_v24 = vrot.slane %v2348_v15, 7  ;;  %v723_v26 = vsel %vm470_vm10, %v722_v14, %v721_v22  ;;  %v3011_v33 = vld [vmem:[#allocation2 + $0x3] sm:$0x1]  ;;  %v2411_v41 = vld [vmem:[#allocation2 + $0x8] sm:$0x1] }
 0x1c8   : > { %526 = vrot.lane.b32.xlu1 %v513_v57, %s2727_s24  ;;  %555 = vrot.lane.b32.xlu2 %v554_v3, %s2729_s30  ;;  %v2342_v57 = vld [vmem:[#allocation2 + $0x4a] sm:$0x1]  ;;  %v687_v2 = vsel %vm480_vm6, %v686_v59, %v685_v63  ;;  %v711_v21 = vsel %vm480_vm6, %v710_v11, %v709_v16  ;;  %v755_v28 = vrot.slane %v2348_v15, 3  ;;  %v748_v34 = vrot.slane %v2350_v23, 5  ;;  %v2412_v42 = vld [vmem:[#allocation2 + $0x20] sm:$0x1] }
 0x1c9   : > { %559 = vrot.lane.b32.xlu0 %v545_v58, %s2727_s24  ;;  %v674_v58 = vrot.slane %v2340_v52, 7  ;;  %v678_v62 = vrot.slane %v2342_v57, 5  ;;  %v690_v0 = vrot.slane %v2342_v57, 1  ;;  %v689_v4 = vsel %vm483_vm8, %v688_v61, %v687_v2  ;;  %v2413_v46 = vld [vmem:[#allocation2 + $0x38] sm:$0x1] }
 0x1ca   : > { %v713_v25 = vsel %vm483_vm8, %v712_v13, %v711_v21  ;;  %v725_v31 = vsel %vm473_vm11, %v724_v18, %v723_v26  ;;  %v759_v39 = vrot.slane %v2350_v23, 1  ;;  %v777_v40 = vrot.slane %v3007_v29, 7  ;;  %v2414_v47 = vld [vmem:[#allocation2 + $0x50] sm:$0x1]  ;;  %v2416_v57 = vld [vmem:[#allocation2 + $0x21] sm:$0x1] }
 0x1cb   : > { %v675_v1 = vsel %vm467_vm7, %v674_v58, %v2339_v56  ;;  %v691_v7 = vsel %vm486_vm9, %v690_v0, %v689_v4  ;;  %v715_v30 = vsel %vm486_vm9, %v714_v17, %v713_v25  ;;  %v788_v45 = vrot.slane %v3011_v33, 4  ;;  %v2415_v56 = vld [vmem:[#allocation2 + $0x9] sm:$0x1]  ;;  %v2418_v63 = vld [vmem:[#allocation2 + $0x51] sm:$0x1] }
 0x1cc   : > { %v677_v3 = vsel %vm470_vm10, %v676_v60, %v675_v1  ;;  %v789_v50 = vrot.slane %v3007_v29, 3  ;;  %v1301_v55 = vrot.slane %v2412_v42, 3  ;;  %v778_v59 = vsel %vm467_vm7, %v777_v40, %v3011_v33  ;;  %v2419_v8 = vld [vmem:[#allocation2 + $0xa] sm:$0x1]  ;;  %v2420_v13 = vld [vmem:[#allocation2 + $0x22] sm:$0x1] }
 0x1cd   : > { %v679_v6 = vsel %vm473_vm11, %v678_v62, %v677_v3  ;;  %v1303_v60 = vrot.slane %v2413_v46, 2  ;;  %v1305_v61 = vrot.slane %v2414_v47, 1  ;;  %v2417_v62 = vld [vmem:[#allocation2 + $0x39] sm:$0x1]  ;;  %v1292_v2 = vrot.slane %v2412_v42, 7 }
 0x1ce   : > { %v1294_v3 = vrot.slane %v2413_v46, 6  ;;  %v1296_v5 = vrot.slane %v2414_v47, 5  ;;  %v1334_v11 = vrot.slane %v2417_v62, 6  ;;  %v1336_v12 = vrot.slane %v2418_v63, 5  ;;  %v2421_v14 = vld [vmem:[#allocation2 + $0x3a] sm:$0x1] }
 0x1cf   : > { %v1293_v10 = vsel %vm467_vm7, %v1292_v2, %v2411_v41  ;;  %v1324_v17 = vrot.slane %v2416_v57, 3  ;;  %v1326_v18 = vrot.slane %v2417_v62, 2  ;;  %v1328_v22 = vrot.slane %v2418_v63, 1  ;;  %v2355_v46 = vld [vmem:[#allocation2 + $0x4] sm:$0x1] }
 0x1d0   : > { %577 = vrot.lane.b32.xlu1 %v576_v19, %s2730_s4  ;;  %589 = vrot.lane.b32.xlu2 %v588_v20, %s2731_s5  ;;  %v2347_v20 = vld [vmem:[#allocation2 + $0x4] sm:$0x1]  ;;  %v1295_v15 = vsel %vm470_vm10, %v1294_v3, %v1293_v10  ;;  %v1364_v23 = vrot.slane %v2419_v8, 4  ;;  %v1365_v26 = vrot.slane %v2420_v13, 3  ;;  %v2358_v47 = vld [vmem:[#allocation2 + $0x4c] sm:$0x1] }
 0x1d1   : > { %594 = vrot.lane.b32.xlu0 %v576_v19, %s2732_s6  ;;  %v2349_v19 = vld [vmem:[#allocation2 + $0x34] sm:$0x1]  ;;  %v754_v32 = vrot.slane %v2347_v20, 4  ;;  %v745_v38 = vsel %vm467_vm7, %v744_v24, %v2347_v20  ;;  %v3047_v20 = vsel %vm473_vm11, %v1296_v5, %v1295_v15  ;;  %v2361_v63 = vld [vmem:[#allocation2 + $0x35] sm:$0x1]  ;;  %vm3833_vm5 = vcmask 650752  }
 0x1d2   : > { %v746_v27 = vrot.slane %v2349_v19, 6  ;;  %v757_v35 = vrot.slane %v2349_v19, 2  ;;  %v2422_v19 = vld [vmem:[#allocation2 + $0x52] sm:$0x1]  ;;  %1299 = vst.msk [vmem:[#allocation3 + $0x8] sm:$0xf] %vm476_vm12, %v3047_v20 }
 0x1d3   : > { %v756_v44 = vsel %vm480_vm6, %v755_v28, %v754_v32  ;;  %v1369_v29 = vrot.slane %v2422_v19, 1  ;;  %v790_v32 = vsel %vm480_vm6, %v789_v50, %v788_v45  ;;  %v860_v5 = vrot.slane %v2361_v63, 2 }
 0x1d4   : > { %v747_v43 = vsel %vm470_vm10, %v746_v27, %v745_v38  ;;  %v1367_v27 = vrot.slane %v2421_v14, 2  ;;  %v2356_v38 = vld [vmem:[#allocation2 + $0x1c] sm:$0x1] }
 0x1d5   : > { %v749_v52 = vsel %vm473_vm11, %v748_v34, %v747_v43  ;;  %v1366_v34 = vsel %vm480_vm6, %v1365_v26, %v1364_v23  ;;  %v2357_v43 = vld [vmem:[#allocation2 + $0x34] sm:$0x1]  ;;  %v823_v50 = vrot.slane %v2356_v38, 7 }
 0x1d8   : > { %613 = vrot.lane.b32.xlu1 %v612_v36, %s2730_s4  ;;  %623 = vrot.lane.b32.xlu2 %v622_v37, %s2731_s5  ;;  %v3017_v37 = vld [vmem:[#allocation2 + $0x4b] sm:$0x1] }
 0x1d9   : > { %627 = vrot.lane.b32.xlu0 %v612_v36, %s2732_s6  ;;  %v3015_v36 = vld [vmem:[#allocation2 + $0x33] sm:$0x1]  ;;  %v781_v49 = vrot.slane %v3017_v37, 5  ;;  %v793_v0 = vrot.slane %v3017_v37, 1 }
 0x1da   : > { %v779_v48 = vrot.slane %v3015_v36, 6  ;;  %v791_v51 = vrot.slane %v3015_v36, 2 }
 0x1dc   : > { %v780_v36 = vsel %vm470_vm10, %v779_v48, %v778_v59  ;;  %v792_v37 = vsel %vm483_vm8, %v791_v51, %v790_v32  ;;  %v815_v51 = vrot.slane %v2357_v43, 2 }
 0x1dd   : > { %v794_v42 = vsel %vm486_vm9, %v793_v0, %v792_v37  ;;  %v2359_v0 = vld [vmem:[#allocation2 + $0x5] sm:$0x1]  ;;  %v2369_v37 = vld [vmem:[#allocation2 + $0x35] sm:$0x1] }
 0x1e0   : > { %647 = vrot.lane.b32.xlu1 %v646_v53, %s2730_s4  ;;  %658 = vrot.lane.b32.xlu2 %v657_v54, %s2731_s5  ;;  %v1300_v54 = vrot.slane %v2411_v41, 4  ;;  %v782_v41 = vsel %vm473_vm11, %v781_v49, %v780_v36  ;;  %v813_v49 = vrot.slane %v2356_v38, 3  ;;  %v2367_v38 = vld [vmem:[#allocation2 + $0x5] sm:$0x1] }
 0x1e1   : > { %662 = vrot.lane.b32.xlu0 %v646_v53, %s2732_s6  ;;  %v758_v53 = vsel %vm483_vm8, %v757_v35, %v756_v44  ;;  %v1360_v35 = vrot.slane %v2422_v19, 5  ;;  %v2366_v19 = vld [vmem:[#allocation2 + $0x4c] sm:$0x1] }
 0x1e2   : > { %v760_v58 = vsel %vm486_vm9, %v759_v39, %v758_v53  ;;  %v1302_v1 = vsel %vm480_vm6, %v1301_v55, %v1300_v54  ;;  %v1368_v39 = vsel %vm483_vm8, %v1367_v27, %v1366_v34  ;;  %v812_v53 = vrot.slane %v2355_v46, 4  ;;  %v2368_v34 = vld [vmem:[#allocation2 + $0x1d] sm:$0x1] }
 0x1e3   : > { %v1304_v4 = vsel %vm483_vm8, %v1303_v60, %v1302_v1  ;;  %v3071_v44 = vsel %vm486_vm9, %v1369_v29, %v1368_v39  ;;  %v817_v54 = vrot.slane %v2358_v47, 1  ;;  %v827_v55 = vrot.slane %v2358_v47, 5  ;;  %v2360_v60 = vld [vmem:[#allocation2 + $0x1d] sm:$0x1]  ;;  %v2362_v1 = vld [vmem:[#allocation2 + $0x4d] sm:$0x1] }
 0x1e4   : > { %v3040_v9 = vsel %vm486_vm9, %v1305_v61, %v1304_v4  ;;  %v847_v2 = vrot.slane %v2360_v60, 7  ;;  %v858_v3 = vrot.slane %v2360_v60, 3  ;;  %v849_v4 = vrot.slane %v2361_v63, 6  ;;  %v2370_v39 = vld [vmem:[#allocation2 + $0x4d] sm:$0x1] }
 0x1e5   : > { %v884_v26 = vrot.slane %v2366_v19, 5  ;;  %v920_v47 = vrot.slane %v2370_v39, 1 }
 0x1e6   : > { %v848_v10 = vsel %vm467_vm7, %v847_v2, %v2359_v0 }
 0x1e8   : > { %680 = vrot.lane.b32.xlu1 %v679_v6, %s2733_s7  ;;  %692 = vrot.lane.b32.xlu2 %v691_v7, %s2734_s8  ;;  %v1332_v7 = vrot.slane %v2416_v57, 7  ;;  %v824_v57 = vsel %vm467_vm7, %v823_v50, %v2355_v46  ;;  %v915_v46 = vrot.slane %v2367_v38, 4 }
 0x1e9   : > { %697 = vrot.lane.b32.xlu0 %v679_v6, %s2735_s9  ;;  %v1323_v6 = vrot.slane %v2415_v56, 4 }
 0x1ea   : > { %v1333_v16 = vsel %vm467_vm7, %v1332_v7, %v2415_v56  ;;  %v814_v56 = vsel %vm480_vm6, %v813_v49, %v812_v53  ;;  %v857_v7 = vrot.slane %v2359_v0, 4  ;;  %v930_v49 = vrot.slane %v2370_v39, 5 }
 0x1eb   : > { %v1335_v21 = vsel %vm470_vm10, %v1334_v11, %v1333_v16  ;;  %v1325_v25 = vsel %vm480_vm6, %v1324_v17, %v1323_v6  ;;  %v851_v6 = vrot.slane %v2362_v1, 5  ;;  %v2365_v17 = vld [vmem:[#allocation2 + $0x34] sm:$0x1] }
 0x1ec   : > { %v3053_v24 = vsel %vm473_vm11, %v1336_v12, %v1335_v21  ;;  %v1327_v28 = vsel %vm483_vm8, %v1326_v18, %v1325_v25  ;;  %v859_v11 = vsel %vm480_vm6, %v858_v3, %v857_v7  ;;  %v850_v12 = vsel %vm470_vm10, %v849_v4, %v848_v10  ;;  %v2363_v18 = vld [vmem:[#allocation2 + $0x4] sm:$0x1] }
 0x1ed   : > { %v3059_v33 = vsel %vm486_vm9, %v1328_v22, %v1327_v28  ;;  %v852_v15 = vsel %vm473_vm11, %v851_v6, %v850_v12  ;;  %v882_v23 = vrot.slane %v2365_v17, 6  ;;  %v894_v25 = vrot.slane %v2365_v17, 2  ;;  %v2377_v12 = vld [vmem:[#allocation2 + $0x35] sm:$0x1] }
 0x1ee   : > { %1331 = vst.msk [vmem:[#allocation3 + $0x18] sm:$0xf0] %vm491_vm13, %v3059_v33  ;;  %v891_v27 = vrot.slane %v2363_v18, 4  ;;  %v896_v28 = vrot.slane %v2366_v19, 1  ;;  %v997_v19 = vrot.slane %v2377_v12, 2 }
 0x1f0   : > { %716 = vrot.lane.b32.xlu1 %v715_v30, %s2733_s7  ;;  %726 = vrot.lane.b32.xlu2 %v725_v31, %s2734_s8  ;;  %v1358_v31 = vrot.slane %v2421_v14, 6  ;;  %v2364_v14 = vld [vmem:[#allocation2 + $0x1c] sm:$0x1] }
 0x1f1   : > { %730 = vrot.lane.b32.xlu0 %v715_v30, %s2735_s9  ;;  %v1356_v30 = vrot.slane %v2420_v13, 7  ;;  %v861_v13 = vsel %vm483_vm8, %v860_v5, %v859_v11  ;;  %v880_v21 = vrot.slane %v2364_v14, 7  ;;  %v892_v22 = vrot.slane %v2364_v14, 3  ;;  %v2378_v14 = vld [vmem:[#allocation2 + $0x4d] sm:$0x1] }
 0x1f3   : > { %v1357_v40 = vsel %vm467_vm7, %v1356_v30, %v2419_v8  ;;  %v862_v8 = vrot.slane %v2362_v1, 1  ;;  %v881_v29 = vsel %vm467_vm7, %v880_v21, %v2363_v18  ;;  %v893_v30 = vsel %vm480_vm6, %v892_v22, %v891_v27 }
 0x1f4   : > { %v1359_v45 = vsel %vm470_vm10, %v1358_v31, %v1357_v40  ;;  %v883_v31 = vsel %vm470_vm10, %v882_v23, %v881_v29  ;;  %v895_v32 = vsel %vm483_vm8, %v894_v25, %v893_v30  ;;  %v916_v40 = vrot.slane %v2368_v34, 3  ;;  %v2380_v29 = vld [vmem:[#allocation2 + $0x1e] sm:$0x1] }
 0x1f5   : > { %v3077_v48 = vsel %vm473_vm11, %v1360_v35, %v1359_v45  ;;  %v863_v16 = vsel %vm486_vm9, %v862_v8, %v861_v13  ;;  %v885_v35 = vsel %vm473_vm11, %v884_v26, %v883_v31  ;;  %v897_v36 = vsel %vm486_vm9, %v896_v28, %v895_v32  ;;  %v2376_v8 = vld [vmem:[#allocation2 + $0x1d] sm:$0x1]  ;;  %v2375_v13 = vld [vmem:[#allocation2 + $0x5] sm:$0x1]  ;;  %v2381_v32 = vld [vmem:[#allocation2 + $0x36] sm:$0x1] }
 0x1f6   : > { %1363 = vst.msk [vmem:[#allocation3 + $0x38] sm:$0xf] %vm476_vm12, %v3077_v48  ;;  %v928_v45 = vrot.slane %v2369_v37, 6  ;;  %v917_v50 = vsel %vm480_vm6, %v916_v40, %v915_v46  ;;  %v985_v18 = vrot.slane %v2377_v12, 6  ;;  %v987_v21 = vrot.slane %v2378_v14, 5 }
 0x1f7   : > { %v994_v22 = vrot.slane %v2375_v13, 4  ;;  %v999_v23 = vrot.slane %v2378_v14, 1  ;;  %v1021_v40 = vrot.slane %v2381_v32, 2  ;;  %v2389_v12 = vld [vmem:[#allocation2 + $0x36] sm:$0x1] }
 0x1f8   : > { %750 = vrot.lane.b32.xlu1 %v749_v52, %s2733_s7  ;;  %761 = vrot.lane.b32.xlu2 %v760_v58, %s2734_s8  ;;  %v816_v58 = vsel %vm483_vm8, %v815_v51, %v814_v56  ;;  %v2390_v14 = vld [vmem:[#allocation2 + $0x4e] sm:$0x1] }
 0x1f9   : > { %765 = vrot.lane.b32.xlu0 %v749_v52, %s2735_s9  ;;  %v825_v52 = vrot.slane %v2357_v43, 6  ;;  %v818_v61 = vsel %vm486_vm9, %v817_v54, %v816_v58  ;;  %v918_v43 = vrot.slane %v2369_v37, 2  ;;  %v2372_v54 = vld [vmem:[#allocation2 + $0x1e] sm:$0x1]  ;;  %v2371_v58 = vld [vmem:[#allocation2 + $0x6] sm:$0x1] }
 0x1fa   : > { %v950_v60 = vrot.slane %v2372_v54, 7  ;;  %v960_v2 = vrot.slane %v2371_v58, 4  ;;  %v1029_v37 = vrot.slane %v2380_v29, 7 }
 0x1fb   : > { %v826_v59 = vsel %vm470_vm10, %v825_v52, %v824_v57  ;;  %v919_v52 = vsel %vm483_vm8, %v918_v43, %v917_v50  ;;  %v2373_v57 = vld [vmem:[#allocation2 + $0x36] sm:$0x1] }
 0x1fc   : > { %v828_v62 = vsel %vm473_vm11, %v827_v55, %v826_v59  ;;  %v921_v55 = vsel %vm486_vm9, %v920_v47, %v919_v52  ;;  %v2374_v59 = vld [vmem:[#allocation2 + $0x4e] sm:$0x1]  ;;  %v952_v63 = vrot.slane %v2373_v57, 6  ;;  %v963_v0 = vrot.slane %v2373_v57, 2  ;;  %v2384_v52 = vld [vmem:[#allocation2 + $0x1f] sm:$0x1] }
 0x1fd   : > { %v954_v1 = vrot.slane %v2374_v59, 5  ;;  %v965_v3 = vrot.slane %v2374_v59, 1  ;;  %v951_v4 = vsel %vm467_vm7, %v950_v60, %v2371_v58  ;;  %v2386_v57 = vld [vmem:[#allocation2 + $0x4f] sm:$0x1]  ;;  %v1053_v58 = vrot.slane %v2384_v52, 7 }
 0x1fe   : > { %v953_v6 = vsel %vm470_vm10, %v952_v63, %v951_v4  ;;  %v1064_v59 = vrot.slane %v2384_v52, 3 }
 0x1ff   : > { %v955_v10 = vsel %vm473_vm11, %v954_v1, %v953_v6  ;;  %v1057_v1 = vrot.slane %v2386_v57, 5 }
 0x200   : > { %783 = vrot.lane.b32.xlu1 %v782_v41, %s2736_s10  ;;  %795 = vrot.lane.b32.xlu2 %v794_v42, %s2737_s11 }
 0x201   : > { %800 = vrot.lane.b32.xlu0 %v782_v41, %s2738_s18  ;;  %v926_v41 = vrot.slane %v2368_v34, 7  ;;  %v2379_v34 = vld [vmem:[#allocation2 + $0x6] sm:$0x1] }
 0x202   : > { %v1018_v43 = vrot.slane %v2379_v34, 4 }
 0x203   : > { %v927_v51 = vsel %vm467_vm7, %v926_v41, %v2367_v38  ;;  %v1031_v41 = vrot.slane %v2381_v32, 6 }
 0x204   : > { %v929_v53 = vsel %vm470_vm10, %v928_v45, %v927_v51 }
 0x205   : > { %v931_v56 = vsel %vm473_vm11, %v930_v49, %v929_v53  ;;  %v1030_v49 = vsel %vm467_vm7, %v1029_v37, %v2379_v34  ;;  %v2394_v37 = vld [vmem:[#allocation2 + $0x4f] sm:$0x1] }
 0x206   : > { %v1032_v51 = vsel %vm470_vm10, %v1031_v41, %v1030_v49  ;;  %v1136_v49 = vrot.slane %v2394_v37, 5 }
 0x208   : > { %819 = vrot.lane.b32.xlu1 %v818_v61, %s2736_s10  ;;  %829 = vrot.lane.b32.xlu2 %v828_v62, %s2737_s11 }
 0x209   : > { %833 = vrot.lane.b32.xlu0 %v818_v61, %s2738_s18  ;;  %v961_v61 = vrot.slane %v2372_v54, 3 }
 0x20b   : > { %v962_v5 = vsel %vm480_vm6, %v961_v61, %v960_v2 }
 0x20c   : > { %v964_v7 = vsel %vm483_vm8, %v963_v0, %v962_v5 }
 0x20d   : > { %v966_v11 = vsel %vm486_vm9, %v965_v3, %v964_v7  ;;  %v1068_v3 = vrot.slane %v2386_v57, 1  ;;  %v2397_v57 = vld [vmem:[#allocation2 + $0x38] sm:$0x1] }
 0x210   : > { %853 = vrot.lane.b32.xlu1 %v852_v15, %s2736_s10  ;;  %864 = vrot.lane.b32.xlu2 %v863_v16, %s2737_s11  ;;  %v995_v16 = vrot.slane %v2376_v8, 3 }
 0x211   : > { %868 = vrot.lane.b32.xlu0 %v852_v15, %s2738_s18  ;;  %v983_v15 = vrot.slane %v2376_v8, 7  ;;  %v2388_v8 = vld [vmem:[#allocation2 + $0x1e] sm:$0x1] }
 0x212   : > { %v996_v26 = vsel %vm480_vm6, %v995_v16, %v994_v22  ;;  %v1098_v16 = vrot.slane %v2388_v8, 3 }
 0x213   : > { %v984_v25 = vsel %vm467_vm7, %v983_v15, %v2375_v13  ;;  %v998_v28 = vsel %vm483_vm8, %v997_v19, %v996_v26  ;;  %v2387_v13 = vld [vmem:[#allocation2 + $0x6] sm:$0x1]  ;;  %v1086_v15 = vrot.slane %v2388_v8, 7  ;;  %v1088_v19 = vrot.slane %v2389_v12, 6 }
 0x214   : > { %v986_v27 = vsel %vm470_vm10, %v985_v18, %v984_v25  ;;  %v1000_v31 = vsel %vm486_vm9, %v999_v23, %v998_v28  ;;  %v1090_v23 = vrot.slane %v2390_v14, 5  ;;  %v1097_v25 = vrot.slane %v2387_v13, 4 }
 0x215   : > { %v988_v30 = vsel %vm473_vm11, %v987_v21, %v986_v27  ;;  %v1100_v21 = vrot.slane %v2389_v12, 2  ;;  %v1102_v26 = vrot.slane %v2390_v14, 1  ;;  %v1087_v27 = vsel %vm467_vm7, %v1086_v15, %v2387_v13  ;;  %v2401_v14 = vld [vmem:[#allocation2 + $0x37] sm:$0x1]  ;;  %v2399_v15 = vld [vmem:[#allocation2 + $0x7] sm:$0x1] }
 0x216   : > { %v1099_v28 = vsel %vm480_vm6, %v1098_v16, %v1097_v25  ;;  %v2402_v16 = vld [vmem:[#allocation2 + $0x4f] sm:$0x1] }
 0x218   : > { %886 = vrot.lane.b32.xlu1 %v885_v35, %s3822_s21  ;;  %898 = vrot.lane.b32.xlu2 %v897_v36, %s3816_s23  ;;  %v1019_v36 = vrot.slane %v2380_v29, 3  ;;  %v1089_v29 = vsel %vm470_vm10, %v1088_v19, %v1087_v27  ;;  %v1200_v27 = vrot.slane %v2399_v15, 4 }
 0x219   : > { %903 = vrot.lane.b32.xlu0 %v885_v35, %s2741_s29  ;;  %v2382_v35 = vld [vmem:[#allocation2 + $0x4e] sm:$0x1]  ;;  %v1091_v32 = vsel %vm473_vm11, %v1090_v23, %v1089_v29  ;;  %v1203_v23 = vrot.slane %v2401_v14, 2 }
 0x21a   : > { %v494_v42 = vpop.permute.xlu2 %493  ;;  %v1023_v45 = vrot.slane %v2382_v35, 1  ;;  %v1033_v46 = vrot.slane %v2382_v35, 5  ;;  %v1020_v47 = vsel %vm480_vm6, %v1019_v36, %v1018_v43  ;;  %v2393_v35 = vld [vmem:[#allocation2 + $0x37] sm:$0x1]  ;;  %v2391_v36 = vld [vmem:[#allocation2 + $0x7] sm:$0x1] }
 0x21b   : > { %496 = vst.msk [vmem:[#allocation3 + $0x10] sm:$0xf] %vm476_vm12, %v494_v42  ;;  %v1022_v50 = vsel %vm483_vm8, %v1021_v40, %v1020_v47  ;;  %v1134_v43 = vrot.slane %v2393_v35, 6  ;;  %v1126_v47 = vrot.slane %v2394_v37, 1  ;;  %v2405_v37 = vld [vmem:[#allocation2 + $0x38] sm:$0x1] }
 0x21c   : > { %v1024_v53 = vsel %vm486_vm9, %v1023_v45, %v1022_v50  ;;  %v1034_v54 = vsel %vm473_vm11, %v1033_v46, %v1032_v51  ;;  %v1121_v46 = vrot.slane %v2391_v36, 4 }
 0x220   : > { %922 = vrot.lane.b32.xlu1 %v921_v55, %s3822_s21  ;;  %932 = vrot.lane.b32.xlu2 %v931_v56, %s3816_s23  ;;  %v2383_v56 = vld [vmem:[#allocation2 + $0x7] sm:$0x1] }
 0x221   : > { %936 = vrot.lane.b32.xlu0 %v921_v55, %s2741_s29  ;;  %v2385_v55 = vld [vmem:[#allocation2 + $0x37] sm:$0x1]  ;;  %v1063_v2 = vrot.slane %v2383_v56, 4  ;;  %v1054_v4 = vsel %vm467_vm7, %v1053_v58, %v2383_v56  ;;  %v2395_v58 = vld [vmem:[#allocation2 + $0x8] sm:$0x1] }
 0x222   : > { %v556_v62 = vpop.permute.xlu2 %555  ;;  %v1066_v63 = vrot.slane %v2385_v55, 2 }
 0x223   : > { %558 = vst.msk [vmem:[#allocation3 + $0x30] sm:$0xf0] %vm491_vm13, %v556_v62  ;;  %v1055_v62 = vrot.slane %v2385_v55, 6  ;;  %v1065_v5 = vsel %vm480_vm6, %v1064_v59, %v1063_v2  ;;  %v2398_v59 = vld [vmem:[#allocation2 + $0x50] sm:$0x1] }
 0x224   : > { %v1067_v7 = vsel %vm483_vm8, %v1066_v63, %v1065_v5  ;;  %v1171_v5 = vrot.slane %v2398_v59, 1 }
 0x225   : > { %v1056_v6 = vsel %vm470_vm10, %v1055_v62, %v1054_v4  ;;  %v1166_v4 = vrot.slane %v2395_v58, 4 }
 0x228   : > { %956 = vrot.lane.b32.xlu1 %v955_v10, %s3822_s21  ;;  %967 = vrot.lane.b32.xlu2 %v966_v11, %s3816_s23  ;;  %s2744_s23 = smov 78   ;;  %v1069_v11 = vsel %vm486_vm9, %v1068_v3, %v1067_v7  ;;  %s3828_s21 = smov 94   ;;  %v1160_v3 = vrot.slane %v2398_v59, 5  ;;  %v2409_v59 = vld [vmem:[#allocation2 + $0x39] sm:$0x1] }
 0x229   : > { %971 = vrot.lane.b32.xlu0 %v955_v10, %s2741_s29  ;;  %v1058_v10 = vsel %vm473_vm11, %v1057_v1, %v1056_v6  ;;  %v1169_v1 = vrot.slane %v2397_v57, 2 }
 0x22a   : > { %v590_v17 = vpop.permute.xlu2 %589 }
 0x230   : > { %989 = vrot.lane.b32.xlu1 %v988_v30, %s3820_s22  ;;  %1001 = vrot.lane.b32.xlu2 %v1000_v31, %s3818_s28  ;;  %v2392_v31 = vld [vmem:[#allocation2 + $0x1f] sm:$0x1] }
 0x231   : > { %1006 = vrot.lane.b32.xlu0 %v988_v30, %s2744_s23  ;;  %v1101_v30 = vsel %vm483_vm8, %v1100_v21, %v1099_v28  ;;  %v1205_v28 = vrot.slane %v2402_v16, 1 }
 0x232   : > { %v489_v38 = vpop.permute.xlu1 %488  ;;  %v624_v39 = vpop.permute.xlu2 %623  ;;  %v1103_v34 = vsel %vm486_vm9, %v1102_v26, %v1101_v30  ;;  %v1193_v26 = vrot.slane %v2402_v16, 5 }
 0x233   : > { %492 = vst.msk [vmem:[#allocation3] sm:$0xf0] %vm491_vm13, %v489_v38  ;;  %v523_v42 = vpop.permute.xlu0 %522  ;;  %v1122_v38 = vrot.slane %v2392_v31, 3 }
 0x234   : > { %593 = vst.msk [vmem:[#allocation3] sm:$0xf0] %vm592_vm14, %v590_v17 }
 0x235   : > { %525 = vst.msk [vmem:[#allocation3 + $0x20] sm:$0xf] %vm476_vm12, %v523_v42  ;;  %v1124_v42 = vrot.slane %v2393_v35, 2  ;;  %v1123_v50 = vsel %vm480_vm6, %v1122_v38, %v1121_v46  ;;  %v2403_v38 = vld [vmem:[#allocation2 + $0x8] sm:$0x1]  ;;  %v1237_v46 = vrot.slane %v2405_v37, 6 }
 0x236   : > { %626 = vst.msk [vmem:[#allocation3 + $0x20] sm:$0xf] %vm580_vm15, %v624_v39  ;;  %v1132_v39 = vrot.slane %v2392_v31, 7 }
 0x237   : > { %v1125_v52 = vsel %vm483_vm8, %v1124_v42, %v1123_v50 }
 0x238   : > { %1025 = vrot.lane.b32.xlu1 %v1024_v53, %s3820_s22  ;;  %1035 = vrot.lane.b32.xlu2 %v1034_v54, %s3818_s28  ;;  %v1133_v51 = vsel %vm467_vm7, %v1132_v39, %v2391_v36  ;;  %v2396_v54 = vld [vmem:[#allocation2 + $0x20] sm:$0x1]  ;;  %v1127_v55 = vsel %vm486_vm9, %v1126_v47, %v1125_v52  ;;  %v2406_v39 = vld [vmem:[#allocation2 + $0x50] sm:$0x1] }
 0x239   : > { %1039 = vrot.lane.b32.xlu0 %v1024_v53, %s2744_s23  ;;  %v1135_v53 = vsel %vm470_vm10, %v1134_v43, %v1133_v51  ;;  %v1229_v50 = vrot.slane %v2406_v39, 1  ;;  %v1239_v51 = vrot.slane %v2406_v39, 5 }
 0x23a   : > { %v527_v60 = vpop.permute.xlu1 %526  ;;  %v659_v61 = vpop.permute.xlu2 %658  ;;  %v1137_v56 = vsel %vm473_vm11, %v1136_v49, %v1135_v53  ;;  %v1224_v49 = vrot.slane %v2403_v38, 4 }
 0x23b   : > { %529 = vst.msk [vmem:[#allocation3 + $0x20] sm:$0xf0] %vm491_vm13, %v527_v60  ;;  %v560_v0 = vpop.permute.xlu0 %559  ;;  %v1156_v60 = vrot.slane %v2396_v54, 7 }
 0x23c   : > { %661 = vst.msk [vmem:[#allocation3 + $0x30] sm:$0xf0] %vm592_vm14, %v659_v61  ;;  %v1167_v61 = vrot.slane %v2396_v54, 3 }
 0x23d   : > { %562 = vst.msk [vmem:[#allocation3 + $0x40] sm:$0xf] %vm476_vm12, %v560_v0  ;;  %v1158_v0 = vrot.slane %v2397_v57, 6  ;;  %v1157_v6 = vsel %vm467_vm7, %v1156_v60, %v2395_v58  ;;  %v2407_v60 = vld [vmem:[#allocation2 + $0x9] sm:$0x1] }
 0x23e   : > { %v1168_v7 = vsel %vm480_vm6, %v1167_v61, %v1166_v4  ;;  %v2410_v61 = vld [vmem:[#allocation2 + $0x51] sm:$0x1] }
 0x23f   : > { %v1159_v8 = vsel %vm470_vm10, %v1158_v0, %v1157_v6  ;;  %v1269_v6 = vrot.slane %v2407_v60, 4 }
 0x240   : > { %1059 = vrot.lane.b32.xlu1 %v1058_v10, %s3820_s22  ;;  %1070 = vrot.lane.b32.xlu2 %v1069_v11, %s3818_s28  ;;  %s3826_s28 = smov 96   ;;  %s3824_s22 = smov 95   ;;  %v2400_v11 = vld [vmem:[#allocation2 + $0x1f] sm:$0x1]  ;;  %v1161_v12 = vsel %vm473_vm11, %v1160_v3, %v1159_v8  ;;  %v1272_v3 = vrot.slane %v2409_v59, 2 }
 0x241   : > { %1074 = vrot.lane.b32.xlu0 %v1058_v10, %s2744_s23  ;;  %v1170_v10 = vsel %vm483_vm8, %v1169_v1, %v1168_v7  ;;  %v1274_v7 = vrot.slane %v2410_v61, 1 }
 0x242   : > { %v578_v17 = vpop.permute.xlu1 %577  ;;  %v693_v18 = vpop.permute.xlu2 %692  ;;  %v1172_v13 = vsel %vm486_vm9, %v1171_v5, %v1170_v10  ;;  %v1263_v5 = vrot.slane %v2410_v61, 5 }
 0x243   : > { %581 = vst.msk [vmem:[#allocation3] sm:$0xf] %vm580_vm15, %v578_v17  ;;  %v595_v22 = vpop.permute.xlu0 %594  ;;  %v1189_v17 = vrot.slane %v2400_v11, 7 }
 0x244   : > { %696 = vst.msk [vmem:[#allocation3] sm:$0xf0] %vm3831_vm0, %v693_v18  ;;  %v1201_v18 = vrot.slane %v2400_v11, 3 }
 0x245   : > { %597 = vst.msk [vmem:[#allocation3 + $0x10] sm:$0xf] %vm580_vm15, %v595_v22  ;;  %v1191_v22 = vrot.slane %v2401_v14, 6  ;;  %v1190_v29 = vsel %vm467_vm7, %v1189_v17, %v2399_v15 }
 0x246   : > { %v1202_v30 = vsel %vm480_vm6, %v1201_v18, %v1200_v27 }
 0x247   : > { %v1192_v31 = vsel %vm470_vm10, %v1191_v22, %v1190_v29  ;;  %v2424_v22 = vld [vmem:[#allocation2 + $0x21] sm:$0x1] }
 0x248   : > { %1092 = vrot.lane.b32.xlu1 %v1091_v32, %s3826_s28  ;;  %1104 = vrot.lane.b32.xlu2 %v1103_v34, %s3824_s22  ;;  %v2404_v34 = vld [vmem:[#allocation2 + $0x20] sm:$0x1]  ;;  %v1194_v35 = vsel %vm473_vm11, %v1193_v26, %v1192_v31  ;;  %v1387_v26 = vrot.slane %v2424_v22, 7  ;;  %v1398_v27 = vrot.slane %v2424_v22, 3 }
 0x249   : > { %1109 = vrot.lane.b32.xlu0 %v1091_v32, %s3828_s21  ;;  %v1204_v32 = vsel %vm483_vm8, %v1203_v23, %v1202_v30  ;;  %v2425_v23 = vld [vmem:[#allocation2 + $0x39] sm:$0x1] }
 0x24a   : > { %v614_v40 = vpop.permute.xlu1 %613  ;;  %v727_v41 = vpop.permute.xlu2 %726  ;;  %v1206_v36 = vsel %vm486_vm9, %v1205_v28, %v1204_v32  ;;  %v2434_v28 = vld [vmem:[#allocation2 + $0x53] sm:$0x1]  ;;  %v1389_v31 = vrot.slane %v2425_v23, 6  ;;  %v1400_v32 = vrot.slane %v2425_v23, 2 }
 0x24b   : > { %616 = vst.msk [vmem:[#allocation3 + $0x10] sm:$0xf0] %vm592_vm14, %v614_v40  ;;  %v628_v45 = vpop.permute.xlu0 %627  ;;  %v1225_v40 = vrot.slane %v2404_v34, 3 }
 0x24c   : > { %729 = vst.msk [vmem:[#allocation3 + $0x20] sm:$0xf] %vm683_vm1, %v727_v41  ;;  %v1235_v41 = vrot.slane %v2404_v34, 7 }
 0x24d   : > { %630 = vst.msk [vmem:[#allocation3 + $0x20] sm:$0xf0] %vm592_vm14, %v628_v45  ;;  %v1227_v45 = vrot.slane %v2405_v37, 2  ;;  %v1226_v52 = vsel %vm480_vm6, %v1225_v40, %v1224_v49  ;;  %v2431_v40 = vld [vmem:[#allocation2 + $0xb] sm:$0x1] }
 0x24e   : > { %v1236_v53 = vsel %vm467_vm7, %v1235_v41, %v2403_v38  ;;  %v1459_v38 = vrot.slane %v2434_v28, 5  ;;  %v1465_v61 = vrot.slane %v2431_v40, 4 }
 0x24f   : > { %v1228_v54 = vsel %vm483_vm8, %v1227_v45, %v1226_v52  ;;  %v2444_v45 = vld [vmem:[#allocation2 + $0x24] sm:$0x1]  ;;  %v2446_v52 = vld [vmem:[#allocation2 + $0x54] sm:$0x1] }
 0x250   : > { %1128 = vrot.lane.b32.xlu1 %v1127_v55, %s3826_s28  ;;  %1138 = vrot.lane.b32.xlu2 %v1137_v56, %s3824_s22  ;;  %v2408_v56 = vld [vmem:[#allocation2 + $0x21] sm:$0x1]  ;;  %v1230_v57 = vsel %vm486_vm9, %v1229_v50, %v1228_v54  ;;  %v2445_v50 = vld [vmem:[#allocation2 + $0x3c] sm:$0x1] }
 0x251   : > { %1142 = vrot.lane.b32.xlu0 %v1127_v55, %s3828_s21  ;;  %v1238_v55 = vsel %vm470_vm10, %v1237_v46, %v1236_v53  ;;  %v1556_v53 = vrot.slane %v2444_v45, 7 }
 0x252   : > { %v648_v62 = vpop.permute.xlu1 %647  ;;  %v762_v63 = vpop.permute.xlu2 %761  ;;  %v1240_v58 = vsel %vm473_vm11, %v1239_v51, %v1238_v55 }
 0x253   : > { %650 = vst.msk [vmem:[#allocation3 + $0x30] sm:$0xf] %vm580_vm15, %v648_v62  ;;  %v663_v2 = vpop.permute.xlu0 %662  ;;  %v1259_v62 = vrot.slane %v2408_v56, 7 }
 0x254   : > { %764 = vst.msk [vmem:[#allocation3 + $0x30] sm:$0xf0] %vm3831_vm0, %v762_v63  ;;  %v1270_v63 = vrot.slane %v2408_v56, 3  ;;  %v1558_v56 = vrot.slane %v2445_v50, 6 }
 0x255   : > { %665 = vst.msk [vmem:[#allocation3 + $0x40] sm:$0xf] %vm580_vm15, %v663_v2  ;;  %v1261_v2 = vrot.slane %v2409_v59, 6  ;;  %v1260_v8 = vsel %vm467_vm7, %v1259_v62, %v2407_v60  ;;  %v1560_v59 = vrot.slane %v2446_v52, 5  ;;  %v2443_v62 = vld [vmem:[#allocation2 + $0xc] sm:$0x1] }
 0x256   : > { %v1271_v10 = vsel %vm480_vm6, %v1270_v63, %v1269_v6  ;;  %v1470_v63 = vrot.slane %v2434_v28, 1  ;;  %v3281_v6 = vld [vmem:[#allocation2 + $0x3d] sm:$0x1]  ;;  %v2429_v28 = vld [vmem:[#allocation2 + $0x3a] sm:$0x1] }
 0x257   : > { %v1262_v11 = vsel %vm470_vm10, %v1261_v2, %v1260_v8  ;;  %v3286_v8 = vld [vmem:[#allocation2 + $0x55] sm:$0x1] }
 0x258   : > { %1162 = vrot.lane.b32.xlu1 %v1161_v12, %s3826_s28  ;;  %1173 = vrot.lane.b32.xlu2 %v1172_v13, %s3824_s22  ;;  %s2748_s22 = smov 112   ;;  %s2749_s28 = smov 111   ;;  %v1264_v13 = vsel %vm473_vm11, %v1263_v5, %v1262_v11 }
 0x259   : > { %1177 = vrot.lane.b32.xlu0 %v1161_v12, %s3828_s21  ;;  %s3836_s21 = smov 110   ;;  %v1273_v12 = vsel %vm483_vm8, %v1272_v3, %v1271_v10  ;;  %v3277_v3 = vld [vmem:[#allocation2 + $0x25] sm:$0x1] }
 0x25a   : > { %v681_v19 = vpop.permute.xlu1 %680  ;;  %v796_v21 = vpop.permute.xlu2 %795  ;;  %v1275_v14 = vsel %vm486_vm9, %v1274_v7, %v1273_v12  ;;  %v1657_v10 = vrot.slane %v3277_v3, 7 }
 0x25b   : > { %684 = vst.msk [vmem:[#allocation3] sm:$0xf] %vm683_vm1, %v681_v19  ;;  %v698_v25 = vpop.permute.xlu0 %697 }
 0x25c   : > { %799 = vst.msk [vmem:[#allocation3] sm:$0xf0] %vm3830_vm2, %v796_v21 }
 0x25d   : > { %700 = vst.msk [vmem:[#allocation3 + $0x10] sm:$0xf] %vm683_vm1, %v698_v25  ;;  %v2432_v25 = vld [vmem:[#allocation2 + $0x23] sm:$0x1] }
 0x25e   : > { %v1455_v34 = vrot.slane %v2432_v25, 7 }
 0x260   : > { %1195 = vrot.lane.b32.xlu1 %v1194_v35, %s2748_s22  ;;  %1207 = vrot.lane.b32.xlu2 %v1206_v36, %s2749_s28 }
 0x261   : > { %1212 = vrot.lane.b32.xlu0 %v1194_v35, %s3836_s21 }
 0x262   : > { %v717_v42 = vpop.permute.xlu1 %716  ;;  %v830_v43 = vpop.permute.xlu2 %829 }
 0x263   : > { %719 = vst.msk [vmem:[#allocation3 + $0x10] sm:$0xf0] %vm3831_vm0, %v717_v42  ;;  %v731_v47 = vpop.permute.xlu0 %730 }
 0x264   : > { %832 = vst.msk [vmem:[#allocation3 + $0x20] sm:$0xf] %vm786_vm3, %v830_v43  ;;  %v1456_v43 = vsel %vm467_vm7, %v1455_v34, %v2431_v40  ;;  %v2427_v34 = vld [vmem:[#allocation2 + $0xa] sm:$0x1] }
 0x265   : > { %733 = vst.msk [vmem:[#allocation3 + $0x20] sm:$0xf0] %vm3831_vm0, %v731_v47  ;;  %vm3835_vm0 = vcmask 781952  }
 0x268   : > { %1231 = vrot.lane.b32.xlu1 %v1230_v57, %s2748_s22  ;;  %1241 = vrot.lane.b32.xlu2 %v1240_v58, %s2749_s28 }
 0x269   : > { %1245 = vrot.lane.b32.xlu0 %v1230_v57, %s3836_s21  ;;  %v1466_v57 = vrot.slane %v2432_v25, 3 }
 0x26a   : > { %v751_v0 = vpop.permute.xlu1 %750  ;;  %v865_v1 = vpop.permute.xlu2 %864 }
 0x26b   : > { %753 = vst.msk [vmem:[#allocation3 + $0x30] sm:$0xf] %vm683_vm1, %v751_v0  ;;  %v766_v4 = vpop.permute.xlu0 %765  ;;  %v1557_v0 = vsel %vm467_vm7, %v1556_v53, %v2443_v62  ;;  %v1467_v2 = vsel %vm480_vm6, %v1466_v57, %v1465_v61 }
 0x26c   : > { %867 = vst.msk [vmem:[#allocation3 + $0x30] sm:$0xf0] %vm3830_vm2, %v865_v1  ;;  %v1559_v1 = vsel %vm470_vm10, %v1558_v56, %v1557_v0  ;;  %v3333_v56 = vld [vmem:[#allocation2 + $0x27] sm:$0x1] }
 0x26d   : > { %768 = vst.msk [vmem:[#allocation3 + $0x40] sm:$0xf] %vm683_vm1, %v766_v4  ;;  %v1561_v4 = vsel %vm473_vm11, %v1560_v59, %v1559_v1  ;;  %v1668_v59 = vrot.slane %v3277_v3, 3  ;;  %v1859_v0 = vrot.slane %v3333_v56, 7 }
 0x270   : > { %1265 = vrot.lane.b32.xlu1 %v1264_v13, %s2748_s22  ;;  %1276 = vrot.lane.b32.xlu2 %v1275_v14, %s2749_s28  ;;  %v1567_v14 = vrot.slane %v2444_v45, 3 }
 0x271   : > { %1280 = vrot.lane.b32.xlu0 %v1264_v13, %s3836_s21  ;;  %v1659_v13 = vrot.slane %v3281_v6, 6 }
 0x272   : > { %v784_v15 = vpop.permute.xlu1 %783  ;;  %v899_v16 = vpop.permute.xlu2 %898 }
 0x273   : > { %787 = vst.msk [vmem:[#allocation3] sm:$0xf] %vm786_vm3, %v784_v15  ;;  %v801_v17 = vpop.permute.xlu0 %800 }
 0x274   : > { %902 = vst.msk [vmem:[#allocation3] sm:$0xf0] %vm3832_vm4, %v899_v16  ;;  %v1661_v16 = vrot.slane %v3286_v8, 5 }
 0x275   : > { %803 = vst.msk [vmem:[#allocation3 + $0x10] sm:$0xf] %vm786_vm3, %v801_v17  ;;  %v1569_v17 = vrot.slane %v2445_v50, 2 }
 0x278   : > { %1307 = vrot.lane.b32.xlu1 %v3040_v9, %s2729_s30  ;;  %1311 = vrot.lane.b32.xlu2 %v3047_v20, %s2727_s24  ;;  %v2423_v9 = vld [vmem:[#allocation2 + $0x9] sm:$0x1]  ;;  %v2426_v20 = vld [vmem:[#allocation2 + $0x51] sm:$0x1] }
 0x279   : > { %1338 = vrot.lane.b32.xlu0 %v3053_v24, %s2729_s30  ;;  %v2433_v24 = vld [vmem:[#allocation2 + $0x3b] sm:$0x1]  ;;  %v1391_v35 = vrot.slane %v2426_v20, 5  ;;  %v1397_v36 = vrot.slane %v2423_v9, 4 }
 0x27a   : > { %v820_v18 = vpop.permute.xlu1 %819  ;;  %v933_v19 = vpop.permute.xlu2 %932  ;;  %v1457_v37 = vrot.slane %v2433_v24, 6  ;;  %v1468_v60 = vrot.slane %v2433_v24, 2 }
 0x27b   : > { %822 = vst.msk [vmem:[#allocation3 + $0x10] sm:$0xf0] %vm3830_vm2, %v820_v18  ;;  %v834_v21 = vpop.permute.xlu0 %833  ;;  %v1399_v39 = vsel %vm480_vm6, %v1398_v27, %v1397_v36  ;;  %v1566_v18 = vrot.slane %v2443_v62, 4  ;;  %v3307_v27 = vld [vmem:[#allocation2 + $0x3e] sm:$0x1] }
 0x27c   : > { %935 = vst.msk [vmem:[#allocation3 + $0x20] sm:$0xf] %vm3833_vm5, %v933_v19  ;;  %v1401_v42 = vsel %vm483_vm8, %v1400_v32, %v1399_v39  ;;  %v1458_v49 = vsel %vm470_vm10, %v1457_v37, %v1456_v43  ;;  %v1469_v5 = vsel %vm483_vm8, %v1468_v60, %v1467_v2  ;;  %v3294_v19 = vld [vmem:[#allocation2 + $0xd] sm:$0x1]  ;;  %v1433_v37 = vrot.slane %v2429_v28, 6 }
 0x27d   : > { %836 = vst.msk [vmem:[#allocation3 + $0x20] sm:$0xf0] %vm3830_vm2, %v834_v21  ;;  %v1460_v51 = vsel %vm473_vm11, %v1459_v38, %v1458_v49  ;;  %vm3834_vm2 = vcmask 786052   ;;  %v1471_v7 = vsel %vm486_vm9, %v1470_v63, %v1469_v5  ;;  %v1571_v21 = vrot.slane %v2446_v52, 1  ;;  %v3345_v60 = vld [vmem:[#allocation2 + $0x57] sm:$0x1] }
 0x27e   : > { %v1658_v22 = vsel %vm467_vm7, %v1657_v10, %v3294_v19  ;;  %v1568_v25 = vsel %vm480_vm6, %v1567_v14, %v1566_v18  ;;  %v1420_v43 = vrot.slane %v2427_v34, 4  ;;  %v1670_v63 = vrot.slane %v3281_v6, 2  ;;  %v3357_v6 = vld [vmem:[#allocation2 + $0xf] sm:$0x1]  ;;  %v2441_v14 = vld [vmem:[#allocation2 + $0x3b] sm:$0x1] }
 0x27f   : > { %v1660_v23 = vsel %vm470_vm10, %v1659_v13, %v1658_v22  ;;  %v1667_v1 = vrot.slane %v3294_v19, 4  ;;  %v1863_v3 = vrot.slane %v3345_v60, 5 }
 0x280   : > { %1342 = vrot.lane.b32.xlu1 %v3059_v33, %s2727_s24  ;;  %1371 = vrot.lane.b32.xlu2 %v3071_v44, %s2729_s30  ;;  %v1402_v44 = vrot.slane %v2426_v20, 1  ;;  %v2428_v20 = vld [vmem:[#allocation2 + $0x22] sm:$0x1]  ;;  %v3304_v24 = vsel %vm473_vm11, %v1661_v16, %v1660_v23  ;;  %v2439_v16 = vld [vmem:[#allocation2 + $0xb] sm:$0x1]  ;;  %v1534_v23 = vrot.slane %v2441_v14, 6 }
 0x281   : > { %1375 = vrot.lane.b32.xlu0 %v3077_v48, %s2727_s24  ;;  %v1388_v48 = vsel %vm467_vm7, %v1387_v26, %v2423_v9  ;;  %v3301_v9 = vld [vmem:[#allocation2 + $0x26] sm:$0x1]  ;;  %v1570_v26 = vsel %vm483_vm8, %v1569_v17, %v1568_v25  ;;  %v1421_v38 = vrot.slane %v2428_v20, 3  ;;  %v2442_v17 = vld [vmem:[#allocation2 + $0x53] sm:$0x1]  ;;  %v1524_v25 = vrot.slane %v2441_v14, 2 }
 0x282   : > { %v854_v29 = vpop.permute.xlu1 %853  ;;  %v968_v30 = vpop.permute.xlu2 %967  ;;  %v1390_v41 = vsel %vm470_vm10, %v1389_v31, %v1388_v48  ;;  %v1403_v47 = vsel %vm486_vm9, %v1402_v44, %v1401_v42  ;;  %v2430_v31 = vld [vmem:[#allocation2 + $0x52] sm:$0x1]  ;;  %v1758_v32 = vrot.slane %v3301_v9, 7  ;;  %v1760_v44 = vrot.slane %v3307_v27, 6  ;;  %v3321_v42 = vld [vmem:[#allocation2 + $0xe] sm:$0x1] }
 0x283   : > { %856 = vst.msk [vmem:[#allocation3 + $0x30] sm:$0xf] %vm786_vm3, %v854_v29  ;;  %v869_v33 = vpop.permute.xlu0 %868  ;;  %v3262_v46 = vsel %vm473_vm11, %v1391_v35, %v1390_v41  ;;  %v1572_v29 = vsel %vm486_vm9, %v1571_v21, %v1570_v26  ;;  %v1435_v40 = vrot.slane %v2430_v31, 5  ;;  %v1423_v41 = vrot.slane %v2429_v28, 2  ;;  %s3843_s24 = smov 64   ;;  %s3844_s30 = smov 63  }
 0x284   : > { %970 = vst.msk [vmem:[#allocation3 + $0x30] sm:$0xf0] %vm3832_vm4, %v968_v30  ;;  %v3313_v30 = vld [vmem:[#allocation2 + $0x56] sm:$0x1]  ;;  %v1425_v45 = vrot.slane %v2430_v31, 1  ;;  %v1422_v52 = vsel %vm480_vm6, %v1421_v38, %v1420_v43  ;;  %v1536_v26 = vrot.slane %v2442_v17, 5 }
 0x285   : > { %871 = vst.msk [vmem:[#allocation3 + $0x40] sm:$0xf] %vm786_vm3, %v869_v33  ;;  %v1431_v33 = vrot.slane %v2428_v20, 7  ;;  %v1762_v39 = vrot.slane %v3313_v30, 5  ;;  %v1526_v28 = vrot.slane %v2442_v17, 1  ;;  %v1769_v38 = vrot.slane %v3301_v9, 3 }
 0x286   : > { %v3402_v9 = vld [vmem:[#allocation2 + $0x10] sm:$0x1]  ;;  %v3427_v14 = vld [vmem:[#allocation2 + $0x29] sm:$0x1]  ;;  %v3435_v17 = vld [vmem:[#allocation2 + $0x41] sm:$0x1] }
 0x287   : > { %v1432_v49 = vsel %vm467_vm7, %v1431_v33, %v2427_v34  ;;  %v3379_v33 = vld [vmem:[#allocation2 + $0x28] sm:$0x1] }
 0x288   : > { %1393 = vrot.lane.b32.xlu1 %v3262_v46, %s2730_s4  ;;  %1404 = vrot.lane.b32.xlu2 %v1403_v47, %s2731_s5  ;;  %v1759_v47 = vsel %vm467_vm7, %v1758_v32, %v3321_v42 }
 0x289   : > { %1476 = vrot.lane.b32.xlu0 %v1460_v51, %s2732_s6  ;;  %v1761_v50 = vsel %vm470_vm10, %v1760_v44, %v1759_v47  ;;  %v3385_v44 = vld [vmem:[#allocation2 + $0x40] sm:$0x1] }
 0x28a   : > { %v887_v54 = vpop.permute.xlu1 %886  ;;  %v1002_v55 = vpop.permute.xlu2 %1001  ;;  %v1763_v53 = vsel %vm473_vm11, %v1762_v39, %v1761_v50  ;;  %v1962_v43 = vrot.slane %v3385_v44, 6 }
 0x28b   : > { %890 = vst.msk [vmem:[#allocation3] sm:$0xf] %vm3833_vm5, %v887_v54  ;;  %v904_v58 = vpop.permute.xlu0 %903 }
 0x28c   : > { %1005 = vst.msk [vmem:[#allocation3] sm:$0xf0] %vm3834_vm2, %v1002_v55  ;;  %v1424_v55 = vsel %vm483_vm8, %v1423_v41, %v1422_v52  ;;  %v1771_v41 = vrot.slane %v3307_v27, 2 }
 0x28d   : > { %906 = vst.msk [vmem:[#allocation3 + $0x10] sm:$0xf] %vm3833_vm5, %v904_v58  ;;  %v3338_v57 = vsel %vm486_vm9, %v1425_v45, %v1424_v55  ;;  %v3340_v58 = vld [vmem:[#allocation2 + $0x3f] sm:$0x1]  ;;  %v1768_v45 = vrot.slane %v3321_v42, 4 }
 0x28e   : > { %v1861_v5 = vrot.slane %v3340_v58, 6  ;;  %v2453_v55 = vld [vmem:[#allocation2 + $0x3c] sm:$0x1] }
 0x290   : > { %1577 = vrot.lane.b32.xlu1 %v1561_v4, %s2735_s9  ;;  %1461 = vrot.lane.b32.xlu2 %v1460_v51, %s2730_s4  ;;  %v1434_v51 = vsel %vm470_vm10, %v1433_v37, %v1432_v49  ;;  %v3390_v37 = vld [vmem:[#allocation2 + $0x58] sm:$0x1]  ;;  %v1773_v49 = vrot.slane %v3313_v30, 1 }
 0x291   : > { %1472 = vrot.lane.b32.xlu0 %v1471_v7, %s2731_s5  ;;  %v1436_v54 = vsel %vm473_vm11, %v1435_v40, %v1434_v51  ;;  %v1669_v7 = vsel %vm480_vm6, %v1668_v59, %v1667_v1  ;;  %v1964_v50 = vrot.slane %v3390_v37, 5  ;;  %v1770_v51 = vsel %vm480_vm6, %v1769_v38, %v1768_v45  ;;  %v2454_v59 = vld [vmem:[#allocation2 + $0x54] sm:$0x1] }
 0x292   : > { %v923_v11 = vpop.permute.xlu1 %922  ;;  %v1036_v12 = vpop.permute.xlu2 %1035  ;;  %v1671_v10 = vsel %vm483_vm8, %v1670_v63, %v1669_v7  ;;  %v1772_v42 = vsel %vm483_vm8, %v1771_v41, %v1770_v51  ;;  %v2466_v41 = vld [vmem:[#allocation2 + $0x55] sm:$0x1] }
 0x293   : > { %925 = vst.msk [vmem:[#allocation3 + $0x10] sm:$0xf0] %vm3832_vm4, %v923_v11  ;;  %v937_v15 = vpop.permute.xlu0 %936  ;;  %v1860_v11 = vsel %vm467_vm7, %v1859_v0, %v3357_v6  ;;  %v1774_v30 = vsel %vm486_vm9, %v1773_v49, %v1772_v42  ;;  %v1738_v42 = vrot.slane %v2466_v41, 5 }
 0x294   : > { %1038 = vst.msk [vmem:[#allocation3 + $0x20] sm:$0xf] %vm3835_vm0, %v1036_v12  ;;  %v2440_v12 = vld [vmem:[#allocation2 + $0x23] sm:$0x1]  ;;  %v1862_v13 = vsel %vm470_vm10, %v1861_v5, %v1860_v11  ;;  %v1625_v5 = vrot.slane %v2453_v55, 2 }
 0x295   : > { %939 = vst.msk [vmem:[#allocation3 + $0x20] sm:$0xf0] %vm3832_vm4, %v937_v15  ;;  %vm1107_vm4 = vcmask 917252   ;;  %v3368_v15 = vsel %vm473_vm11, %v1863_v3, %v1862_v13  ;;  %v1532_v18 = vrot.slane %v2440_v12, 7  ;;  %v1522_v19 = vrot.slane %v2440_v12, 3 }
 0x296   : > { %v1637_v3 = vrot.slane %v2454_v59, 5 }
 0x298   : > { %1678 = vrot.lane.b32.xlu1 %v3304_v24, %s2738_s18  ;;  %1562 = vrot.lane.b32.xlu2 %v1561_v4, %s2733_s7  ;;  %v1672_v4 = vrot.slane %v3286_v8, 1 }
 0x299   : > { %1573 = vrot.lane.b32.xlu0 %v1572_v29, %s2734_s8  ;;  %v1533_v29 = vsel %vm467_vm7, %v1532_v18, %v2439_v16  ;;  %v3439_v18 = vld [vmem:[#allocation2 + $0x59] sm:$0x1] }
 0x29a   : > { %v957_v35 = vpop.permute.xlu1 %956  ;;  %v1071_v36 = vpop.permute.xlu2 %1070  ;;  %v1673_v8 = vsel %vm486_vm9, %v1672_v4, %v1671_v10  ;;  %v1535_v32 = vsel %vm470_vm10, %v1534_v23, %v1533_v29  ;;  %v1627_v10 = vrot.slane %v2454_v59, 1  ;;  %v2061_v23 = vrot.slane %v3427_v14, 7 }
 0x29b   : > { %959 = vst.msk [vmem:[#allocation3 + $0x30] sm:$0xf] %vm3833_vm5, %v957_v35  ;;  %v972_v48 = vpop.permute.xlu0 %971  ;;  %v1537_v35 = vsel %vm473_vm11, %v1536_v26, %v1535_v32  ;;  %v1874_v26 = vrot.slane %v3345_v60, 1 }
 0x29c   : > { %1073 = vst.msk [vmem:[#allocation3 + $0x30] sm:$0xf0] %vm3834_vm2, %v1071_v36 }
 0x29d   : > { %974 = vst.msk [vmem:[#allocation3 + $0x40] sm:$0xf] %vm3833_vm5, %v972_v48  ;;  %vm1095_vm5 = vcmask 913152   ;;  %v1960_v48 = vrot.slane %v3379_v33, 7 }
 0x29f   : > { %v1961_v27 = vsel %vm467_vm7, %v1960_v48, %v3402_v9  ;;  %v3469_v48 = vld [vmem:[#allocation2 + $0x52] sm:$0x1] }
 0x2a0   : > { %1779 = vrot.lane.b32.xlu1 %v1763_v53, %s2741_s29  ;;  %1437 = vrot.lane.b32.xlu2 %v1436_v54, %s2731_s5  ;;  %v1963_v52 = vsel %vm470_vm10, %v1962_v43, %v1961_v27  ;;  %s3845_s5 = smov 94   ;;  %v3478_v27 = vld [vmem:[#allocation2 + $0xa] sm:$0x1] }
 0x2a1   : > { %1441 = vrot.lane.b32.xlu0 %v3338_v57, %s2732_s6  ;;  %v3412_v54 = vsel %vm473_vm11, %v1964_v50, %v1963_v52  ;;  %v1492_v50 = vrot.slane %v3469_v48, 5 }
 0x2a2   : > { %v990_v61 = vpop.permute.xlu1 %989  ;;  %v1105_v62 = vpop.permute.xlu2 %1104 }
 0x2a3   : > { %993 = vst.msk [vmem:[#allocation3] sm:$0xf] %vm3835_vm0, %v990_v61  ;;  %v1007_v2 = vpop.permute.xlu0 %1006  ;;  %v2451_v61 = vld [vmem:[#allocation2 + $0xc] sm:$0x1] }
 0x2a4   : > { %1108 = vst.msk [vmem:[#allocation3] sm:$0xf0] %vm1107_vm4, %v1105_v62  ;;  %v1622_v7 = vrot.slane %v2451_v61, 4 }
 0x2a5   : > { %1009 = vst.msk [vmem:[#allocation3 + $0x10] sm:$0xf] %vm3835_vm0, %v1007_v2  ;;  %v1635_v2 = vrot.slane %v2453_v55, 6 }
 0x2a8   : > { %1663 = vrot.lane.b32.xlu1 %v3304_v24, %s2736_s10  ;;  %1674 = vrot.lane.b32.xlu2 %v1673_v8, %s2737_s11  ;;  %v1521_v24 = vrot.slane %v2439_v16, 4 }
 0x2a9   : > { %1880 = vrot.lane.b32.xlu0 %v3368_v15, %s2744_s23 }
 0x2aa   : > { %v1026_v21 = vpop.permute.xlu1 %1025  ;;  %v1139_v22 = vpop.permute.xlu2 %1138  ;;  %v1523_v31 = vsel %vm480_vm6, %v1522_v19, %v1521_v24  ;;  %v1870_v19 = vrot.slane %v3333_v56, 3  ;;  %v2063_v24 = vrot.slane %v3435_v17, 6  ;;  %v3451_v56 = vld [vmem:[#allocation2 + $0x11] sm:$0x1] }
 0x2ab   : > { %1028 = vst.msk [vmem:[#allocation3 + $0x10] sm:$0xf0] %vm3834_vm2, %v1026_v21  ;;  %v1040_v20 = vpop.permute.xlu0 %1039  ;;  %v1525_v34 = vsel %vm483_vm8, %v1524_v25, %v1523_v31  ;;  %v1869_v25 = vrot.slane %v3357_v6, 4  ;;  %v3457_v31 = vld [vmem:[#allocation2 + $0x22] sm:$0x1] }
 0x2ac   : > { %1141 = vst.msk [vmem:[#allocation3 + $0x20] sm:$0xf] %vm1095_vm5, %v1139_v22  ;;  %v3383_v36 = vsel %vm486_vm9, %v1526_v28, %v1525_v34  ;;  %v2065_v28 = vrot.slane %v3439_v18, 5  ;;  %v3461_v34 = vld [vmem:[#allocation2 + $0x3a] sm:$0x1] }
 0x2ad   : > { %1042 = vst.msk [vmem:[#allocation3 + $0x20] sm:$0xf0] %vm3834_vm2, %v1040_v20  ;;  %vm3838_vm2 = vcmask 1048452   ;;  %v1871_v29 = vsel %vm480_vm6, %v1870_v19, %v1869_v25  ;;  %v2476_v19 = vld [vmem:[#allocation2 + $0x26] sm:$0x1] }
 0x2b0   : > { %1538 = vrot.lane.b32.xlu1 %v1537_v35, %s2734_s8  ;;  %1542 = vrot.lane.b32.xlu2 %v3383_v36, %s2735_s9  ;;  %v2464_v35 = vld [vmem:[#allocation2 + $0x25] sm:$0x1] }
 0x2b1   : > { %1764 = vrot.lane.b32.xlu0 %v1763_v53, %s3843_s24  ;;  %v2452_v53 = vld [vmem:[#allocation2 + $0x24] sm:$0x1]  ;;  %v1734_v49 = vrot.slane %v2464_v35, 7 }
 0x2b2   : > { %v1060_v39 = vpop.permute.xlu1 %1059  ;;  %v1174_v40 = vpop.permute.xlu2 %1173  ;;  %v1633_v62 = vrot.slane %v2452_v53, 7  ;;  %v1623_v1 = vrot.slane %v2452_v53, 3  ;;  %v2463_v53 = vld [vmem:[#allocation2 + $0xd] sm:$0x1] }
 0x2b3   : > { %1062 = vst.msk [vmem:[#allocation3 + $0x30] sm:$0xf] %vm3835_vm0, %v1060_v39  ;;  %v1075_v47 = vpop.permute.xlu0 %1074  ;;  %v2465_v39 = vld [vmem:[#allocation2 + $0x3d] sm:$0x1]  ;;  %v1735_v55 = vsel %vm467_vm7, %v1734_v49, %v2463_v53 }
 0x2b4   : > { %1176 = vst.msk [vmem:[#allocation3 + $0x30] sm:$0xf0] %vm1107_vm4, %v1174_v40  ;;  %v1624_v11 = vsel %vm480_vm6, %v1623_v1, %v1622_v7  ;;  %v1488_v40 = vrot.slane %v3457_v31, 7  ;;  %v1736_v51 = vrot.slane %v2465_v39, 6  ;;  %v1728_v7 = vrot.slane %v2466_v41, 1 }
 0x2b5   : > { %1077 = vst.msk [vmem:[#allocation3 + $0x40] sm:$0xf] %vm3835_vm0, %v1075_v47  ;;  %v1626_v8 = vsel %vm483_vm8, %v1625_v5, %v1624_v11  ;;  %vm1198_vm0 = vcmask 1044352   ;;  %v1490_v47 = vrot.slane %v3461_v34, 6  ;;  %v1723_v5 = vrot.slane %v2463_v53, 4 }
 0x2b6   : > { %v3432_v16 = vsel %vm486_vm9, %v1627_v10, %v1626_v8  ;;  %v1489_v52 = vsel %vm467_vm7, %v1488_v40, %v3478_v27  ;;  %v1973_v10 = vrot.slane %v3385_v44, 2  ;;  %v3505_v8 = vld [vmem:[#allocation2 + $0x23] sm:$0x1]  ;;  %v2074_v53 = vrot.slane %v3435_v17, 2 }
 0x2b8   : > { %1775 = vrot.lane.b32.xlu1 %v1774_v30, %s3844_s30  ;;  %1981 = vrot.lane.b32.xlu2 %v3412_v54, %s3845_s5  ;;  %v1491_v30 = vsel %vm470_vm10, %v1490_v47, %v1489_v52 }
 0x2b9   : > { %1408 = vrot.lane.b32.xlu0 %v3262_v46, %s2732_s6  ;;  %v1634_v46 = vsel %vm467_vm7, %v1633_v62, %v2451_v61  ;;  %s3847_s6 = smov 79   ;;  %v3486_v59 = vsel %vm473_vm11, %v1492_v50, %v1491_v30  ;;  %v1737_v61 = vsel %vm470_vm10, %v1736_v51, %v1735_v55  ;;  %v2072_v50 = vrot.slane %v3427_v14, 3 }
 0x2ba   : > { %v1093_v63 = vpop.permute.xlu1 %1092  ;;  %v1208_v0 = vpop.permute.xlu2 %1207  ;;  %v1636_v12 = vsel %vm470_vm10, %v1635_v2, %v1634_v46  ;;  %v1739_v62 = vsel %vm473_vm11, %v1738_v42, %v1737_v61  ;;  %v1726_v2 = vrot.slane %v2465_v39, 2  ;;  %v1970_v46 = vrot.slane %v3402_v9, 4  ;;  %v3511_v9 = vld [vmem:[#allocation2 + $0x3b] sm:$0x1] }
 0x2bb   : > { %1096 = vst.msk [vmem:[#allocation3] sm:$0xf] %vm1095_vm5, %v1093_v63  ;;  %v1110_v4 = vpop.permute.xlu0 %1109  ;;  %v1638_v13 = vsel %vm473_vm11, %v1637_v3, %v1636_v12  ;;  %v1724_v63 = vrot.slane %v2464_v35, 3  ;;  %v2071_v30 = vrot.slane %v3451_v56, 4 }
 0x2bc   : > { %1211 = vst.msk [vmem:[#allocation3] sm:$0xf0] %vm3838_vm2, %v1208_v0 }
 0x2bd   : > { %1112 = vst.msk [vmem:[#allocation3 + $0x10] sm:$0xf] %vm1095_vm5, %v1110_v4  ;;  %v1971_v4 = vrot.slane %v3379_v33, 3  ;;  %v1725_v11 = vsel %vm480_vm6, %v1724_v63, %v1723_v5  ;;  %v1499_v5 = vrot.slane %v3457_v31, 3 }
 0x2be   : > { %v1727_v12 = vsel %vm483_vm8, %v1726_v2, %v1725_v11  ;;  %v1503_v11 = vrot.slane %v3469_v48, 1 }
 0x2bf   : > { %v1972_v33 = vsel %vm480_vm6, %v1971_v4, %v1970_v46  ;;  %v1498_v46 = vrot.slane %v3478_v27, 4 }
 0x2c0   : > { %1427 = vrot.lane.b32.xlu1 %v3338_v57, %s2730_s4  ;;  %1639 = vrot.lane.b32.xlu2 %v1638_v13, %s2737_s11  ;;  %v1872_v57 = vrot.slane %v3340_v58, 2  ;;  %v2062_v58 = vsel %vm467_vm7, %v2061_v23, %v3451_v56  ;;  %s3846_s4 = smov 80   ;;  %v3508_v13 = vsel %vm486_vm9, %v1728_v7, %v1727_v12  ;;  %v1974_v44 = vsel %vm483_vm8, %v1973_v10, %v1972_v33  ;;  %v3566_v56 = vld [vmem:[#allocation2 + $0x54] sm:$0x1]  ;;  %v3579_v12 = vld [vmem:[#allocation2 + $0xc] sm:$0x1] }
 0x2c1   : > { %1643 = vrot.lane.b32.xlu0 %v3432_v16, %s2738_s18  ;;  %v2064_v32 = vsel %vm470_vm10, %v2063_v24, %v2062_v58  ;;  %v1589_v23 = vrot.slane %v3505_v8, 7  ;;  %v1591_v24 = vrot.slane %v3511_v9, 6  ;;  %v1500_v27 = vsel %vm480_vm6, %v1499_v5, %v1498_v46 }
 0x2c2   : > { %v1129_v21 = vpop.permute.xlu1 %1128  ;;  %v1242_v22 = vpop.permute.xlu2 %1241  ;;  %v1873_v6 = vsel %vm483_vm8, %v1872_v57, %v1871_v29  ;;  %v3466_v38 = vsel %vm473_vm11, %v2065_v28, %v2064_v32  ;;  %v2478_v57 = vld [vmem:[#allocation2 + $0x56] sm:$0x1] }
 0x2c3   : > { %1131 = vst.msk [vmem:[#allocation3 + $0x10] sm:$0xf0] %vm1107_vm4, %v1129_v21  ;;  %v1143_v20 = vpop.permute.xlu0 %1142  ;;  %v1875_v60 = vsel %vm486_vm9, %v1874_v26, %v1873_v6  ;;  %v3518_v21 = vld [vmem:[#allocation2 + $0x53] sm:$0x1]  ;;  %v1835_v26 = vrot.slane %v2476_v19, 7  ;;  %v1839_v6 = vrot.slane %v2478_v57, 5 }
 0x2c4   : > { %1244 = vst.msk [vmem:[#allocation3 + $0x20] sm:$0xf] %vm1198_vm0, %v1242_v22  ;;  %v2477_v22 = vld [vmem:[#allocation2 + $0x3e] sm:$0x1]  ;;  %v1593_v29 = vrot.slane %v3518_v21, 5  ;;  %v1829_v52 = vrot.slane %v2478_v57, 1 }
 0x2c5   : > { %1145 = vst.msk [vmem:[#allocation3 + $0x20] sm:$0xf0] %vm1107_vm4, %v1143_v20  ;;  %v1837_v58 = vrot.slane %v2477_v22, 6 }
 0x2c8   : > { %1865 = vrot.lane.b32.xlu1 %v3368_v15, %s3846_s4  ;;  %1876 = vrot.lane.b32.xlu2 %v1875_v60, %s3847_s6  ;;  %v2475_v60 = vld [vmem:[#allocation2 + $0xe] sm:$0x1] }
 0x2c9   : > { %2082 = vrot.lane.b32.xlu0 %v3466_v38, %s3836_s21  ;;  %s3849_s21 = smov 95   ;;  %v1836_v39 = vsel %vm467_vm7, %v1835_v26, %v2475_v60  ;;  %v1824_v51 = vrot.slane %v2475_v60, 4 }
 0x2ca   : > { %v1163_v43 = vpop.permute.xlu1 %1162  ;;  %v1277_v45 = vpop.permute.xlu2 %1276  ;;  %v1838_v41 = vsel %vm470_vm10, %v1837_v58, %v1836_v39 }
 0x2cb   : > { %1165 = vst.msk [vmem:[#allocation3 + $0x30] sm:$0xf] %vm1095_vm5, %v1163_v43  ;;  %v1178_v15 = vpop.permute.xlu0 %1177  ;;  %v1840_v43 = vsel %vm473_vm11, %v1839_v6, %v1838_v41 }
 0x2cc   : > { %1279 = vst.msk [vmem:[#allocation3 + $0x30] sm:$0xf0] %vm3838_vm2, %v1277_v45  ;;  %v1825_v45 = vrot.slane %v2476_v19, 3 }
 0x2cd   : > { %1180 = vst.msk [vmem:[#allocation3 + $0x40] sm:$0xf] %vm1095_vm5, %v1178_v15  ;;  %v1827_v15 = vrot.slane %v2477_v22, 2 }
 0x2ce   : > { %v1826_v55 = vsel %vm480_vm6, %v1825_v45, %v1824_v51  ;;  %v3611_v51 = vld [vmem:[#allocation2 + $0x3d] sm:$0x1] }
 0x2cf   : > { %v1828_v61 = vsel %vm483_vm8, %v1827_v15, %v1826_v55  ;;  %v1793_v55 = vrot.slane %v3611_v51, 6 }
 0x2d0   : > { %1509 = vrot.lane.b32.xlu1 %v3486_v59, %s2735_s9  ;;  %1528 = vrot.lane.b32.xlu2 %v3383_v36, %s2733_s7  ;;  %v1975_v36 = vrot.slane %v3390_v37, 1  ;;  %s3848_s9 = smov 96   ;;  %v3553_v14 = vsel %vm486_vm9, %v1829_v52, %v1828_v61  ;;  %v1602_v61 = vrot.slane %v3511_v9, 2 }
 0x2d1   : > { %1740 = vrot.lane.b32.xlu0 %v1739_v62, %s3844_s30  ;;  %v2073_v62 = vsel %vm480_vm6, %v2072_v50, %v2071_v30 }
 0x2d2   : > { %v1196_v0 = vpop.permute.xlu1 %1195  ;;  %v1312_v1 = vpop.permute.xlu2 %1311  ;;  %v1976_v37 = vsel %vm486_vm9, %v1975_v36, %v1974_v44  ;;  %v2075_v63 = vsel %vm483_vm8, %v2074_v53, %v2073_v62  ;;  %v1694_v36 = vrot.slane %v3566_v56, 5 }
 0x2d3   : > { %1199 = vst.msk [vmem:[#allocation3] sm:$0xf] %vm1198_vm0, %v1196_v0  ;;  %v1213_v3 = vpop.permute.xlu0 %1212  ;;  %v3556_v0 = vld [vmem:[#allocation2 + $0x24] sm:$0x1] }
 0x2d4   : > { %1314 = vst.msk [vmem:[#allocation3 + $0x18] sm:$0xf] %vm476_vm12, %v1312_v1  ;;  %v1690_v4 = vrot.slane %v3556_v0, 7 }
 0x2d5   : > { %1215 = vst.msk [vmem:[#allocation3 + $0x10] sm:$0xf] %vm1198_vm0, %v1213_v3 }
 0x2d8   : > { %1744 = vrot.lane.b32.xlu1 %v3508_v13, %s2741_s29  ;;  %1966 = vrot.lane.b32.xlu2 %v3412_v54, %s3848_s9  ;;  %v3526_v54 = vld [vmem:[#allocation2 + $0xb] sm:$0x1] }
 0x2d9   : > { %1977 = vrot.lane.b32.xlu0 %v1976_v37, %s3849_s21  ;;  %v1590_v32 = vsel %vm467_vm7, %v1589_v23, %v3526_v54  ;;  %v2488_v37 = vld [vmem:[#allocation2 + $0x27] sm:$0x1]  ;;  %v2489_v23 = vld [vmem:[#allocation2 + $0x3f] sm:$0x1]  ;;  %v1599_v62 = vrot.slane %v3526_v54, 4 }
 0x2da   : > { %v1232_v25 = vpop.permute.xlu1 %1231  ;;  %v1372_v20 = vpop.permute.xlu2 %1371  ;;  %v1592_v35 = vsel %vm470_vm10, %v1591_v24, %v1590_v32  ;;  %v2087_v58 = vld [vmem:[#allocation3] sm:$0xff]  ;;  %v1928_v6 = vrot.slane %v2489_v23, 2  ;;  %v1938_v32 = vrot.slane %v2489_v23, 6  ;;  %v2500_v54 = vld [vmem:[#allocation2 + $0x28] sm:$0x1] }
 0x2db   : > { %1234 = vst.msk [vmem:[#allocation3 + $0x10] sm:$0xf0] %vm3838_vm2, %v1232_v25  ;;  %v1246_v28 = vpop.permute.xlu0 %1245  ;;  %v3534_v40 = vsel %vm473_vm11, %v1593_v29, %v1592_v35  ;;  %v2487_v25 = vld [vmem:[#allocation2 + $0xf] sm:$0x1]  ;;  %v1936_v29 = vrot.slane %v2488_v37, 7 }
 0x2dc   : > { %1374 = vst.msk [vmem:[#allocation3 + $0x38] sm:$0xf0] %vm491_vm13, %v1372_v20  ;;  %v2490_v20 = vld [vmem:[#allocation2 + $0x57] sm:$0x1]  ;;  %v1925_v60 = vrot.slane %v2487_v25, 4 }
 0x2dd   : > { %1248 = vst.msk [vmem:[#allocation3 + $0x20] sm:$0xf0] %vm3838_vm2, %v1246_v28  ;;  %vm2107_vm2 = vcmask 1043456   ;;  %v1926_v28 = vrot.slane %v2488_v37, 3  ;;  %v1930_v35 = vrot.slane %v2490_v20, 1  ;;  %v1940_v39 = vrot.slane %v2490_v20, 5 }
 0x2df   : > { %v1927_v41 = vsel %vm480_vm6, %v1926_v28, %v1925_v60  ;;  %v1700_v60 = vrot.slane %v3579_v12, 4 }
 0x2e0   : > { %1610 = vrot.lane.b32.xlu1 %v3534_v40, %s2738_s18  ;;  %1629 = vrot.lane.b32.xlu2 %v3432_v16, %s2736_s10  ;;  %v2076_v16 = vrot.slane %v3439_v18, 1  ;;  %v3563_v18 = vld [vmem:[#allocation2 + $0x3c] sm:$0x1]  ;;  %v1929_v45 = vsel %vm483_vm8, %v1928_v6, %v1927_v41  ;;  %v2483_v41 = vld [vmem:[#allocation2 + $0xe] sm:$0x1] }
 0x2e1   : > { %1841 = vrot.lane.b32.xlu0 %v1840_v43, %s3847_s6  ;;  %v1692_v10 = vrot.slane %v3563_v18, 6  ;;  %v1937_v43 = vsel %vm467_vm7, %v1936_v29, %v2487_v25  ;;  %v3608_v15 = vsel %vm486_vm9, %v1930_v35, %v1929_v45 }
 0x2e2   : > { %v1266_v47 = vpop.permute.xlu1 %1265  ;;  %v1405_v49 = vpop.permute.xlu2 %1404  ;;  %v2077_v17 = vsel %vm486_vm9, %v2076_v16, %v2075_v63  ;;  %v2089_v57 = vld [vmem:[#allocation3 + $0x10] sm:$0xff] }
 0x2e3   : > { %1268 = vst.msk [vmem:[#allocation3 + $0x30] sm:$0xf] %vm1198_vm0, %v1266_v47  ;;  %v1281_v42 = vpop.permute.xlu0 %1280  ;;  %v1939_v47 = vsel %vm470_vm10, %v1938_v32, %v1937_v43  ;;  %v1703_v32 = vrot.slane %v3563_v18, 2 }
 0x2e4   : > { %1283 = vst.msk [vmem:[#allocation3 + $0x40] sm:$0xf] %vm1198_vm0, %v1281_v42  ;;  %v2091_v33 = vld [vmem:[#allocation3 + $0x20] sm:$0xff]  ;;  %v1941_v50 = vsel %vm473_vm11, %v1940_v39, %v1939_v47  ;;  %v3616_v42 = vld [vmem:[#allocation2 + $0x55] sm:$0x1]  ;;  %v1705_v39 = vrot.slane %v3566_v56, 1 }
 0x2e5   : > { %v1795_v63 = vrot.slane %v3616_v42, 5 }
 0x2e8   : > { %1845 = vrot.lane.b32.xlu1 %v3553_v14, %s2744_s23  ;;  %2067 = vrot.lane.b32.xlu2 %v3466_v38, %s2748_s22  ;;  %v1501_v38 = vrot.slane %v3461_v34, 2  ;;  %v1691_v34 = vsel %vm467_vm7, %v1690_v4, %v3579_v12 }
 0x2e9   : > { %2078 = vrot.lane.b32.xlu0 %v2077_v17, %s2749_s28  ;;  %v1693_v44 = vsel %vm470_vm10, %v1692_v10, %v1691_v34  ;;  %v1604_v17 = vrot.slane %v3518_v21, 1  ;;  %v2502_v10 = vld [vmem:[#allocation2 + $0x58] sm:$0x1] }
 0x2ea   : > { %v1308_v1 = vpop.permute.xlu1 %1307  ;;  %v1462_v2 = vpop.permute.xlu2 %1461  ;;  %v2093_v31 = vld [vmem:[#allocation3 + $0x30] sm:$0xff]  ;;  %v1502_v19 = vsel %vm483_vm8, %v1501_v38, %v1500_v27  ;;  %v3590_v48 = vsel %vm473_vm11, %v1694_v36, %v1693_v44  ;;  %v2027_v36 = vrot.slane %v2500_v54, 3  ;;  %v2041_v44 = vrot.slane %v2502_v10, 5 }
 0x2eb   : > { %1310 = vst.msk [vmem:[#allocation3 + $0x8] sm:$0xf0] %vm491_vm13, %v1308_v1  ;;  %v1339_v3 = vpop.permute.xlu0 %1338  ;;  %v2095_v7 = vld [vmem:[#allocation3 + $0x40] sm:$0xf]  ;;  %v1504_v22 = vsel %vm486_vm9, %v1503_v11, %v1502_v19  ;;  %v3628_v1 = vld [vmem:[#allocation2 + $0xd] sm:$0x1] }
 0x2ec   : > { %1407 = vst.msk [vmem:[#allocation3 + $0x8] sm:$0xf0] %vm592_vm14, %v1405_v49  ;;  %2507 = vmatpush.msk.msra.mxu0 %vm2107_vm2, %v2095_v7  ;;  %v3603_v49 = vld [vmem:[#allocation2 + $0x25] sm:$0x1]  ;;  %v2499_v7 = vld [vmem:[#allocation2 + $0x10] sm:$0x1] }
 0x2ed   : > { %1464 = vst.msk [vmem:[#allocation3 + $0x38] sm:$0xf] %vm580_vm15, %v1462_v2  ;;  %v1791_v30 = vrot.slane %v3603_v49, 7  ;;  %v2037_v11 = vrot.slane %v2500_v54, 7  ;;  %v2026_v27 = vrot.slane %v2499_v7, 4 }
 0x2ee   : > { %1341 = vst.msk [vmem:[#allocation3 + $0x28] sm:$0xf] %vm476_vm12, %v1339_v3  ;;  %2126 = vmatpush.msra.mxu0 %v2093_v31  ;;  %v2501_v3 = vld [vmem:[#allocation2 + $0x40] sm:$0x1] }
 0x2ef   : > { %v2029_v31 = vrot.slane %v2501_v3, 2  ;;  %v2039_v34 = vrot.slane %v2501_v3, 6  ;;  %v2028_v19 = vsel %vm480_vm6, %v2027_v36, %v2026_v27  ;;  %v2038_v37 = vsel %vm467_vm7, %v2037_v11, %v2499_v7 }
 0x2f0   : > { %2127 = vmatpush.msra.mxu0 %v2091_v33  ;;  %1494 = vrot.lane.b32.xlu1 %v3486_v59, %s2733_s7  ;;  %v2031_v33 = vrot.slane %v2502_v10, 1  ;;  %s3850_s7 = smov 110  }
 0x2f1   : > { %1711 = vrot.lane.b32.xlu0 %v3590_v48, %s2741_s29  ;;  %1505 = vrot.lane.b32.xlu2 %v1504_v22, %s2734_s8  ;;  %v2030_v22 = vsel %vm483_vm8, %v2029_v31, %v2028_v19  ;;  %v2040_v23 = vsel %vm470_vm10, %v2039_v34, %v2038_v37  ;;  %s2517_s29 = sshll.u32 %s2714_s15, 4  ;;  %s2660_s8 = scalar_lea.hbm %s3815_s3, 32 }
 0x2f2   : > { %2128 = vmatpush.msra.mxu0 %v2089_v57  ;;  %v1343_v24 = vpop.permute.xlu1 %1342  ;;  %v1563_v26 = vpop.permute.xlu2 %1562  ;;  %v3650_v57 = vld [vmem:[#allocation2 + $0x26] sm:$0x1]  ;;  %v2032_v25 = vsel %vm486_vm9, %v2031_v33, %v2030_v22  ;;  %v2042_v20 = vsel %vm473_vm11, %v2041_v44, %v2040_v23 }
 0x2f3   : > { %1345 = vst.msk [vmem:[#allocation3 + $0x28] sm:$0xf0] %vm491_vm13, %v1343_v24  ;;  %v1376_v59 = vpop.permute.xlu0 %1375  ;;  %v3656_v24 = vld [vmem:[#allocation2 + $0x3e] sm:$0x1]  ;;  %vm3852_vm13 = vcmask 523652  }
 0x2f4   : > { %1565 = vst.msk [vmem:[#allocation3 + $0x38] sm:$0xf] %vm683_vm1, %v1563_v26  ;;  %2129 = vmatpush.msra.mxu0 %v2087_v58  ;;  %v3660_v26 = vld [vmem:[#allocation2 + $0x56] sm:$0x1]  ;;  %v1701_v58 = vrot.slane %v3556_v0, 3  ;;  %v1894_v6 = vrot.slane %v3656_v24, 6 }
 0x2f5   : > { %1378 = vst.msk [vmem:[#allocation3 + $0x48] sm:$0xf] %vm476_vm12, %v1376_v59  ;;  %v1892_v59 = vrot.slane %v3650_v57, 7  ;;  %vm3851_vm12 = vcmask 392452   ;;  %v1896_v35 = vrot.slane %v3660_v26, 5  ;;  %v1905_v7 = vrot.slane %v3656_v24, 2 }
 0x2f6   : > { %v1702_v43 = vsel %vm480_vm6, %v1701_v58, %v1700_v60  ;;  %v1907_v36 = vrot.slane %v3660_v26, 1 }
 0x2f7   : > { %v1893_v0 = vsel %vm467_vm7, %v1892_v59, %v2483_v41  ;;  %v1704_v47 = vsel %vm483_vm8, %v1703_v32, %v1702_v43 }
 0x2f8   : > { %1730 = vrot.lane.b32.xlu1 %v3508_v13, %s3843_s24  ;;  %v1600_v13 = vrot.slane %v3505_v8, 3  ;;  %v1792_v8 = vsel %vm467_vm7, %v1791_v30, %v3628_v1  ;;  %v1895_v45 = vsel %vm470_vm10, %v1894_v6, %v1893_v0  ;;  %v1706_v12 = vsel %vm486_vm9, %v1705_v39, %v1704_v47 }
 0x2f9   : > { %1946 = vrot.lane.b32.xlu0 %v3608_v15, %s3845_s5  ;;  %1942 = vrot.lane.b32.xlu2 %v1941_v50, %s3849_s21  ;;  %v1794_v4 = vsel %vm470_vm10, %v1793_v55, %v1792_v8  ;;  %v1897_v18 = vsel %vm473_vm11, %v1896_v35, %v1895_v45  ;;  %v1804_v30 = vrot.slane %v3611_v51, 2  ;;  %v2496_v55 = vld [vmem:[#allocation2 + $0x27] sm:$0x1]  ;;  %v2498_v51 = vld [vmem:[#allocation2 + $0x57] sm:$0x1] }
 0x2fa   : > { %v1394_v52 = vpop.permute.xlu1 %1393  ;;  %v1438_v53 = vpop.permute.xlu2 %1437  ;;  %v1601_v2 = vsel %vm480_vm6, %v1600_v13, %v1599_v62  ;;  %v3638_v5 = vsel %vm473_vm11, %v1795_v63, %v1794_v4  ;;  %v1801_v13 = vrot.slane %v3628_v1, 4  ;;  %v2497_v62 = vld [vmem:[#allocation2 + $0x3f] sm:$0x1]  ;;  %v2495_v4 = vld [vmem:[#allocation2 + $0xf] sm:$0x1]  ;;  %v2004_v10 = vrot.slane %v2496_v55, 3 }
 0x2fb   : > { %1396 = vst.msk [vmem:[#allocation3 + $0x8] sm:$0xf] %vm580_vm15, %v1394_v52  ;;  %v1477_v16 = vpop.permute.xlu0 %1476  ;;  %v1603_v9 = vsel %vm483_vm8, %v1602_v61, %v1601_v2  ;;  %v1802_v52 = vrot.slane %v3603_v49, 3  ;;  %v1995_v1 = vrot.slane %v2497_v62, 6  ;;  %v1997_v2 = vrot.slane %v2498_v51, 5 }
 0x2fc   : > { %1440 = vst.msk [vmem:[#allocation3 + $0x28] sm:$0xf] %vm580_vm15, %v1438_v53  ;;  %v1605_v21 = vsel %vm486_vm9, %v1604_v17, %v1603_v9  ;;  %v2006_v11 = vrot.slane %v2497_v62, 2  ;;  %v2008_v31 = vrot.slane %v2498_v51, 1 }
 0x2fd   : > { %1479 = vst.msk [vmem:[#allocation3 + $0x48] sm:$0xf] %vm580_vm15, %v1477_v16  ;;  %v1803_v16 = vsel %vm480_vm6, %v1802_v52, %v1801_v13 }
 0x2fe   : > { %v1805_v61 = vsel %vm483_vm8, %v1804_v30, %v1803_v16 }
 0x300   : > { %1595 = vrot.lane.b32.xlu1 %v3534_v40, %s2736_s10 }
 0x301   : > { %1812 = vrot.lane.b32.xlu0 %v3638_v5, %s2744_s23  ;;  %1606 = vrot.lane.b32.xlu2 %v1605_v21, %s2737_s11 }
 0x302   : > { %v1578_v38 = vpop.permute.xlu1 %1577  ;;  %v1675_v46 = vpop.permute.xlu2 %1674 }
 0x303   : > { %1580 = vst.msk [vmem:[#allocation3 + $0x48] sm:$0xf] %vm683_vm1, %v1578_v38  ;;  %v1473_v40 = vpop.permute.xlu0 %1472  ;;  %v1902_v38 = vrot.slane %v2483_v41, 4 }
 0x304   : > { %1475 = vst.msk [vmem:[#allocation3 + $0x38] sm:$0xf0] %vm592_vm14, %v1473_v40  ;;  %v2003_v40 = vrot.slane %v2495_v4, 4 }
 0x306   : > { %v2005_v33 = vsel %vm480_vm6, %v2004_v10, %v2003_v40 }
 0x307   : > { %v2007_v19 = vsel %vm483_vm8, %v2006_v11, %v2005_v33 }
 0x308   : > { %1831 = vrot.lane.b32.xlu1 %v3553_v14, %s3846_s4  ;;  %v2009_v37 = vsel %vm486_vm9, %v2008_v31, %v2007_v19 }
 0x309   : > { %2047 = vrot.lane.b32.xlu0 %v2032_v25, %s3850_s7  ;;  %2043 = vrot.lane.b32.xlu2 %v2042_v20, %s2749_s28 }
 0x30a   : > { %v1679_v28 = vpop.permute.xlu1 %1678  ;;  %v1543_v29 = vpop.permute.xlu2 %1542 }
 0x30b   : > { %1681 = vst.msk [vmem:[#allocation3 + $0x48] sm:$0xf] %vm786_vm3, %v1679_v28  ;;  %v1574_v14 = vpop.permute.xlu0 %1573 }
 0x30c   : > { %1576 = vst.msk [vmem:[#allocation3 + $0x38] sm:$0xf0] %vm3851_vm12, %v1574_v14  ;;  %vm3853_vm12 = vcmask 650752  }
 0x30d   : > { %1677 = vst.msk [vmem:[#allocation3 + $0x38] sm:$0xf0] %vm3852_vm13, %v1675_v46  ;;  %vm3854_vm13 = vcmask 392452  }
 0x310   : > { %1696 = vrot.lane.b32.xlu1 %v3590_v48, %s3843_s24  ;;  %v1806_v48 = vrot.slane %v3616_v42, 1  ;;  %v1993_v42 = vrot.slane %v2496_v55, 7  ;;  %s2170_s24 = scalar_lea.hbm %s3815_s3, %s2517_s29 }
 0x311   : > { %1913 = vrot.lane.b32.xlu0 %v1897_v18, %s3845_s5  ;;  %1707 = vrot.lane.b32.xlu2 %v1706_v12, %s3844_s30  ;;  %s2174_s5 = sshll.u32 %s2170_s24, 4  ;;  %s2175_s5 = int_to_ptr.hbm [resolvable:$true] %s2174_s5 }
 0x312   : > { %v1780_v56 = vpop.permute.xlu1 %1779  ;;  %v1982_v50 = vpop.permute.xlu2 %1981  ;;  %v1807_v49 = vsel %vm486_vm9, %v1806_v48, %v1805_v61 }
 0x313   : > { %1782 = vst.msk [vmem:[#allocation3 + $0x48] sm:$0xf] %vm3853_vm12, %v1780_v56  ;;  %v1442_v53 = vpop.permute.xlu0 %1441  ;;  %vm3855_vm12 = vcmask 781952  }
 0x314   : > { %1444 = vst.msk [vmem:[#allocation3 + $0x28] sm:$0xf0] %vm592_vm14, %v1442_v53 }
 0x315   : > { %1545 = vst.msk [vmem:[#allocation3 + $0x28] sm:$0xf0] %vm3854_vm13, %v1543_v29 }
 0x318   : > { %1932 = vrot.lane.b32.xlu1 %v3608_v15, %s3848_s9  ;;  %v1994_v15 = vsel %vm467_vm7, %v1993_v42, %v2495_v4  ;;  %vm3856_vm7 = vcmask 650752   ;;  %v2086_v42 = vld [vmem:[%s3813_s1] sm:$0xff] }
 0x319   : > { %1808 = vrot.lane.b32.xlu0 %v1807_v49, %s3847_s6  ;;  %1797 = vrot.lane.b32.xlu2 %v3638_v5, %s3846_s4  ;;  %v1996_v9 = vsel %vm470_vm10, %v1995_v1, %v1994_v15  ;;  %v1903_v5 = vrot.slane %v3650_v57, 3  ;;  %vm3857_vm10 = vcmask 654852   ;;  %s2157_s4 = scalar_lea.sflag [#allocation6], %s2846_s19  ;;  %s2654_s6 = sshra.s32 %s2175_s5, 4  ;;  %s2655_s6 = int_to_ptr.hbm [resolvable:$true] %s2654_s6 }
 0x31a   : > { %v1664_v63 = vpop.permute.xlu1 %1663  ;;  %v1640_v17 = vpop.permute.xlu2 %1639  ;;  %v1998_v54 = vsel %vm473_vm11, %v1997_v2, %v1996_v9  ;;  %vm3858_vm11 = vcmask 786052   ;;  %p2661_p7 = scmp.lt.s32.totalorder %s2655_s6, %s3815_s3 }
 0x31b   : > { %1666 = vst.msk [vmem:[#allocation3 + $0x38] sm:$0xf] %vm786_vm3, %v1664_v63  ;;  %v1881_v8 = vpop.permute.xlu0 %1880  ;;  %v1904_v34 = vsel %vm480_vm6, %v1903_v5, %v1902_v38  ;;  %vm3859_vm6 = vmmov %vm3854_vm13  ;;  %v2097_v63 = vld [vmem:[%s3814_s2] sm:$0xff] }
 0x31c   : > { %1883 = vst.msk [vmem:[#allocation3 + $0x48] sm:$0xf] %vm3855_vm12, %v1881_v8  ;;  %v1906_v27 = vsel %vm483_vm8, %v1905_v7, %v1904_v34  ;;  %vm3860_vm8 = vcmask 523652  }
 0x31d   : > { %1984 = vst.msk [vmem:[#allocation3 + $0x48] sm:$0xf] %vm1095_vm5, %v1982_v50  ;;  %v1908_v44 = vsel %vm486_vm9, %v1907_v36, %v1906_v27  ;;  %vm3861_vm9 = vmmov %vm3855_vm12 }
 0x31e   : > { %vm3862_vm13 = vmmov %vm3860_vm8 }
 0x31f   : > { %vm3865_vm12 = vmmov %vm3859_vm6 }
 0x320   : > { %2014 = vrot.lane.b32.xlu1 %v1998_v54, %s3850_s7 }
 0x321   : > { %1898 = vrot.lane.b32.xlu0 %v1897_v18, %s3848_s9  ;;  %2033 = vrot.lane.b32.xlu2 %v2032_v25, %s2748_s22  ;;  %s2656_s9 = scalar_lea.hbm %s2655_s6, 16 }
 0x322   : > { %v1539_v21 = vpop.permute.xlu1 %1538  ;;  %v1877_v3 = vpop.permute.xlu2 %1876  ;;  %p2657_p4 = scmp.ne.s32.totalorder %s2655_s6, %s2656_s9  ;;  %p2662_p8 = scmp.lt.s32.totalorder %s2660_s8, %s2656_s9 }
 0x323   : > { %1541 = vst.msk [vmem:[#allocation3 + $0x28] sm:$0xf] %vm683_vm1, %v1539_v21  ;;  %v1765_v46 = vpop.permute.xlu0 %1764 }
 0x324   : > { %1642 = vst.msk [vmem:[#allocation3 + $0x28] sm:$0xf] %vm786_vm3, %v1640_v17  ;;  %v2751_v17 = vmov 0   ;;  %p2658_p5 = pnand %p2657_p4, %p2823_p9  ;;  %p2663_p10 = por %p2662_p8, %p2661_p7 }
 0x325   : > { %1767 = vst.msk [vmem:[#allocation3 + $0x38] sm:$0xf] %vm3856_vm7, %v1765_v46  ;;  %2608 = vset.pattern.permute.xlu1 %v2751_v17  ;;  %2609 = vset.pattern.permute.xlu0 %v2751_v17 }
 0x326   : > { %p2659_p6 = pneg %p2658_p5 }
 0x328   : > { %1909 = vrot.lane.b32.xlu1 %v1908_v44, %s3849_s21  ;;  %s2318_s21 = sshll.u32 %s2846_s19, 4  ;;  %p2664_p13 = pnand %p2663_p10, %p2659_p6 }
 0x329   : > { %2010 = vrot.lane.b32.xlu0 %v2009_v37, %s2749_s28  ;;  %1999 = vrot.lane.b32.xlu2 %v1998_v54, %s2748_s22  ;;  %s204_s23 = scalar_lea.vmem [#allocation7], %s2318_s21 }
 0x32a   : > { %v1776_v22 = vpop.permute.xlu1 %1775  ;;  %v1529_v23 = vpop.permute.xlu2 %1528  ;;  %s2172_s30 = sshll.u32 %s204_s23, 4  ;;  %s2173_s30 = int_to_ptr.vmem [resolvable:$true] %s2172_s30 }
 0x32b   : > { %1778 = vst.msk [vmem:[#allocation3 + $0x38] sm:$0xf0] %vm3857_vm10, %v1776_v22  ;;  %v1409_v57 = vpop.permute.xlu0 %1408 }
 0x32c   : > { %1879 = vst.msk [vmem:[#allocation3 + $0x38] sm:$0xf0] %vm3858_vm11, %v1877_v3 }
 0x32d   : > { %1411 = vst.msk [vmem:[#allocation3 + $0x18] sm:$0xf] %vm580_vm15, %v1409_v57  ;;  %vm3864_vm15 = vmmov %vm3857_vm10 }
 0x32e   : > { %vm3868_vm10 = vmmov %vm3860_vm8 }
 0x330   : > { %2100 = vperm.xlu1 %2608, %v2097_v63  }
 0x332   : > { %v1428_v25 = vpop.permute.xlu1 %1427  ;;  %v1967_v20 = vpop.permute.xlu2 %1966 }
 0x333   : > { %1430 = vst.msk [vmem:[#allocation3 + $0x18] sm:$0xf0] %vm592_vm14, %v1428_v25  ;;  %v1644_v24 = vpop.permute.xlu0 %1643  ;;  %vm3863_vm14 = vmmov %vm3856_vm7 }
 0x334   : > { %1531 = vst.msk [vmem:[#allocation3 + $0x18] sm:$0xf0] %vm3859_vm6, %v1529_v23  ;;  %vm3866_vm7 = vmmov %vm3861_vm9 }
 0x335   : > { %1646 = vst.msk [vmem:[#allocation3 + $0x28] sm:$0xf0] %vm3860_vm8, %v1644_v24  ;;  %vm3870_vm6 = vmmov %vm3863_vm14 }
 0x336   : > { %vm3871_vm8 = vmmov %vm3864_vm15 }
 0x33a   : > { %v1866_v26 = vpop.permute.xlu1 %1865  ;;  %v1630_v28 = vpop.permute.xlu2 %1629 }
 0x33b   : > { %1868 = vst.msk [vmem:[#allocation3 + $0x38] sm:$0xf] %vm3861_vm9, %v1866_v26  ;;  %v2083_v29 = vpop.permute.xlu0 %2082  ;;  %vm3872_vm9 = vmmov %vm3871_vm8 }
 0x33c   : > { %1969 = vst.msk [vmem:[#allocation3 + $0x38] sm:$0xf] %vm1095_vm5, %v1967_v20 }
 0x33d   : > { %1632 = vst.msk [vmem:[#allocation3 + $0x18] sm:$0xf0] %vm3862_vm13, %v1630_v28 }
 0x33e   : > { %2085 = vst.msk [vmem:[#allocation3 + $0x48] sm:$0xf] %vm1198_vm0, %v2083_v29 }
 0x342   : > { %v1510_v59 = vpop.permute.xlu1 %1509  ;;  %v2068_v58 = vpop.permute.xlu2 %2067 }
 0x343   : > { %1512 = vst.msk [vmem:[#allocation3 + $0x18] sm:$0xf] %vm683_vm1, %v1510_v59  ;;  %v1741_v14 = vpop.permute.xlu0 %1740 }
 0x344   : > { %2070 = vst.msk [vmem:[#allocation3 + $0x38] sm:$0xf] %vm1198_vm0, %v2068_v58 }
 0x345   : > { %1743 = vst.msk [vmem:[#allocation3 + $0x28] sm:$0xf] %vm3863_vm14, %v1741_v14  ;;  %v2096_v6 = vld [vmem:[#allocation3 + $0x48] sm:$0xf] }
 0x346   : > { %2509 = vmatpush.msk.msra.mxu1 %vm2107_vm2, %v2096_v6  ;;  %vm3867_vm2 = vmmov %vm3858_vm11  ;;  %vm3869_vm11 = vcmask 1048452  }
 0x347   : > { %vm3874_vm13 = vmmov %vm3867_vm2 }
 0x348   : > { %vm3875_vm14 = vmmov %vm3869_vm11 }
 0x34a   : > { %v1745_v32 = vpop.permute.xlu1 %1744 }
 0x34b   : > { %1747 = vst.msk [vmem:[#allocation3 + $0x28] sm:$0xf0] %vm3864_vm15, %v1745_v32  ;;  %v1506_v60 = vpop.permute.xlu2 %1505  ;;  %v1978_v35 = vpop.permute.xlu0 %1977  ;;  %vm3876_vm15 = vmmov %vm3870_vm6 }
 0x34c   : > { %1508 = vst.msk [vmem:[#allocation3 + $0x8] sm:$0xf0] %vm3865_vm12, %v1506_v60 }
 0x34d   : > { %1980 = vst.msk [vmem:[#allocation3 + $0x38] sm:$0xf0] %vm1107_vm4, %v1978_v35 }
 0x352   : > { %v1611_v39 = vpop.permute.xlu1 %1610 }
 0x353   : > { %1613 = vst.msk [vmem:[#allocation3 + $0x18] sm:$0xf] %vm786_vm3, %v1611_v39  ;;  %v1943_v41 = vpop.permute.xlu2 %1942  ;;  %v1842_v0 = vpop.permute.xlu0 %1841 }
 0x354   : > { %1844 = vst.msk [vmem:[#allocation3 + $0x28] sm:$0xf] %vm3866_vm7, %v1842_v0 }
 0x355   : > { %1945 = vst.msk [vmem:[#allocation3 + $0x28] sm:$0xf] %vm1095_vm5, %v1943_v41 }
 0x35a   : > { %v1846_v43 = vpop.permute.xlu1 %1845 }
 0x35b   : > { %1848 = vst.msk [vmem:[#allocation3 + $0x28] sm:$0xf0] %vm3867_vm2, %v1846_v43  ;;  %v1607_v45 = vpop.permute.xlu2 %1606  ;;  %v2079_v47 = vpop.permute.xlu0 %2078 }
 0x35c   : > { %1609 = vst.msk [vmem:[#allocation3 + $0x8] sm:$0xf0] %vm3868_vm10, %v1607_v45 }
 0x35d   : > { %2081 = vst.msk [vmem:[#allocation3 + $0x38] sm:$0xf0] %vm3869_vm11, %v2079_v47 }
 0x362   : > { %v1495_v18 = vpop.permute.xlu1 %1494 }
 0x363   : > { %1497 = vst.msk [vmem:[#allocation3 + $0x8] sm:$0xf] %vm683_vm1, %v1495_v18  ;;  %v2044_v12 = vpop.permute.xlu2 %2043  ;;  %v1712_v56 = vpop.permute.xlu0 %1711  ;;  %vm3873_vm1 = vmmov %vm3866_vm7 }
 0x364   : > { %2046 = vst.msk [vmem:[#allocation3 + $0x28] sm:$0xf] %vm1198_vm0, %v2044_v12  ;;  %v2094_v50 = vld [vmem:[#allocation3 + $0x38] sm:$0xff]  ;;  %vm3877_vm12 = vmmov %vm3873_vm1 }
 0x365   : > { %1714 = vst.msk [vmem:[#allocation3 + $0x18] sm:$0xf] %vm3870_vm6, %v1712_v56  ;;  %2146 = vmatpush.msra.mxu1 %v2094_v50  ;;  %vm3878_vm7 = vmmov %vm3869_vm11 }
 0x366   : > { %vm3879_vm10 = vmmov %vm3878_vm7 }
 0x36a   : > { %v1731_v52 = vpop.permute.xlu1 %1730 }
 0x36b   : > { %1733 = vst.msk [vmem:[#allocation3 + $0x18] sm:$0xf0] %vm3871_vm8, %v1731_v52  ;;  %v1708_v53 = vpop.permute.xlu2 %1707  ;;  %v1947_v30 = vpop.permute.xlu0 %1946 }
 0x36c   : > { %1710 = vst.msk [vmem:[#allocation3 + $0x8] sm:$0xf0] %vm3872_vm9, %v1708_v53 }
 0x36d   : > { %1949 = vst.msk [vmem:[#allocation3 + $0x28] sm:$0xf0] %vm1107_vm4, %v1947_v30 }
 0x372   : > { %v1596_v13 = vpop.permute.xlu1 %1595 }
 0x373   : > { %1598 = vst.msk [vmem:[#allocation3 + $0x8] sm:$0xf] %vm786_vm3, %v1596_v13  ;;  %v1813_v48 = vpop.permute.xlu0 %1812  ;;  %v1798_v61 = vpop.permute.xlu2 %1797  ;;  %vm2103_vm3 = vcmask 293888  }
 0x374   : > { %1815 = vst.msk [vmem:[#allocation3 + $0x18] sm:$0xf] %vm3873_vm1, %v1813_v48  ;;  %2508 = vmatmul.msk.f32.vlgmr.msra.gmra.mxu0 %vm2103_vm3, %v2086_v42 }
 0x37a   : > { %v1832_v16 = vpop.permute.xlu1 %1831 }
 0x37b   : > { %1834 = vst.msk [vmem:[#allocation3 + $0x18] sm:$0xf0] %vm3874_vm13, %v1832_v16  ;;  %v2048_v55 = vpop.permute.xlu0 %2047  ;;  %v2034_v1 = vpop.permute.xlu2 %2033 }
 0x37c   : > { %2050 = vst.msk [vmem:[#allocation3 + $0x28] sm:$0xf0] %vm3875_vm14, %v2048_v55 }
 0x382   : > { %v1697_v62 = vpop.permute.xlu1 %1696 }
 0x383   : > { %1699 = vst.msk [vmem:[#allocation3 + $0x8] sm:$0xf] %vm3876_vm15, %v1697_v62  ;;  %v1914_v49 = vpop.permute.xlu0 %1913  ;;  %v2092_v51 = vld [vmem:[#allocation3 + $0x28] sm:$0xff]  ;;  %v2000_v9 = vpop.permute.xlu2 %1999 }
 0x384   : > { %1800 = vst.msk [vmem:[#allocation3 + $0x8] sm:$0xf] %vm3877_vm12, %v1798_v61  ;;  %2147 = vmatpush.msra.mxu1 %v2092_v51 }
 0x385   : > { %1916 = vst.msk [vmem:[#allocation3 + $0x18] sm:$0xf] %vm1095_vm5, %v1914_v49 }
 0x38a   : > { %v1933_v8 = vpop.permute.xlu1 %1932 }
 0x38b   : > { %1935 = vst.msk [vmem:[#allocation3 + $0x18] sm:$0xf0] %vm1107_vm4, %v1933_v8  ;;  %v1809_v2 = vpop.permute.xlu0 %1808 }
 0x38c   : > { %2036 = vst.msk [vmem:[#allocation3 + $0x18] sm:$0xf0] %vm3878_vm7, %v2034_v1 }
 0x38d   : > { %1811 = vst.msk [vmem:[#allocation3 + $0x8] sm:$0xf0] %vm3867_vm2, %v1809_v2 }
 0x392   : > { %v2015_v4 = vpop.permute.xlu1 %2014 }
 0x393   : > { %2017 = vst.msk [vmem:[#allocation3 + $0x18] sm:$0xf] %vm1198_vm0, %v2015_v4  ;;  %v1899_v15 = vpop.permute.xlu0 %1898 }
 0x394   : > { %1901 = vst.msk [vmem:[#allocation3 + $0x8] sm:$0xf] %vm1095_vm5, %v1899_v15 }
 0x395   : > { %2002 = vst.msk [vmem:[#allocation3 + $0x8] sm:$0xf] %vm1198_vm0, %v2000_v9 }
 0x39a   : > { %v1910_v54 = vpop.permute.xlu1 %1909  ;;  %v2090_v5 = vld [vmem:[#allocation3 + $0x18] sm:$0xff] }
 0x39b   : > { %1912 = vst.msk [vmem:[#allocation3 + $0x8] sm:$0xf0] %vm1107_vm4, %v1910_v54  ;;  %v2011_v21 = vpop.permute.xlu0 %2010  ;;  %2148 = vmatpush.msra.mxu1 %v2090_v5 }
 0x39c   : > { %2013 = vst.msk [vmem:[#allocation3 + $0x8] sm:$0xf0] %vm3879_vm10, %v2011_v21 }
 0x3a2   : > { %v2101_v7 = vpop.permute.xlu1 %2100 }
 0x3a3   : > { %v2088_v3 = vld [vmem:[#allocation3 + $0x8] sm:$0xff] }
 0x3a4   : > { %2149 = vmatpush.msra.mxu1 %v2088_v3 }
 0x3a5   : > { %2510 = vmatmul.msk.f32.vlgmr.msra.gmra.mxu1 %vm2103_vm3, %v2086_v42 }
 0x3f1   : > { %v2131_v10 = vpop.f32.mrf.mxu0 }
 0x3f2   : > { %v2132_v38 = vadd.f32 %v2131_v10, %v2101_v7 }
 0x3f4   : > { %2154 = vst [vmem:[%s204_s23] sm:$0xff] %v2132_v38 }
 0x422   : > { %v2151_v46 = vpop.f32.mrf.mxu1 }
 0x423   : > { %v2152_v36 = vadd.f32 %v2151_v46, %v2101_v7 }
 0x425   : > { %2155 = vst [vmem:[%s204_s23 + $0x8] sm:$0xff] %v2152_v36 }
 0x426   : > { %2667 = shalt.err (!%p2664_p13)
}
 0x427   : > { %2520 = dma.vmem_to_hbm [thread:$0]  (%p2823_p9), %s2173_s30, 256, %s2175_s5, %s2157_s4  }
 0x428 PF: > { %s2186_s19 = sand.u32 1, %s2702_s12   ;;  %p2527_p0 = pnand %p2312_p12, %p2830_p11 }
 0x429   : > { %s2187_s18 = scalar_lea.sflag [#allocation6], %s2186_s19 }
 0x42a   : > { %p2528_p1 = pneg %p2527_p0 }
 0x42c   : > { %2697 = dma.done.wait (%p2528_p1), %s2187_s18, 256  }
 0x42d   : > { %2699 = vsyncadd (%p2528_p1), %s2187_s18, 4294967040  ;;  %s19_s17 = sadd.s32 1, %s2722_s17   ;;  %s3880_s12 = smov %s2706_s13 }
 0x42e   : > { %p16_p2 = scmp.ge.s32.totalorder %s19_s17, 4   ;;  %s3881_s13 = smov %s2710_s14 }
 0x42f   : > { %s3882_s14 = smov %s2828_s26  ;;  %s3883_s15 = smov %s2718_s16 }
 0x430   : > { %s3884_s16 = smov %s3886_s20  ;;  %18 = sbr.rel (!%p16_p2) target bundleno = 6 (0x6), region = 99 }
 0x435   :  { %2193 = vsyncpa [#allocation5], 1 }
 0x436   :  { %2195 = vsyncpa [#allocation5 + $0x1], 1 }
 0x437   :  { %2196 = vsyncpa [#allocation6], 1 }
 0x438   :  { %2198 = vsyncpa [#allocation6 + $0x1], 1 }

</bundles_post_ra>
